<compile_context>
chip_gen: v6e
topology: v6e:2x2x1
jax: 0.10.0
libtpu: 0.0.40
codegen_flags: <defaults>
</compile_context>

<pallas_src>
import jax
import jax.numpy as jnp
from jax.experimental import pallas as pl
from jax.experimental.pallas import tpu as pltpu

LANE = 128
TM = 512  # row tile for the pointwise conv1 kernel
VMEM_LIMIT = 64 * 1024 * 1024


def _rup(x, m=LANE):
    return ((x + m - 1) // m) * m


# ---------------------------------------------------------------------------
# Pallas kernels
# ---------------------------------------------------------------------------

def _pw_bn_relu_kernel(x_ref, w_ref, s_ref, b_ref, o_ref):
    """1x1x1 conv (channel matmul) + folded BN + ReLU."""
    y = jnp.dot(x_ref[...], w_ref[...], preferred_element_type=jnp.float32)
    y = jnp.maximum(y * s_ref[...] + b_ref[...], 0.0)
    o_ref[...] = y.astype(o_ref.dtype)


def _fused_conv2_conv3_kernel(yd0_ref, yd1_ref, yd2_ref, w2_ref, s2_ref, b2_ref,
                              w3_ref, s3_ref, b3_ref, res_ref, o_ref):
    """3x3x3 conv as ONE matmul (K = 27*C1p) + BN2 + ReLU, then fused
    1x1x1 conv + BN3 + residual + ReLU — all in VMEM, single HBM write."""
    hp2, wp2, c1p = yd0_ref.shape          # (H+2, W+2, C1p) padded plane per depth tap
    H, W = hp2 - 2, wp2 - 2
    taps = []
    for ref in (yd0_ref, yd1_ref, yd2_ref):            # kd = 0, 1, 2
        for kh in range(3):
            for kw in range(3):
                taps.append(ref[kh:kh + H, kw:kw + W, :])   # (H, W, C1p) window
    t = jnp.concatenate(taps, axis=-1).reshape(H * W, 27 * c1p)   # im2col in VMEM
    y = jnp.dot(t, w2_ref[...], preferred_element_type=jnp.float32)      # (HW, C2p)
    y = jnp.maximum(y * s2_ref[...] + b2_ref[...], 0.0)
    z = jnp.dot(y.astype(w3_ref.dtype), w3_ref[...],
                preferred_element_type=jnp.float32)                      # (HW, C3p)
    z = z * s3_ref[...] + b3_ref[...] + res_ref[...]                     # f32 epilogue
    o_ref[...] = jnp.maximum(z, 0.0).astype(o_ref.dtype)


# ---------------------------------------------------------------------------
# pallas_call wrappers
# ---------------------------------------------------------------------------

def pointwise_bn_relu(x2d, w, scale, bias, *, tm=TM):
    Mp, cin = x2d.shape
    cout = w.shape[1]
    assert Mp % tm == 0
    return pl.pallas_call(
        _pw_bn_relu_kernel,
        out_shape=jax.ShapeDtypeStruct((Mp, cout), jnp.bfloat16),
        grid=(Mp // tm,),
        in_specs=[
            pl.BlockSpec((tm, cin), lambda i: (i, 0)),
            pl.BlockSpec((cin, cout), lambda i: (0, 0)),
            pl.BlockSpec((1, cout), lambda i: (0, 0)),
            pl.BlockSpec((1, cout), lambda i: (0, 0)),
        ],
        out_specs=pl.BlockSpec((tm, cout), lambda i: (i, 0)),
        compiler_params=pltpu.CompilerParams(
            dimension_semantics=("parallel",),
            vmem_limit_bytes=VMEM_LIMIT),
    )(x2d, w, scale, bias)


def fused_conv2_conv3(y1p, w2col, s2, b2, w3, s3, b3, res):
    N, dp2, hp2, wp2, c1p = y1p.shape
    D = dp2 - 2
    k2, c2p = w2col.shape
    c3p = w3.shape[1]
    HW = res.shape[2]

    def y_spec(kd):
        return pl.BlockSpec((None, None, hp2, wp2, c1p),
                            lambda n, d, kd=kd: (n, d + kd, 0, 0, 0))

    return pl.pallas_call(
        _fused_conv2_conv3_kernel,
        out_shape=jax.ShapeDtypeStruct((N, D, HW, c3p), jnp.float32),
        grid=(N, D),
        in_specs=[
            y_spec(0), y_spec(1), y_spec(2),
            pl.BlockSpec((k2, c2p), lambda n, d: (0, 0)),
            pl.BlockSpec((1, c2p), lambda n, d: (0, 0)),
            pl.BlockSpec((1, c2p), lambda n, d: (0, 0)),
            pl.BlockSpec((c2p, c3p), lambda n, d: (0, 0)),
            pl.BlockSpec((1, c3p), lambda n, d: (0, 0)),
            pl.BlockSpec((1, c3p), lambda n, d: (0, 0)),
            pl.BlockSpec((None, None, HW, c3p), lambda n, d: (n, d, 0, 0)),
        ],
        out_specs=pl.BlockSpec((None, None, HW, c3p), lambda n, d: (n, d, 0, 0)),
        compiler_params=pltpu.CompilerParams(
            dimension_semantics=("parallel", "parallel"),
            vmem_limit_bytes=VMEM_LIMIT),
    )(y1p, y1p, y1p, w2col, s2, b2, w3, s3, b3, res)


# ---------------------------------------------------------------------------
# Parameter preparation (channel padding + BN folding + im2col weight layout)
# ---------------------------------------------------------------------------

def _fold_bn(gamma, beta, mean, var, cpad, eps=1e-5):
    scale = gamma / jnp.sqrt(var + eps)
    bias = beta - mean * scale
    c = gamma.shape[0]
    s = jnp.zeros((1, cpad), jnp.float32).at[0, :c].set(scale.astype(jnp.float32))
    b = jnp.zeros((1, cpad), jnp.float32).at[0, :c].set(bias.astype(jnp.float32))
    return s, b


def prepare_params(w1_t, w2_t, w3_t, bn1, bn2, bn3):
    """Torch OIDHW weights + BN tuples -> padded, bf16, kernel-layout params."""
    c1, cin = w1_t.shape[0], w1_t.shape[1]
    c2 = w2_t.shape[0]
    c3 = w3_t.shape[0]
    assert c3 == cin, "identity residual requires in_planes == planes * expansion"
    cinp, c1p, c2p, c3p = _rup(cin), _rup(c1), _rup(c2), _rup(c3)

    w1 = jnp.zeros((cinp, c1p), jnp.bfloat16).at[:cin, :c1].set(
        jnp.transpose(w1_t[:, :, 0, 0, 0], (1, 0)).astype(jnp.bfloat16))
    # (C2,C1,kd,kh,kw) -> (kd,kh,kw,C1,C2) -> rows ordered (kd,kh,kw,ci) to match taps.
    w2k = jnp.transpose(w2_t, (2, 3, 4, 1, 0)).reshape(27, c1, c2)
    w2 = (jnp.zeros((27, c1p, c2p), jnp.bfloat16)
          .at[:, :c1, :c2].set(w2k.astype(jnp.bfloat16))
          .reshape(27 * c1p, c2p))
    w3 = jnp.zeros((c2p, c3p), jnp.bfloat16).at[:c2, :c3].set(
        jnp.transpose(w3_t[:, :, 0, 0, 0], (1, 0)).astype(jnp.bfloat16))

    s1, b1 = _fold_bn(*bn1, c1p)
    s2, b2 = _fold_bn(*bn2, c2p)
    s3, b3 = _fold_bn(*bn3, c3p)
    return dict(w1=w1, w2=w2, w3=w3, s1=s1, b1=b1, s2=s2, b2=b2, s3=s3, b3=b3)


# ---------------------------------------------------------------------------
# Bottleneck forward
# ---------------------------------------------------------------------------

@jax.jit
def bottleneck_forward(x_ncdhw, p):
    N, cin, D, H, W = x_ncdhw.shape
    cinp, c1p = p["w1"].shape
    c2p, c3p = p["w3"].shape
    assert cinp == c3p, "identity residual requires in_planes == planes * expansion"

    x = jnp.transpose(x_ncdhw, (0, 2, 3, 4, 1))                     # NDHWC, f32
    xc = jnp.pad(x, ((0, 0),) * 4 + ((0, c3p - cin),))              # channel pad (zeros)

    M = N * D * H * W
    Mp = ((M + TM - 1) // TM) * TM
    x2d = jnp.pad(xc.astype(jnp.bfloat16).reshape(M, cinp), ((0, Mp - M), (0, 0)))

    # conv1 + bn1 + relu   (bf16 in, bf16 out)
    y1 = pointwise_bn_relu(x2d, p["w1"], p["s1"], p["b1"])          # (Mp, C1p)
    y1 = y1[:M].reshape(N, D, H, W, c1p)
    y1p = jnp.pad(y1, ((0, 0), (1, 1), (1, 1), (1, 1), (0, 0)))     # spatial zero pad, bf16

    # conv2+bn2+relu+conv3+bn3+residual+relu, fully fused
    res = xc.reshape(N, D, H * W, c3p)                              # f32 residual slab
    out = fused_conv2_conv3(y1p, p["w2"], p["s2"], p["b2"],
                            p["w3"], p["s3"], p["b3"], res)         # (N, D, HW, C3p) f32

    out = out.reshape(N, D, H, W, c3p)[..., :cin]                   # drop channel padding
    return jnp.transpose(out, (0, 4, 1, 2, 3))                      # back to NCDHW


# ---------------------------------------------------------------------------
# Pure-JAX f32 reference (correctness check)
# ---------------------------------------------------------------------------

def _conv3d(x, w, stride, pad):
    return jax.lax.conv_general_dilated(
        x, w, window_strides=(stride,) * 3, padding=[(pad, pad)] * 3,
        dimension_numbers=("NCDHW", "OIDHW", "NCDHW"))


def bottleneck_reference(x, p_torch):
    def bn(y, g, b, m, v, eps=1e-5):
        sh = (1, -1, 1, 1, 1)
        return (y - m.reshape(sh)) / jnp.sqrt(v.reshape(sh) + eps) * g.reshape(sh) + b.reshape(sh)

    residual = x
    out = _conv3d(x, p_torch["w1"], 1, 0)
    out = jax.nn.relu(bn(out, *p_torch["bn1"]))
    out = _conv3d(out, p_torch["w2"], 1, 1)
    out = jax.nn.relu(bn(out, *p_torch["bn2"]))
    out = _conv3d(out, p_torch["w3"], 1, 0)
    out = bn(out, *p_torch["bn3"])
    return jax.nn.relu(out + residual)


# ---------------------------------------------------------------------------
# Main
# ---------------------------------------------------------------------------

if __name__ == "__main__":
    key = jax.random.PRNGKey(0)

    # shapes consistent with the module (stride=1, downsample=None => in_planes == planes*4)
    N, D, H, W = 2, 8, 8, 8
    planes = 4
    expansion = 4
    in_planes = planes * expansion        # 16

    ks = jax.random.split(key, 8)
    x = jax.random.normal(ks[0], (N, in_planes, D, H, W), jnp.float32)

    w1_t = jax.random.normal(ks[1], (planes, in_planes, 1, 1, 1), jnp.float32) * 0.1
    w2_t = jax.random.normal(ks[2], (planes, planes, 3, 3, 3), jnp.float32) * 0.1
    w3_t = jax.random.normal(ks[3], (planes * expansion, planes, 1, 1, 1), jnp.float32) * 0.1

    def bn_params(k, c):
        k1, k2, k3, k4 = jax.random.split(k, 4)
        gamma = jax.random.uniform(k1, (c,), jnp.float32, 0.5, 1.5)
        beta = jax.random.normal(k2, (c,), jnp.float32) * 0.1
        mean = jax.random.normal(k3, (c,), jnp.float32) * 0.1
        var = jax.random.uniform(k4, (c,), jnp.float32, 0.5, 1.5)
        return (gamma, beta, mean, var)

    bn1 = bn_params(ks[4], planes)
    bn2 = bn_params(ks[5], planes)
    bn3 = bn_params(ks[6], planes * expansion)

    params = prepare_params(w1_t, w2_t, w3_t, bn1, bn2, bn3)
    p_torch = {"w1": w1_t, "w2": w2_t, "w3": w3_t, "bn1": bn1, "bn2": bn2, "bn3": bn3}

    out = jax.block_until_ready(bottleneck_forward(x, params))
    ref = jax.block_until_ready(bottleneck_reference(x, p_torch))

    assert out.shape == (N, planes * expansion, D, H, W), out.shape
    # bf16 MXU inputs vs f32 reference -> relaxed tolerance
    max_err = float(jnp.max(jnp.abs(out - ref)))
    assert jnp.allclose(out, ref, rtol=3e-2, atol=3e-2), max_err

    print("KERNEL_OK")
</pallas_src>

<mosaic_0001>
module attributes {stable_mosaic.version = 11 : i64} {
  func.func @_pw_bn_relu_kernel(%arg0: i32, %arg1: memref<512x128xbf16, #tpu.memory_space<vmem>>, %arg2: memref<128x128xbf16, #tpu.memory_space<vmem>>, %arg3: memref<1x128xf32, #tpu.memory_space<vmem>>, %arg4: memref<1x128xf32, #tpu.memory_space<vmem>>, %arg5: memref<512x128xbf16, #tpu.memory_space<vmem>>) attributes {dimension_semantics = [#tpu.dimension_semantics<parallel>], iteration_bounds = array<i64: 2>, scalar_prefetch = 0 : i64, scratch_operands = 0 : i64, tpu.core_type = #tpu.core_type<tc>, window_params = [{transform_indices = @transform_0, window_bounds = array<i64: 512, 128>}, {pipeline_mode = #tpu.pipeline_mode<synchronous>, transform_indices = @transform_1, window_bounds = array<i64: 128, 128>}, {pipeline_mode = #tpu.pipeline_mode<synchronous>, transform_indices = @transform_2, window_bounds = array<i64: 1, 128>}, {pipeline_mode = #tpu.pipeline_mode<synchronous>, transform_indices = @transform_3, window_bounds = array<i64: 1, 128>}, {transform_indices = @transform_4, window_bounds = array<i64: 512, 128>}]} {
    %c0 = arith.constant 0 : index
    %c0_0 = arith.constant 0 : index
    %0 = vector.load %arg1[%c0, %c0_0] : memref<512x128xbf16, #tpu.memory_space<vmem>>, vector<512x128xbf16>
    %c0_1 = arith.constant 0 : index
    %c0_2 = arith.constant 0 : index
    %1 = vector.load %arg2[%c0_1, %c0_2] : memref<128x128xbf16, #tpu.memory_space<vmem>>, vector<128x128xbf16>
    %cst = arith.constant dense<0.000000e+00> : vector<512x128xf32>
    %2 = tpu.matmul %0, %1, %cst {dimension_numbers = #tpu.dot_dimension_numbers<[1], [0], [0], [1], [0, 0, 1, 1], [], []>} : vector<512x128xbf16>, vector<128x128xbf16>, vector<512x128xf32> -> vector<512x128xf32>
    %c0_3 = arith.constant 0 : index
    %c0_4 = arith.constant 0 : index
    %3 = vector.load %arg3[%c0_3, %c0_4] : memref<1x128xf32, #tpu.memory_space<vmem>>, vector<1x128xf32>
    %4 = vector.broadcast %3 : vector<1x128xf32> to vector<512x128xf32>
    %5 = arith.mulf %2, %4 : vector<512x128xf32>
    %c0_5 = arith.constant 0 : index
    %c0_6 = arith.constant 0 : index
    %6 = vector.load %arg4[%c0_5, %c0_6] : memref<1x128xf32, #tpu.memory_space<vmem>>, vector<1x128xf32>
    %7 = vector.broadcast %6 : vector<1x128xf32> to vector<512x128xf32>
    %8 = arith.addf %5, %7 : vector<512x128xf32>
    %cst_7 = arith.constant 0.000000e+00 : f32
    %9 = vector.broadcast %cst_7 : f32 to vector<512x128xf32>
    %10 = arith.maximumf %8, %9 : vector<512x128xf32>
    %11 = arith.truncf %10 : vector<512x128xf32> to vector<512x128xbf16>
    %c0_8 = arith.constant 0 : index
    %c0_9 = arith.constant 0 : index
    %12 = vector.load %arg5[%c0_8, %c0_9] : memref<512x128xbf16, #tpu.memory_space<vmem>>, vector<512x128xbf16>
    tpu.vector_store %arg5[%c0_8, %c0_9], %11 {strides = array<i32>} : memref<512x128xbf16, #tpu.memory_space<vmem>>, vector<512x128xbf16>,
    return
  }
  func.func @transform_0(%arg0: i32) -> (i32, i32) {
    %c0_i32 = arith.constant 0 : i32
    %c0_i32_0 = arith.constant 0 : i32
    return %arg0, %c0_i32 : i32, i32
  }
  func.func @transform_1(%arg0: i32) -> (i32, i32) {
    %c0_i32 = arith.constant 0 : i32
    %c0_i32_0 = arith.constant 0 : i32
    %c0_i32_1 = arith.constant 0 : i32
    return %c0_i32, %c0_i32_0 : i32, i32
  }
  func.func @transform_2(%arg0: i32) -> (i32, i32) {
    %c0_i32 = arith.constant 0 : i32
    %c0_i32_0 = arith.constant 0 : i32
    %c0_i32_1 = arith.constant 0 : i32
    return %c0_i32, %c0_i32_0 : i32, i32
  }
  func.func @transform_3(%arg0: i32) -> (i32, i32) {
    %c0_i32 = arith.constant 0 : i32
    %c0_i32_0 = arith.constant 0 : i32
    %c0_i32_1 = arith.constant 0 : i32
    return %c0_i32, %c0_i32_0 : i32, i32
  }
  func.func @transform_4(%arg0: i32) -> (i32, i32) {
    %c0_i32 = arith.constant 0 : i32
    %c0_i32_0 = arith.constant 0 : i32
    return %arg0, %c0_i32 : i32, i32
  }
}

module attributes {stable_mosaic.version = 11 : i64} {
  func.func @_fused_conv2_conv3_kernel(%arg0: i32, %arg1: i32, %arg2: memref<1x1x10x10x128xbf16, #tpu.memory_space<vmem>>, %arg3: memref<1x1x10x10x128xbf16, #tpu.memory_space<vmem>>, %arg4: memref<1x1x10x10x128xbf16, #tpu.memory_space<vmem>>, %arg5: memref<3456x128xbf16, #tpu.memory_space<vmem>>, %arg6: memref<1x128xf32, #tpu.memory_space<vmem>>, %arg7: memref<1x128xf32, #tpu.memory_space<vmem>>, %arg8: memref<128x128xbf16, #tpu.memory_space<vmem>>, %arg9: memref<1x128xf32, #tpu.memory_space<vmem>>, %arg10: memref<1x128xf32, #tpu.memory_space<vmem>>, %arg11: memref<1x1x64x128xf32, #tpu.memory_space<vmem>>, %arg12: memref<1x1x64x128xf32, #tpu.memory_space<vmem>>) attributes {dimension_semantics = [#tpu.dimension_semantics<parallel>, #tpu.dimension_semantics<parallel>], iteration_bounds = array<i64: 2, 8>, scalar_prefetch = 0 : i64, scratch_operands = 0 : i64, tpu.core_type = #tpu.core_type<tc>, window_params = [{transform_indices = @transform_0, window_bounds = array<i64: 1, 1, 10, 10, 128>}, {transform_indices = @transform_1, window_bounds = array<i64: 1, 1, 10, 10, 128>}, {transform_indices = @transform_2, window_bounds = array<i64: 1, 1, 10, 10, 128>}, {pipeline_mode = #tpu.pipeline_mode<synchronous>, transform_indices = @transform_3, window_bounds = array<i64: 3456, 128>}, {pipeline_mode = #tpu.pipeline_mode<synchronous>, transform_indices = @transform_4, window_bounds = array<i64: 1, 128>}, {pipeline_mode = #tpu.pipeline_mode<synchronous>, transform_indices = @transform_5, window_bounds = array<i64: 1, 128>}, {pipeline_mode = #tpu.pipeline_mode<synchronous>, transform_indices = @transform_6, window_bounds = array<i64: 128, 128>}, {pipeline_mode = #tpu.pipeline_mode<synchronous>, transform_indices = @transform_7, window_bounds = array<i64: 1, 128>}, {pipeline_mode = #tpu.pipeline_mode<synchronous>, transform_indices = @transform_8, window_bounds = array<i64: 1, 128>}, {transform_indices = @transform_9, window_bounds = array<i64: 1, 1, 64, 128>}, {transform_indices = @transform_10, window_bounds = array<i64: 1, 1, 64, 128>}]} {
    %c0 = arith.constant 0 : index
    %c0_0 = arith.constant 0 : index
    %c0_1 = arith.constant 0 : index
    %c0_2 = arith.constant 0 : index
    %c0_3 = arith.constant 0 : index
    %0 = vector.load %arg2[%c0, %c0_0, %c0_1, %c0_2, %c0_3] : memref<1x1x10x10x128xbf16, #tpu.memory_space<vmem>>, vector<1x1x8x8x128xbf16>
    %1 = vector.shape_cast %0 : vector<1x1x8x8x128xbf16> to vector<8x8x128xbf16>
    %c0_4 = arith.constant 0 : index
    %c0_5 = arith.constant 0 : index
    %c0_6 = arith.constant 0 : index
    %c1 = arith.constant 1 : index
    %c0_7 = arith.constant 0 : index
    %2 = vector.load %arg2[%c0_4, %c0_5, %c0_6, %c1, %c0_7] : memref<1x1x10x10x128xbf16, #tpu.memory_space<vmem>>, vector<1x1x8x8x128xbf16>
    %3 = vector.shape_cast %2 : vector<1x1x8x8x128xbf16> to vector<8x8x128xbf16>
    %c0_8 = arith.constant 0 : index
    %c0_9 = arith.constant 0 : index
    %c0_10 = arith.constant 0 : index
    %c2 = arith.constant 2 : index
    %c0_11 = arith.constant 0 : index
    %4 = vector.load %arg2[%c0_8, %c0_9, %c0_10, %c2, %c0_11] : memref<1x1x10x10x128xbf16, #tpu.memory_space<vmem>>, vector<1x1x8x8x128xbf16>
    %5 = vector.shape_cast %4 : vector<1x1x8x8x128xbf16> to vector<8x8x128xbf16>
    %c0_12 = arith.constant 0 : index
    %c0_13 = arith.constant 0 : index
    %c1_14 = arith.constant 1 : index
    %c0_15 = arith.constant 0 : index
    %c0_16 = arith.constant 0 : index
    %6 = vector.load %arg2[%c0_12, %c0_13, %c1_14, %c0_15, %c0_16] : memref<1x1x10x10x128xbf16, #tpu.memory_space<vmem>>, vector<1x1x8x8x128xbf16>
    %7 = vector.shape_cast %6 : vector<1x1x8x8x128xbf16> to vector<8x8x128xbf16>
    %c0_17 = arith.constant 0 : index
    %c0_18 = arith.constant 0 : index
    %c1_19 = arith.constant 1 : index
    %c1_20 = arith.constant 1 : index
    %c0_21 = arith.constant 0 : index
    %8 = vector.load %arg2[%c0_17, %c0_18, %c1_19, %c1_20, %c0_21] : memref<1x1x10x10x128xbf16, #tpu.memory_space<vmem>>, vector<1x1x8x8x128xbf16>
    %9 = vector.shape_cast %8 : vector<1x1x8x8x128xbf16> to vector<8x8x128xbf16>
    %c0_22 = arith.constant 0 : index
    %c0_23 = arith.constant 0 : index
    %c1_24 = arith.constant 1 : index
    %c2_25 = arith.constant 2 : index
    %c0_26 = arith.constant 0 : index
    %10 = vector.load %arg2[%c0_22, %c0_23, %c1_24, %c2_25, %c0_26] : memref<1x1x10x10x128xbf16, #tpu.memory_space<vmem>>, vector<1x1x8x8x128xbf16>
    %11 = vector.shape_cast %10 : vector<1x1x8x8x128xbf16> to vector<8x8x128xbf16>
    %c0_27 = arith.constant 0 : index
    %c0_28 = arith.constant 0 : index
    %c2_29 = arith.constant 2 : index
    %c0_30 = arith.constant 0 : index
    %c0_31 = arith.constant 0 : index
    %12 = vector.load %arg2[%c0_27, %c0_28, %c2_29, %c0_30, %c0_31] : memref<1x1x10x10x128xbf16, #tpu.memory_space<vmem>>, vector<1x1x8x8x128xbf16>
    %13 = vector.shape_cast %12 : vector<1x1x8x8x128xbf16> to vector<8x8x128xbf16>
    %c0_32 = arith.constant 0 : index
    %c0_33 = arith.constant 0 : index
    %c2_34 = arith.constant 2 : index
    %c1_35 = arith.constant 1 : index
    %c0_36 = arith.constant 0 : index
    %14 = vector.load %arg2[%c0_32, %c0_33, %c2_34, %c1_35, %c0_36] : memref<1x1x10x10x128xbf16, #tpu.memory_space<vmem>>, vector<1x1x8x8x128xbf16>
    %15 = vector.shape_cast %14 : vector<1x1x8x8x128xbf16> to vector<8x8x128xbf16>
    %c0_37 = arith.constant 0 : index
    %c0_38 = arith.constant 0 : index
    %c2_39 = arith.constant 2 : index
    %c2_40 = arith.constant 2 : index
    %c0_41 = arith.constant 0 : index
    %16 = vector.load %arg2[%c0_37, %c0_38, %c2_39, %c2_40, %c0_41] : memref<1x1x10x10x128xbf16, #tpu.memory_space<vmem>>, vector<1x1x8x8x128xbf16>
    %17 = vector.shape_cast %16 : vector<1x1x8x8x128xbf16> to vector<8x8x128xbf16>
    %c0_42 = arith.constant 0 : index
    %c0_43 = arith.constant 0 : index
    %c0_44 = arith.constant 0 : index
    %c0_45 = arith.constant 0 : index
    %c0_46 = arith.constant 0 : index
    %18 = vector.load %arg3[%c0_42, %c0_43, %c0_44, %c0_45, %c0_46] : memref<1x1x10x10x128xbf16, #tpu.memory_space<vmem>>, vector<1x1x8x8x128xbf16>
    %19 = vector.shape_cast %18 : vector<1x1x8x8x128xbf16> to vector<8x8x128xbf16>
    %c0_47 = arith.constant 0 : index
    %c0_48 = arith.constant 0 : index
    %c0_49 = arith.constant 0 : index
    %c1_50 = arith.constant 1 : index
    %c0_51 = arith.constant 0 : index
    %20 = vector.load %arg3[%c0_47, %c0_48, %c0_49, %c1_50, %c0_51] : memref<1x1x10x10x128xbf16, #tpu.memory_space<vmem>>, vector<1x1x8x8x128xbf16>
    %21 = vector.shape_cast %20 : vector<1x1x8x8x128xbf16> to vector<8x8x128xbf16>
    %c0_52 = arith.constant 0 : index
    %c0_53 = arith.constant 0 : index
    %c0_54 = arith.constant 0 : index
    %c2_55 = arith.constant 2 : index
    %c0_56 = arith.constant 0 : index
    %22 = vector.load %arg3[%c0_52, %c0_53, %c0_54, %c2_55, %c0_56] : memref<1x1x10x10x128xbf16, #tpu.memory_space<vmem>>, vector<1x1x8x8x128xbf16>
    %23 = vector.shape_cast %22 : vector<1x1x8x8x128xbf16> to vector<8x8x128xbf16>
    %c0_57 = arith.constant 0 : index
    %c0_58 = arith.constant 0 : index
    %c1_59 = arith.constant 1 : index
    %c0_60 = arith.constant 0 : index
    %c0_61 = arith.constant 0 : index
    %24 = vector.load %arg3[%c0_57, %c0_58, %c1_59, %c0_60, %c0_61] : memref<1x1x10x10x128xbf16, #tpu.memory_space<vmem>>, vector<1x1x8x8x128xbf16>
    %25 = vector.shape_cast %24 : vector<1x1x8x8x128xbf16> to vector<8x8x128xbf16>
    %c0_62 = arith.constant 0 : index
    %c0_63 = arith.constant 0 : index
    %c1_64 = arith.constant 1 : index
    %c1_65 = arith.constant 1 : index
    %c0_66 = arith.constant 0 : index
    %26 = vector.load %arg3[%c0_62, %c0_63, %c1_64, %c1_65, %c0_66] : memref<1x1x10x10x128xbf16, #tpu.memory_space<vmem>>, vector<1x1x8x8x128xbf16>
    %27 = vector.shape_cast %26 : vector<1x1x8x8x128xbf16> to vector<8x8x128xbf16>
    %c0_67 = arith.constant 0 : index
    %c0_68 = arith.constant 0 : index
    %c1_69 = arith.constant 1 : index
    %c2_70 = arith.constant 2 : index
    %c0_71 = arith.constant 0 : index
    %28 = vector.load %arg3[%c0_67, %c0_68, %c1_69, %c2_70, %c0_71] : memref<1x1x10x10x128xbf16, #tpu.memory_space<vmem>>, vector<1x1x8x8x128xbf16>
    %29 = vector.shape_cast %28 : vector<1x1x8x8x128xbf16> to vector<8x8x128xbf16>
    %c0_72 = arith.constant 0 : index
    %c0_73 = arith.constant 0 : index
    %c2_74 = arith.constant 2 : index
    %c0_75 = arith.constant 0 : index
    %c0_76 = arith.constant 0 : index
    %30 = vector.load %arg3[%c0_72, %c0_73, %c2_74, %c0_75, %c0_76] : memref<1x1x10x10x128xbf16, #tpu.memory_space<vmem>>, vector<1x1x8x8x128xbf16>
    %31 = vector.shape_cast %30 : vector<1x1x8x8x128xbf16> to vector<8x8x128xbf16>
    %c0_77 = arith.constant 0 : index
    %c0_78 = arith.constant 0 : index
    %c2_79 = arith.constant 2 : index
    %c1_80 = arith.constant 1 : index
    %c0_81 = arith.constant 0 : index
    %32 = vector.load %arg3[%c0_77, %c0_78, %c2_79, %c1_80, %c0_81] : memref<1x1x10x10x128xbf16, #tpu.memory_space<vmem>>, vector<1x1x8x8x128xbf16>
    %33 = vector.shape_cast %32 : vector<1x1x8x8x128xbf16> to vector<8x8x128xbf16>
    %c0_82 = arith.constant 0 : index
    %c0_83 = arith.constant 0 : index
    %c2_84 = arith.constant 2 : index
    %c2_85 = arith.constant 2 : index
    %c0_86 = arith.constant 0 : index
    %34 = vector.load %arg3[%c0_82, %c0_83, %c2_84, %c2_85, %c0_86] : memref<1x1x10x10x128xbf16, #tpu.memory_space<vmem>>, vector<1x1x8x8x128xbf16>
    %35 = vector.shape_cast %34 : vector<1x1x8x8x128xbf16> to vector<8x8x128xbf16>
    %c0_87 = arith.constant 0 : index
    %c0_88 = arith.constant 0 : index
    %c0_89 = arith.constant 0 : index
    %c0_90 = arith.constant 0 : index
    %c0_91 = arith.constant 0 : index
    %36 = vector.load %arg4[%c0_87, %c0_88, %c0_89, %c0_90, %c0_91] : memref<1x1x10x10x128xbf16, #tpu.memory_space<vmem>>, vector<1x1x8x8x128xbf16>
    %37 = vector.shape_cast %36 : vector<1x1x8x8x128xbf16> to vector<8x8x128xbf16>
    %c0_92 = arith.constant 0 : index
    %c0_93 = arith.constant 0 : index
    %c0_94 = arith.constant 0 : index
    %c1_95 = arith.constant 1 : index
    %c0_96 = arith.constant 0 : index
    %38 = vector.load %arg4[%c0_92, %c0_93, %c0_94, %c1_95, %c0_96] : memref<1x1x10x10x128xbf16, #tpu.memory_space<vmem>>, vector<1x1x8x8x128xbf16>
    %39 = vector.shape_cast %38 : vector<1x1x8x8x128xbf16> to vector<8x8x128xbf16>
    %c0_97 = arith.constant 0 : index
    %c0_98 = arith.constant 0 : index
    %c0_99 = arith.constant 0 : index
    %c2_100 = arith.constant 2 : index
    %c0_101 = arith.constant 0 : index
    %40 = vector.load %arg4[%c0_97, %c0_98, %c0_99, %c2_100, %c0_101] : memref<1x1x10x10x128xbf16, #tpu.memory_space<vmem>>, vector<1x1x8x8x128xbf16>
    %41 = vector.shape_cast %40 : vector<1x1x8x8x128xbf16> to vector<8x8x128xbf16>
    %c0_102 = arith.constant 0 : index
    %c0_103 = arith.constant 0 : index
    %c1_104 = arith.constant 1 : index
    %c0_105 = arith.constant 0 : index
    %c0_106 = arith.constant 0 : index
    %42 = vector.load %arg4[%c0_102, %c0_103, %c1_104, %c0_105, %c0_106] : memref<1x1x10x10x128xbf16, #tpu.memory_space<vmem>>, vector<1x1x8x8x128xbf16>
    %43 = vector.shape_cast %42 : vector<1x1x8x8x128xbf16> to vector<8x8x128xbf16>
    %c0_107 = arith.constant 0 : index
    %c0_108 = arith.constant 0 : index
    %c1_109 = arith.constant 1 : index
    %c1_110 = arith.constant 1 : index
    %c0_111 = arith.constant 0 : index
    %44 = vector.load %arg4[%c0_107, %c0_108, %c1_109, %c1_110, %c0_111] : memref<1x1x10x10x128xbf16, #tpu.memory_space<vmem>>, vector<1x1x8x8x128xbf16>
    %45 = vector.shape_cast %44 : vector<1x1x8x8x128xbf16> to vector<8x8x128xbf16>
    %c0_112 = arith.constant 0 : index
    %c0_113 = arith.constant 0 : index
    %c1_114 = arith.constant 1 : index
    %c2_115 = arith.constant 2 : index
    %c0_116 = arith.constant 0 : index
    %46 = vector.load %arg4[%c0_112, %c0_113, %c1_114, %c2_115, %c0_116] : memref<1x1x10x10x128xbf16, #tpu.memory_space<vmem>>, vector<1x1x8x8x128xbf16>
    %47 = vector.shape_cast %46 : vector<1x1x8x8x128xbf16> to vector<8x8x128xbf16>
    %c0_117 = arith.constant 0 : index
    %c0_118 = arith.constant 0 : index
    %c2_119 = arith.constant 2 : index
    %c0_120 = arith.constant 0 : index
    %c0_121 = arith.constant 0 : index
    %48 = vector.load %arg4[%c0_117, %c0_118, %c2_119, %c0_120, %c0_121] : memref<1x1x10x10x128xbf16, #tpu.memory_space<vmem>>, vector<1x1x8x8x128xbf16>
    %49 = vector.shape_cast %48 : vector<1x1x8x8x128xbf16> to vector<8x8x128xbf16>
    %c0_122 = arith.constant 0 : index
    %c0_123 = arith.constant 0 : index
    %c2_124 = arith.constant 2 : index
    %c1_125 = arith.constant 1 : index
    %c0_126 = arith.constant 0 : index
    %50 = vector.load %arg4[%c0_122, %c0_123, %c2_124, %c1_125, %c0_126] : memref<1x1x10x10x128xbf16, #tpu.memory_space<vmem>>, vector<1x1x8x8x128xbf16>
    %51 = vector.shape_cast %50 : vector<1x1x8x8x128xbf16> to vector<8x8x128xbf16>
    %c0_127 = arith.constant 0 : index
    %c0_128 = arith.constant 0 : index
    %c2_129 = arith.constant 2 : index
    %c2_130 = arith.constant 2 : index
    %c0_131 = arith.constant 0 : index
    %52 = vector.load %arg4[%c0_127, %c0_128, %c2_129, %c2_130, %c0_131] : memref<1x1x10x10x128xbf16, #tpu.memory_space<vmem>>, vector<1x1x8x8x128xbf16>
    %53 = vector.shape_cast %52 : vector<1x1x8x8x128xbf16> to vector<8x8x128xbf16>
    %54 = tpu.concatenate %1, %3, %5, %7, %9, %11, %13, %15, %17, %19, %21, %23, %25, %27, %29, %31 in 2 : vector<8x8x128xbf16>, vector<8x8x128xbf16>, vector<8x8x128xbf16>, vector<8x8x128xbf16>, vector<8x8x128xbf16>, vector<8x8x128xbf16>, vector<8x8x128xbf16>, vector<8x8x128xbf16>, vector<8x8x128xbf16>, vector<8x8x128xbf16>, vector<8x8x128xbf16>, vector<8x8x128xbf16>, vector<8x8x128xbf16>, vector<8x8x128xbf16>, vector<8x8x128xbf16>, vector<8x8x128xbf16> -> vector<8x8x2048xbf16>
    %55 = tpu.concatenate %33, %35, %37, %39, %41, %43, %45, %47, %49, %51, %53 in 2 : vector<8x8x128xbf16>, vector<8x8x128xbf16>, vector<8x8x128xbf16>, vector<8x8x128xbf16>, vector<8x8x128xbf16>, vector<8x8x128xbf16>, vector<8x8x128xbf16>, vector<8x8x128xbf16>, vector<8x8x128xbf16>, vector<8x8x128xbf16>, vector<8x8x128xbf16> -> vector<8x8x1408xbf16>
    %56 = tpu.concatenate %54, %55 in 2 : vector<8x8x2048xbf16>, vector<8x8x1408xbf16> -> vector<8x8x3456xbf16>
    %57 = vector.shape_cast %56 : vector<8x8x3456xbf16> to vector<64x3456xbf16>
    %c0_132 = arith.constant 0 : index
    %c0_133 = arith.constant 0 : index
    %58 = vector.load %arg5[%c0_132, %c0_133] : memref<3456x128xbf16, #tpu.memory_space<vmem>>, vector<3456x128xbf16>
    %cst = arith.constant dense<0.000000e+00> : vector<64x128xf32>
    %59 = tpu.matmul %57, %58, %cst {dimension_numbers = #tpu.dot_dimension_numbers<[1], [0], [0], [1], [0, 0, 1, 1], [], []>} : vector<64x3456xbf16>, vector<3456x128xbf16>, vector<64x128xf32> -> vector<64x128xf32>
    %c0_134 = arith.constant 0 : index
    %c0_135 = arith.constant 0 : index
    %60 = vector.load %arg6[%c0_134, %c0_135] : memref<1x128xf32, #tpu.memory_space<vmem>>, vector<1x128xf32>
    %61 = vector.broadcast %60 : vector<1x128xf32> to vector<64x128xf32>
    %62 = arith.mulf %59, %61 : vector<64x128xf32>
    %c0_136 = arith.constant 0 : index
    %c0_137 = arith.constant 0 : index
    %63 = vector.load %arg7[%c0_136, %c0_137] : memref<1x128xf32, #tpu.memory_space<vmem>>, vector<1x128xf32>
    %64 = vector.broadcast %63 : vector<1x128xf32> to vector<64x128xf32>
    %65 = arith.addf %62, %64 : vector<64x128xf32>
    %cst_138 = arith.constant 0.000000e+00 : f32
    %66 = vector.broadcast %cst_138 : f32 to vector<64x128xf32>
    %67 = arith.maximumf %65, %66 : vector<64x128xf32>
    %68 = arith.truncf %67 : vector<64x128xf32> to vector<64x128xbf16>
    %c0_139 = arith.constant 0 : index
    %c0_140 = arith.constant 0 : index
    %69 = vector.load %arg8[%c0_139, %c0_140] : memref<128x128xbf16, #tpu.memory_space<vmem>>, vector<128x128xbf16>
    %cst_141 = arith.constant dense<0.000000e+00> : vector<64x128xf32>
    %70 = tpu.matmul %68, %69, %cst_141 {dimension_numbers = #tpu.dot_dimension_numbers<[1], [0], [0], [1], [0, 0, 1, 1], [], []>} : vector<64x128xbf16>, vector<128x128xbf16>, vector<64x128xf32> -> vector<64x128xf32>
    %c0_142 = arith.constant 0 : index
    %c0_143 = arith.constant 0 : index
    %71 = vector.load %arg9[%c0_142, %c0_143] : memref<1x128xf32, #tpu.memory_space<vmem>>, vector<1x128xf32>
    %72 = vector.broadcast %71 : vector<1x128xf32> to vector<64x128xf32>
    %73 = arith.mulf %70, %72 : vector<64x128xf32>
    %c0_144 = arith.constant 0 : index
    %c0_145 = arith.constant 0 : index
    %74 = vector.load %arg10[%c0_144, %c0_145] : memref<1x128xf32, #tpu.memory_space<vmem>>, vector<1x128xf32>
    %75 = vector.broadcast %74 : vector<1x128xf32> to vector<64x128xf32>
    %76 = arith.addf %73, %75 : vector<64x128xf32>
    %c0_146 = arith.constant 0 : index
    %c0_147 = arith.constant 0 : index
    %c0_148 = arith.constant 0 : index
    %c0_149 = arith.constant 0 : index
    %77 = vector.load %arg11[%c0_146, %c0_147, %c0_148, %c0_149] : memref<1x1x64x128xf32, #tpu.memory_space<vmem>>, vector<1x1x64x128xf32>
    %78 = vector.shape_cast %77 : vector<1x1x64x128xf32> to vector<64x128xf32>
    %79 = arith.addf %76, %78 : vector<64x128xf32>
    %cst_150 = arith.constant 0.000000e+00 : f32
    %80 = vector.broadcast %cst_150 : f32 to vector<64x128xf32>
    %81 = arith.maximumf %79, %80 : vector<64x128xf32>
    %c0_151 = arith.constant 0 : index
    %c0_152 = arith.constant 0 : index
    %c0_153 = arith.constant 0 : index
    %c0_154 = arith.constant 0 : index
    %82 = vector.load %arg12[%c0_151, %c0_152, %c0_153, %c0_154] : memref<1x1x64x128xf32, #tpu.memory_space<vmem>>, vector<1x1x64x128xf32>
    %83 = vector.shape_cast %82 : vector<1x1x64x128xf32> to vector<64x128xf32>
    %84 = vector.shape_cast %81 : vector<64x128xf32> to vector<1x1x64x128xf32>
    tpu.vector_store %arg12[%c0_151, %c0_152, %c0_153, %c0_154], %84 {strides = array<i32>} : memref<1x1x64x128xf32, #tpu.memory_space<vmem>>, vector<1x1x64x128xf32>,
    return
  }
  func.func @transform_0(%arg0: i32, %arg1: i32) -> (i32, i32, i32, i32, i32) {
    %c0_i32 = arith.constant 0 : i32
    %0 = arith.addi %arg1, %c0_i32 : i32
    %c0_i32_0 = arith.constant 0 : i32
    %c0_i32_1 = arith.constant 0 : i32
    %c0_i32_2 = arith.constant 0 : i32
    %c0_i32_3 = arith.constant 0 : i32
    return %arg0, %0, %c0_i32_0, %c0_i32_1, %c0_i32_2 : i32, i32, i32, i32, i32
  }
  func.func @transform_1(%arg0: i32, %arg1: i32) -> (i32, i32, i32, i32, i32) {
    %c1_i32 = arith.constant 1 : i32
    %0 = arith.addi %arg1, %c1_i32 : i32
    %c0_i32 = arith.constant 0 : i32
    %c0_i32_0 = arith.constant 0 : i32
    %c0_i32_1 = arith.constant 0 : i32
    %c0_i32_2 = arith.constant 0 : i32
    return %arg0, %0, %c0_i32, %c0_i32_0, %c0_i32_1 : i32, i32, i32, i32, i32
  }
  func.func @transform_2(%arg0: i32, %arg1: i32) -> (i32, i32, i32, i32, i32) {
    %c2_i32 = arith.constant 2 : i32
    %0 = arith.addi %arg1, %c2_i32 : i32
    %c0_i32 = arith.constant 0 : i32
    %c0_i32_0 = arith.constant 0 : i32
    %c0_i32_1 = arith.constant 0 : i32
    %c0_i32_2 = arith.constant 0 : i32
    return %arg0, %0, %c0_i32, %c0_i32_0, %c0_i32_1 : i32, i32, i32, i32, i32
  }
  func.func @transform_3(%arg0: i32, %arg1: i32) -> (i32, i32) {
    %c0_i32 = arith.constant 0 : i32
    %c0_i32_0 = arith.constant 0 : i32
    %c0_i32_1 = arith.constant 0 : i32
    return %c0_i32, %c0_i32_0 : i32, i32
  }
  func.func @transform_4(%arg0: i32, %arg1: i32) -> (i32, i32) {
    %c0_i32 = arith.constant 0 : i32
    %c0_i32_0 = arith.constant 0 : i32
    %c0_i32_1 = arith.constant 0 : i32
    return %c0_i32, %c0_i32_0 : i32, i32
  }
  func.func @transform_5(%arg0: i32, %arg1: i32) -> (i32, i32) {
    %c0_i32 = arith.constant 0 : i32
    %c0_i32_0 = arith.constant 0 : i32
    %c0_i32_1 = arith.constant 0 : i32
    return %c0_i32, %c0_i32_0 : i32, i32
  }
  func.func @transform_6(%arg0: i32, %arg1: i32) -> (i32, i32) {
    %c0_i32 = arith.constant 0 : i32
    %c0_i32_0 = arith.constant 0 : i32
    %c0_i32_1 = arith.constant 0 : i32
    return %c0_i32, %c0_i32_0 : i32, i32
  }
  func.func @transform_7(%arg0: i32, %arg1: i32) -> (i32, i32) {
    %c0_i32 = arith.constant 0 : i32
    %c0_i32_0 = arith.constant 0 : i32
    %c0_i32_1 = arith.constant 0 : i32
    return %c0_i32, %c0_i32_0 : i32, i32
  }
  func.func @transform_8(%arg0: i32, %arg1: i32) -> (i32, i32) {
    %c0_i32 = arith.constant 0 : i32
    %c0_i32_0 = arith.constant 0 : i32
    %c0_i32_1 = arith.constant 0 : i32
    return %c0_i32, %c0_i32_0 : i32, i32
  }
  func.func @transform_9(%arg0: i32, %arg1: i32) -> (i32, i32, i32, i32) {
    %c0_i32 = arith.constant 0 : i32
    %c0_i32_0 = arith.constant 0 : i32
    %c0_i32_1 = arith.constant 0 : i32
    return %arg0, %arg1, %c0_i32, %c0_i32_0 : i32, i32, i32, i32
  }
  func.func @transform_10(%arg0: i32, %arg1: i32) -> (i32, i32, i32, i32) {
    %c0_i32 = arith.constant 0 : i32
    %c0_i32_0 = arith.constant 0 : i32
    %c0_i32_1 = arith.constant 0 : i32
    return %arg0, %arg1, %c0_i32, %c0_i32_0 : i32, i32, i32, i32
  }
}

</mosaic_0001>

<bundles_post_ra>
// kernel: bottleneck_forward.2
= control target key start
LH: loop header
LB: loop body
LE: loop exit
PB: predicated region body
PF: predicated region fallthrough
CT: control target
= control target key end

     0   :  { %s1982_s15 = smov 0   ;;  %s2236_s0 = inlined_call_operand.vmem [shape: bf16[1024,128], index: 0, kind: input, shape index: {}]   ;;  %s2237_s1 = inlined_call_operand.vmem [shape: bf16[128,128], index: 1, kind: input, shape index: {}]   ;;  %s2238_s2 = inlined_call_operand.vmem [shape: f32[1,128], index: 2, kind: input, shape index: {}]   ;;  %s2239_s3 = inlined_call_operand.vmem [shape: f32[1,128], index: 3, kind: input, shape index: {}]   ;;  %s2240_s4 = inlined_call_operand.vmem [shape: bf16[1024,128], index: 4, kind: output, shape index: {}]  }
   0x1 LB: > { %s1393_s16 = sadd.s32 4294967295, %s1955_s15   ;;  %p1397_p0 = scmp.ge.s32.totalorder %s1955_s15, 1  ;;  %s1955_s15 = sphi %s1982_s15, %s14_s15  }
   0x2   : > { %p163_p1 = scmp.lt.s32.totalorder %s1955_s15, 3 }
   0x4   : > { %p164_p2 = pnand %p1397_p0, %p163_p1 }
   0x5   : > { %s1398_s19 = sshll.u32 (!%p164_p2), %s1393_s16, 6 }
   0x6   : > { %167 = sbr.rel (%p164_p2) target bundleno = 308 (0x134), region = 36  ;;  %p190_p3 = scmp.lt.s32.totalorder (!%p164_p2), %s1398_s19, 127 }
   0xb   : > { %v1909_v0 = vld [vmem:[%s2237_s1 + $0x38] sm:$0xff]   ;;  %v1910_v1 = vld [vmem:[%s2237_s1 + $0x30] sm:$0xff]   ;;  %s2242_s19 = smov (!%p190_p3, %s1398_s19), 127  ;;  %v1911_v2 = vld [vmem:[%s2237_s1 + $0x28] sm:$0xff]  }
   0xc   : > { %1805 = vmatprep.subr.bf16.mxu0 %v1909_v0  ;;  %1885 = vmatprep.subr.bf16.mxu1 %v1909_v0  ;;  %s1399_s24 = sshll.u32 %s2242_s19, 2  ;;  %v1912_v3 = vld [vmem:[%s2237_s1 + $0x20] sm:$0xff]   ;;  %v1913_v6 = vld [vmem:[%s2237_s1 + $0x18] sm:$0xff]   ;;  %v1914_v7 = vld [vmem:[%s2237_s1 + $0x10] sm:$0xff]  }
   0xd   : > { %1806 = vmatpush3.bf16.msra.mxu0 %v1909_v0  ;;  %1893 = vmatpush3.bf16.msra.mxu1 %v1909_v0  ;;  %s2007_s27 = scalar_lea.vmem %s2236_s0, %s1399_s24  ;;  %v1915_v8 = vld [vmem:[%s2237_s1 + $0x8] sm:$0xff]   ;;  %v1916_v9 = vld [vmem:[%s2237_s1] sm:$0xff]   ;;  %s2089_s20 = scalar_lea.vmem %s2240_s4, %s1399_s24 }
   0xe   : > { %1807 = vmatprep.subr.bf16.mxu0 %v1910_v1  ;;  %1886 = vmatprep.subr.bf16.mxu1 %v1910_v1  ;;  %v1917_v4 = vld [vmem:[%s2007_s27] sm:$0xff]   ;;  %v1919_v10 = vld [vmem:[%s2007_s27 + $0x8] sm:$0xff]   ;;  %v1921_v12 = vld [vmem:[%s2007_s27 + $0x10] sm:$0xff]  }
   0xf   : > { %v1918_v5 = vld [vmem:[%s2007_s27 + $0x80] sm:$0xff]   ;;  %1821 = vmatprep.mubr.bf16.mxu0 %v1917_v4  ;;  %v1920_v11 = vld [vmem:[%s2007_s27 + $0x88] sm:$0xff]   ;;  %v1922_v13 = vld [vmem:[%s2007_s27 + $0x90] sm:$0xff]  }
  0x10   : > { %1853 = vmatprep.mubr.bf16.mxu1 %v1918_v5  ;;  %v1923_v14 = vld [vmem:[%s2007_s27 + $0x18] sm:$0xff]   ;;  %v1925_v16 = vld [vmem:[%s2007_s27 + $0x20] sm:$0xff]   ;;  %v1927_v18 = vld [vmem:[%s2007_s27 + $0x28] sm:$0xff]  }
  0x11   : > { %1808 = vmatpush3.bf16.msra.mxu0 %v1910_v1  ;;  %1894 = vmatpush3.bf16.msra.mxu1 %v1910_v1  ;;  %v1924_v15 = vld [vmem:[%s2007_s27 + $0x98] sm:$0xff]   ;;  %v1926_v17 = vld [vmem:[%s2007_s27 + $0xa0] sm:$0xff]   ;;  %v1928_v19 = vld [vmem:[%s2007_s27 + $0xa8] sm:$0xff]  }
  0x12   : > { %1809 = vmatprep.subr.bf16.mxu0 %v1911_v2  ;;  %1887 = vmatprep.subr.bf16.mxu1 %v1911_v2  ;;  %v1929_v20 = vld [vmem:[%s2007_s27 + $0x30] sm:$0xff]   ;;  %v1931_v22 = vld [vmem:[%s2007_s27 + $0x38] sm:$0xff]   ;;  %v1933_v24 = vld [vmem:[%s2007_s27 + $0x40] sm:$0xff]  }
  0x13   : > { %v1930_v21 = vld [vmem:[%s2007_s27 + $0xb0] sm:$0xff]   ;;  %v1932_v23 = vld [vmem:[%s2007_s27 + $0xb8] sm:$0xff]   ;;  %v1934_v25 = vld [vmem:[%s2007_s27 + $0xc0] sm:$0xff]  }
  0x14   : > { %v1935_v26 = vld [vmem:[%s2007_s27 + $0x48] sm:$0xff]   ;;  %v1937_v28 = vld [vmem:[%s2007_s27 + $0x50] sm:$0xff]   ;;  %v1939_v30 = vld [vmem:[%s2007_s27 + $0x58] sm:$0xff]  }
  0x15   : > { %1810 = vmatpush3.bf16.msra.mxu0 %v1911_v2  ;;  %1895 = vmatpush3.bf16.msra.mxu1 %v1911_v2  ;;  %v1936_v27 = vld [vmem:[%s2007_s27 + $0xc8] sm:$0xff]   ;;  %v1938_v29 = vld [vmem:[%s2007_s27 + $0xd0] sm:$0xff]   ;;  %v1940_v31 = vld [vmem:[%s2007_s27 + $0xd8] sm:$0xff]  }
  0x16   : > { %1811 = vmatprep.subr.bf16.mxu0 %v1912_v3  ;;  %1888 = vmatprep.subr.bf16.mxu1 %v1912_v3  ;;  %v1941_v32 = vld [vmem:[%s2007_s27 + $0x60] sm:$0xff]   ;;  %v1943_v34 = vld [vmem:[%s2007_s27 + $0x68] sm:$0xff]   ;;  %v1945_v36 = vld [vmem:[%s2007_s27 + $0x70] sm:$0xff]  }
  0x17   : > { %v1942_v33 = vld [vmem:[%s2007_s27 + $0xe0] sm:$0xff]   ;;  %v1944_v35 = vld [vmem:[%s2007_s27 + $0xe8] sm:$0xff]   ;;  %v1946_v37 = vld [vmem:[%s2007_s27 + $0xf0] sm:$0xff]  }
  0x18   : > { %v1947_v38 = vld [vmem:[%s2007_s27 + $0x78] sm:$0xff]   ;;  %v2059_v40 = vld [vmem:[%s2238_s2] ss:$0 sm:$0xff] }
  0x19   : > { %1812 = vmatpush3.bf16.msra.mxu0 %v1912_v3  ;;  %1896 = vmatpush3.bf16.msra.mxu1 %v1912_v3  ;;  %v1948_v39 = vld [vmem:[%s2007_s27 + $0xf8] sm:$0xff]   ;;  %v2066_v45 = vld [vmem:[%s2239_s3] ss:$0 sm:$0xff] }
  0x1a   : > { %1813 = vmatprep.subr.bf16.mxu0 %v1913_v6  ;;  %1889 = vmatprep.subr.bf16.mxu1 %v1913_v6 }
  0x1d   : > { %1814 = vmatpush3.bf16.msra.mxu0 %v1913_v6  ;;  %1897 = vmatpush3.bf16.msra.mxu1 %v1913_v6 }
  0x1e   : > { %1815 = vmatprep.subr.bf16.mxu0 %v1914_v7  ;;  %1890 = vmatprep.subr.bf16.mxu1 %v1914_v7 }
  0x21   : > { %1816 = vmatpush3.bf16.msra.mxu0 %v1914_v7  ;;  %1898 = vmatpush3.bf16.msra.mxu1 %v1914_v7 }
  0x22   : > { %1817 = vmatprep.subr.bf16.mxu0 %v1915_v8  ;;  %1891 = vmatprep.subr.bf16.mxu1 %v1915_v8 }
  0x25   : > { %1818 = vmatpush3.bf16.msra.mxu0 %v1915_v8  ;;  %1899 = vmatpush3.bf16.msra.mxu1 %v1915_v8 }
  0x26   : > { %1819 = vmatprep.subr.bf16.mxu0 %v1916_v9  ;;  %1892 = vmatprep.subr.bf16.mxu1 %v1916_v9 }
  0x29   : > { %1820 = vmatpush3.bf16.msra.mxu0 %v1916_v9  ;;  %1900 = vmatpush3.bf16.msra.mxu1 %v1916_v9 }
  0x2c   : > { %1822 = vmatmul.mubr.bf16.vlgmr.msra.gmra.mxu0 %v1919_v10  ;;  %1854 = vmatmul.mubr.bf16.vlgmr.msra.gmra.mxu1 %v1920_v11 }
  0x2d   : > { %1825 = vmatprep.mubr.bf16.mxu0 %v1921_v12  ;;  %1857 = vmatprep.mubr.bf16.mxu1 %v1922_v13 }
  0x34   : > { %1826 = vmatmul.mubr.bf16.gmra.mxu0 %v1923_v14  ;;  %1858 = vmatmul.mubr.bf16.gmra.mxu1 %v1924_v15 }
  0x35   : > { %1829 = vmatprep.mubr.bf16.mxu0 %v1925_v16  ;;  %1861 = vmatprep.mubr.bf16.mxu1 %v1926_v17 }
  0x3c   : > { %1830 = vmatmul.mubr.bf16.gmra.mxu0 %v1927_v18  ;;  %1862 = vmatmul.mubr.bf16.gmra.mxu1 %v1928_v19 }
  0x3d   : > { %1833 = vmatprep.mubr.bf16.mxu0 %v1929_v20  ;;  %1865 = vmatprep.mubr.bf16.mxu1 %v1930_v21 }
  0x44   : > { %1834 = vmatmul.mubr.bf16.gmra.mxu0 %v1931_v22  ;;  %1866 = vmatmul.mubr.bf16.gmra.mxu1 %v1932_v23 }
  0x45   : > { %1837 = vmatprep.mubr.bf16.mxu0 %v1933_v24  ;;  %1869 = vmatprep.mubr.bf16.mxu1 %v1934_v25 }
  0x4c   : > { %1838 = vmatmul.mubr.bf16.gmra.mxu0 %v1935_v26  ;;  %1870 = vmatmul.mubr.bf16.gmra.mxu1 %v1936_v27 }
  0x4d   : > { %1841 = vmatprep.mubr.bf16.mxu0 %v1937_v28  ;;  %1873 = vmatprep.mubr.bf16.mxu1 %v1938_v29 }
  0x54   : > { %1842 = vmatmul.mubr.bf16.gmra.mxu0 %v1939_v30  ;;  %1874 = vmatmul.mubr.bf16.gmra.mxu1 %v1940_v31 }
  0x55   : > { %1845 = vmatprep.mubr.bf16.mxu0 %v1941_v32  ;;  %1877 = vmatprep.mubr.bf16.mxu1 %v1942_v33 }
  0x5c   : > { %1846 = vmatmul.mubr.bf16.gmra.mxu0 %v1943_v34  ;;  %1878 = vmatmul.mubr.bf16.gmra.mxu1 %v1944_v35 }
  0x5d   : > { %1849 = vmatprep.mubr.bf16.mxu0 %v1945_v36  ;;  %1881 = vmatprep.mubr.bf16.mxu1 %v1946_v37 }
  0x64   : > { %1850 = vmatmul.mubr.bf16.gmra.mxu0 %v1947_v38  ;;  %1882 = vmatmul.mubr.bf16.gmra.mxu1 %v1948_v39 }
  0xec   : > { %v1823_v41 = vpop.f32.mrf.mxu0  ;;  %v1855_v42 = vpop.f32.mrf.mxu1 }
  0xed   : > { %v820_v43 = vmul.f32 %v1823_v41, %v2059_v40  ;;  %v852_v44 = vmul.f32 %v1855_v42, %v2059_v40 }
  0xee   : > { %v556_v46 = vpop.f32.mrf.mxu0  ;;  %v684_v47 = vpop.f32.mrf.mxu1 }
  0xef   : > { %v818_v48 = vmul.f32 %v2059_v40, %v556_v46  ;;  %v850_v49 = vmul.f32 %v2059_v40, %v684_v47  ;;  %v891_v52 = vadd.f32 %v2066_v45, %v820_v43  ;;  %v923_v53 = vadd.f32 %v2066_v45, %v852_v44 }
  0xf0   : > { %v1824_v50 = vpop.f32.mrf.mxu0  ;;  %v1856_v51 = vpop.f32.mrf.mxu1 }
  0xf1   : > { %v821_v54 = vmul.f32 %v1824_v50, %v2059_v40  ;;  %v853_v55 = vmul.f32 %v1856_v51, %v2059_v40  ;;  %v889_v58 = vadd.f32 %v2066_v45, %v818_v48  ;;  %v921_v59 = vadd.f32 %v2066_v45, %v850_v49 }
  0xf2   : > { %v559_v56 = vpop.f32.mrf.mxu0  ;;  %v687_v57 = vpop.f32.mrf.mxu1  ;;  %v955_v2 = vmax.f32 %v891_v52, 0.0  ;;  %v987_v3 = vmax.f32 %v923_v53, 0.0 }
  0xf3   : > { %v819_v60 = vmul.f32 %v2059_v40, %v559_v56  ;;  %v851_v61 = vmul.f32 %v2059_v40, %v687_v57  ;;  %v892_v62 = vadd.f32 %v2066_v45, %v821_v54  ;;  %v924_v63 = vadd.f32 %v2066_v45, %v853_v55 }
  0xf4   : > { %v1827_v0 = vpop.f32.mrf.mxu0  ;;  %v1859_v1 = vpop.f32.mrf.mxu1  ;;  %v953_v12 = vmax.f32 %v889_v58, 0.0  ;;  %v985_v13 = vmax.f32 %v921_v59, 0.0 }
  0xf5   : > { %v890_v4 = vadd.f32 %v2066_v45, %v819_v60  ;;  %v922_v5 = vadd.f32 %v2066_v45, %v851_v61  ;;  %v956_v6 = vmax.f32 %v892_v62, 0.0  ;;  %v988_v7 = vmax.f32 %v924_v63, 0.0 }
  0xf6   : > { %v824_v8 = vmul.f32 %v1827_v0, %v2059_v40  ;;  %v856_v9 = vmul.f32 %v1859_v1, %v2059_v40  ;;  %v572_v10 = vpop.f32.mrf.mxu0  ;;  %v700_v11 = vpop.f32.mrf.mxu1 }
  0xf7   : > { %v954_v14 = vmax.f32 %v890_v4, 0.0  ;;  %v986_v15 = vmax.f32 %v922_v5, 0.0  ;;  %v1582_v16 = vpack.c.bf16 %v956_v6, %v955_v2  ;;  %v1662_v17 = vpack.c.bf16 %v988_v7, %v987_v3 }
  0xf8   : > { %v822_v18 = vmul.f32 %v2059_v40, %v572_v10  ;;  %v854_v19 = vmul.f32 %v2059_v40, %v700_v11  ;;  %v1828_v20 = vpop.f32.mrf.mxu0  ;;  %v1860_v21 = vpop.f32.mrf.mxu1  ;;  %v895_v24 = vadd.f32 %v2066_v45, %v824_v8  ;;  %v927_v25 = vadd.f32 %v2066_v45, %v856_v9 }
  0xf9   : > { %v1577_v22 = vpack.c.bf16 %v954_v14, %v953_v12  ;;  %v1657_v23 = vpack.c.bf16 %v986_v15, %v985_v13  ;;  %1734 = vst [vmem:[%s2089_s20 + $0x8] sm:$0xff] %v1582_v16   ;;  %1750 = vst [vmem:[%s2089_s20 + $0x88] sm:$0xff] %v1662_v17   ;;  %v825_v26 = vmul.f32 %v1828_v20, %v2059_v40 }
  0xfa   : > { %v857_v27 = vmul.f32 %v1860_v21, %v2059_v40  ;;  %v575_v28 = vpop.f32.mrf.mxu0  ;;  %v703_v29 = vpop.f32.mrf.mxu1  ;;  %v893_v30 = vadd.f32 %v2066_v45, %v822_v18  ;;  %v925_v31 = vadd.f32 %v2066_v45, %v854_v19  ;;  %v959_v43 = vmax.f32 %v895_v24, 0.0 }
  0xfb   : > { %1578 = vst [vmem:[%s2089_s20] sm:$0xff] %v1577_v22   ;;  %1749 = vst [vmem:[%s2089_s20 + $0x80] sm:$0xff] %v1657_v23   ;;  %v823_v32 = vmul.f32 %v2059_v40, %v575_v28  ;;  %v855_v33 = vmul.f32 %v2059_v40, %v703_v29  ;;  %v896_v34 = vadd.f32 %v2066_v45, %v825_v26  ;;  %v991_v44 = vmax.f32 %v927_v25, 0.0 }
  0xfc   : > { %v928_v35 = vadd.f32 %v2066_v45, %v857_v27  ;;  %v1831_v36 = vpop.f32.mrf.mxu0  ;;  %v1863_v37 = vpop.f32.mrf.mxu1  ;;  %v957_v50 = vmax.f32 %v893_v30, 0.0  ;;  %v989_v51 = vmax.f32 %v925_v31, 0.0 }
  0xfd   : > { %v894_v38 = vadd.f32 %v2066_v45, %v823_v32  ;;  %v926_v39 = vadd.f32 %v2066_v45, %v855_v33  ;;  %v828_v41 = vmul.f32 %v1831_v36, %v2059_v40  ;;  %v860_v42 = vmul.f32 %v1863_v37, %v2059_v40 }
  0xfe   : > { %v960_v46 = vmax.f32 %v896_v34, 0.0  ;;  %v992_v47 = vmax.f32 %v928_v35, 0.0  ;;  %v588_v48 = vpop.f32.mrf.mxu0  ;;  %v716_v49 = vpop.f32.mrf.mxu1 }
  0xff   : > { %v958_v52 = vmax.f32 %v894_v38, 0.0  ;;  %v990_v53 = vmax.f32 %v926_v39, 0.0  ;;  %v826_v56 = vmul.f32 %v2059_v40, %v588_v48  ;;  %v858_v57 = vmul.f32 %v2059_v40, %v716_v49 }
 0x100   : > { %v1592_v54 = vpack.c.bf16 %v960_v46, %v959_v43  ;;  %v1672_v55 = vpack.c.bf16 %v992_v47, %v991_v44  ;;  %v1832_v58 = vpop.f32.mrf.mxu0  ;;  %v1864_v59 = vpop.f32.mrf.mxu1  ;;  %v899_v62 = vadd.f32 %v2066_v45, %v828_v41  ;;  %v931_v63 = vadd.f32 %v2066_v45, %v860_v42 }
 0x101   : > { %v1587_v60 = vpack.c.bf16 %v958_v52, %v957_v50  ;;  %v1667_v61 = vpack.c.bf16 %v990_v53, %v989_v51  ;;  %v829_v0 = vmul.f32 %v1832_v58, %v2059_v40  ;;  %v861_v1 = vmul.f32 %v1864_v59, %v2059_v40 }
 0x102   : > { %1736 = vst [vmem:[%s2089_s20 + $0x18] sm:$0xff] %v1592_v54   ;;  %1752 = vst [vmem:[%s2089_s20 + $0x98] sm:$0xff] %v1672_v55   ;;  %v591_v2 = vpop.f32.mrf.mxu0  ;;  %v719_v3 = vpop.f32.mrf.mxu1  ;;  %v897_v4 = vadd.f32 %v2066_v45, %v826_v56  ;;  %v929_v5 = vadd.f32 %v2066_v45, %v858_v57  ;;  %v963_v12 = vmax.f32 %v899_v62, 0.0  ;;  %v995_v13 = vmax.f32 %v931_v63, 0.0 }
 0x103   : > { %1735 = vst [vmem:[%s2089_s20 + $0x10] sm:$0xff] %v1587_v60   ;;  %1751 = vst [vmem:[%s2089_s20 + $0x90] sm:$0xff] %v1667_v61   ;;  %v827_v6 = vmul.f32 %v2059_v40, %v591_v2  ;;  %v859_v7 = vmul.f32 %v2059_v40, %v719_v3  ;;  %v900_v8 = vadd.f32 %v2066_v45, %v829_v0 }
 0x104   : > { %v932_v9 = vadd.f32 %v2066_v45, %v861_v1  ;;  %v1835_v10 = vpop.f32.mrf.mxu0  ;;  %v1867_v11 = vpop.f32.mrf.mxu1  ;;  %v961_v22 = vmax.f32 %v897_v4, 0.0  ;;  %v993_v23 = vmax.f32 %v929_v5, 0.0 }
 0x105   : > { %v898_v14 = vadd.f32 %v2066_v45, %v827_v6  ;;  %v930_v15 = vadd.f32 %v2066_v45, %v859_v7  ;;  %v964_v16 = vmax.f32 %v900_v8, 0.0  ;;  %v832_v18 = vmul.f32 %v1835_v10, %v2059_v40 }
 0x106   : > { %v996_v17 = vmax.f32 %v932_v9, 0.0  ;;  %v864_v19 = vmul.f32 %v1867_v11, %v2059_v40  ;;  %v604_v20 = vpop.f32.mrf.mxu0  ;;  %v732_v21 = vpop.f32.mrf.mxu1 }
 0x107   : > { %v962_v24 = vmax.f32 %v898_v14, 0.0  ;;  %v994_v25 = vmax.f32 %v930_v15, 0.0  ;;  %v1602_v26 = vpack.c.bf16 %v964_v16, %v963_v12  ;;  %v830_v28 = vmul.f32 %v2059_v40, %v604_v20 }
 0x108   : > { %v1682_v27 = vpack.c.bf16 %v996_v17, %v995_v13  ;;  %v862_v29 = vmul.f32 %v2059_v40, %v732_v21  ;;  %v1836_v30 = vpop.f32.mrf.mxu0  ;;  %v1868_v31 = vpop.f32.mrf.mxu1  ;;  %v903_v34 = vadd.f32 %v2066_v45, %v832_v18  ;;  %v935_v35 = vadd.f32 %v2066_v45, %v864_v19 }
 0x109   : > { %v1597_v32 = vpack.c.bf16 %v962_v24, %v961_v22  ;;  %v1677_v33 = vpack.c.bf16 %v994_v25, %v993_v23  ;;  %1738 = vst [vmem:[%s2089_s20 + $0x28] sm:$0xff] %v1602_v26   ;;  %v833_v36 = vmul.f32 %v1836_v30, %v2059_v40  ;;  %v865_v37 = vmul.f32 %v1868_v31, %v2059_v40 }
 0x10a   : > { %1754 = vst [vmem:[%s2089_s20 + $0xa8] sm:$0xff] %v1682_v27   ;;  %v607_v38 = vpop.f32.mrf.mxu0  ;;  %v735_v39 = vpop.f32.mrf.mxu1  ;;  %v901_v41 = vadd.f32 %v2066_v45, %v830_v28  ;;  %v933_v42 = vadd.f32 %v2066_v45, %v862_v29  ;;  %v967_v54 = vmax.f32 %v903_v34, 0.0  ;;  %v999_v55 = vmax.f32 %v935_v35, 0.0 }
 0x10b   : > { %1737 = vst [vmem:[%s2089_s20 + $0x20] sm:$0xff] %v1597_v32   ;;  %1753 = vst [vmem:[%s2089_s20 + $0xa0] sm:$0xff] %v1677_v33   ;;  %v831_v43 = vmul.f32 %v2059_v40, %v607_v38  ;;  %v863_v44 = vmul.f32 %v2059_v40, %v735_v39  ;;  %v904_v46 = vadd.f32 %v2066_v45, %v833_v36 }
 0x10c   : > { %v936_v47 = vadd.f32 %v2066_v45, %v865_v37  ;;  %v1839_v48 = vpop.f32.mrf.mxu0  ;;  %v1871_v49 = vpop.f32.mrf.mxu1  ;;  %v965_v60 = vmax.f32 %v901_v41, 0.0  ;;  %v997_v61 = vmax.f32 %v933_v42, 0.0 }
 0x10d   : > { %v902_v50 = vadd.f32 %v2066_v45, %v831_v43  ;;  %v934_v51 = vadd.f32 %v2066_v45, %v863_v44  ;;  %v836_v52 = vmul.f32 %v1839_v48, %v2059_v40  ;;  %v868_v53 = vmul.f32 %v1871_v49, %v2059_v40 }
 0x10e   : > { %v968_v56 = vmax.f32 %v904_v46, 0.0  ;;  %v1000_v57 = vmax.f32 %v936_v47, 0.0  ;;  %v620_v58 = vpop.f32.mrf.mxu0  ;;  %v748_v59 = vpop.f32.mrf.mxu1 }
 0x10f   : > { %v966_v62 = vmax.f32 %v902_v50, 0.0  ;;  %v998_v63 = vmax.f32 %v934_v51, 0.0  ;;  %v834_v2 = vmul.f32 %v2059_v40, %v620_v58  ;;  %v866_v3 = vmul.f32 %v2059_v40, %v748_v59 }
 0x110   : > { %v1612_v0 = vpack.c.bf16 %v968_v56, %v967_v54  ;;  %v1692_v1 = vpack.c.bf16 %v1000_v57, %v999_v55  ;;  %v1840_v4 = vpop.f32.mrf.mxu0  ;;  %v1872_v5 = vpop.f32.mrf.mxu1  ;;  %v907_v8 = vadd.f32 %v2066_v45, %v836_v52  ;;  %v939_v9 = vadd.f32 %v2066_v45, %v868_v53 }
 0x111   : > { %v1607_v6 = vpack.c.bf16 %v966_v62, %v965_v60  ;;  %v1687_v7 = vpack.c.bf16 %v998_v63, %v997_v61  ;;  %v837_v10 = vmul.f32 %v1840_v4, %v2059_v40  ;;  %v869_v11 = vmul.f32 %v1872_v5, %v2059_v40 }
 0x112   : > { %1740 = vst [vmem:[%s2089_s20 + $0x38] sm:$0xff] %v1612_v0   ;;  %1756 = vst [vmem:[%s2089_s20 + $0xb8] sm:$0xff] %v1692_v1   ;;  %v623_v12 = vpop.f32.mrf.mxu0  ;;  %v751_v13 = vpop.f32.mrf.mxu1  ;;  %v905_v14 = vadd.f32 %v2066_v45, %v834_v2  ;;  %v937_v15 = vadd.f32 %v2066_v45, %v866_v3  ;;  %v971_v22 = vmax.f32 %v907_v8, 0.0  ;;  %v1003_v23 = vmax.f32 %v939_v9, 0.0 }
 0x113   : > { %1739 = vst [vmem:[%s2089_s20 + $0x30] sm:$0xff] %v1607_v6   ;;  %1755 = vst [vmem:[%s2089_s20 + $0xb0] sm:$0xff] %v1687_v7   ;;  %v835_v16 = vmul.f32 %v2059_v40, %v623_v12  ;;  %v867_v17 = vmul.f32 %v2059_v40, %v751_v13  ;;  %v908_v18 = vadd.f32 %v2066_v45, %v837_v10 }
 0x114   : > { %v940_v19 = vadd.f32 %v2066_v45, %v869_v11  ;;  %v1843_v20 = vpop.f32.mrf.mxu0  ;;  %v1875_v21 = vpop.f32.mrf.mxu1  ;;  %v969_v32 = vmax.f32 %v905_v14, 0.0  ;;  %v1001_v33 = vmax.f32 %v937_v15, 0.0 }
 0x115   : > { %v906_v24 = vadd.f32 %v2066_v45, %v835_v16  ;;  %v938_v25 = vadd.f32 %v2066_v45, %v867_v17  ;;  %v972_v26 = vmax.f32 %v908_v18, 0.0  ;;  %v840_v28 = vmul.f32 %v1843_v20, %v2059_v40 }
 0x116   : > { %v1004_v27 = vmax.f32 %v940_v19, 0.0  ;;  %v872_v29 = vmul.f32 %v1875_v21, %v2059_v40  ;;  %v636_v30 = vpop.f32.mrf.mxu0  ;;  %v764_v31 = vpop.f32.mrf.mxu1 }
 0x117   : > { %v970_v34 = vmax.f32 %v906_v24, 0.0  ;;  %v1002_v35 = vmax.f32 %v938_v25, 0.0  ;;  %v1622_v36 = vpack.c.bf16 %v972_v26, %v971_v22  ;;  %v838_v38 = vmul.f32 %v2059_v40, %v636_v30 }
 0x118   : > { %v1702_v37 = vpack.c.bf16 %v1004_v27, %v1003_v23  ;;  %v870_v39 = vmul.f32 %v2059_v40, %v764_v31  ;;  %v1844_v41 = vpop.f32.mrf.mxu0  ;;  %v1876_v42 = vpop.f32.mrf.mxu1  ;;  %v911_v46 = vadd.f32 %v2066_v45, %v840_v28  ;;  %v943_v47 = vadd.f32 %v2066_v45, %v872_v29 }
 0x119   : > { %v1617_v43 = vpack.c.bf16 %v970_v34, %v969_v32  ;;  %v1697_v44 = vpack.c.bf16 %v1002_v35, %v1001_v33  ;;  %1742 = vst [vmem:[%s2089_s20 + $0x48] sm:$0xff] %v1622_v36   ;;  %v841_v48 = vmul.f32 %v1844_v41, %v2059_v40  ;;  %v873_v49 = vmul.f32 %v1876_v42, %v2059_v40 }
 0x11a   : > { %1758 = vst [vmem:[%s2089_s20 + $0xc8] sm:$0xff] %v1702_v37   ;;  %v639_v50 = vpop.f32.mrf.mxu0  ;;  %v767_v51 = vpop.f32.mrf.mxu1  ;;  %v909_v52 = vadd.f32 %v2066_v45, %v838_v38  ;;  %v941_v53 = vadd.f32 %v2066_v45, %v870_v39  ;;  %v975_v0 = vmax.f32 %v911_v46, 0.0  ;;  %v1007_v1 = vmax.f32 %v943_v47, 0.0 }
 0x11b   : > { %1741 = vst [vmem:[%s2089_s20 + $0x40] sm:$0xff] %v1617_v43   ;;  %1757 = vst [vmem:[%s2089_s20 + $0xc0] sm:$0xff] %v1697_v44   ;;  %v839_v54 = vmul.f32 %v2059_v40, %v639_v50  ;;  %v871_v55 = vmul.f32 %v2059_v40, %v767_v51  ;;  %v912_v56 = vadd.f32 %v2066_v45, %v841_v48 }
 0x11c   : > { %v944_v57 = vadd.f32 %v2066_v45, %v873_v49  ;;  %v1847_v58 = vpop.f32.mrf.mxu0  ;;  %v1879_v59 = vpop.f32.mrf.mxu1  ;;  %v973_v6 = vmax.f32 %v909_v52, 0.0  ;;  %v1005_v7 = vmax.f32 %v941_v53, 0.0 }
 0x11d   : > { %v910_v60 = vadd.f32 %v2066_v45, %v839_v54  ;;  %v942_v61 = vadd.f32 %v2066_v45, %v871_v55  ;;  %v844_v62 = vmul.f32 %v1847_v58, %v2059_v40  ;;  %v876_v63 = vmul.f32 %v1879_v59, %v2059_v40 }
 0x11e   : > { %v976_v2 = vmax.f32 %v912_v56, 0.0  ;;  %v1008_v3 = vmax.f32 %v944_v57, 0.0  ;;  %v652_v4 = vpop.f32.mrf.mxu0  ;;  %v780_v5 = vpop.f32.mrf.mxu1 }
 0x11f   : > { %v974_v8 = vmax.f32 %v910_v60, 0.0  ;;  %v1006_v9 = vmax.f32 %v942_v61, 0.0  ;;  %v842_v12 = vmul.f32 %v2059_v40, %v652_v4  ;;  %v874_v13 = vmul.f32 %v2059_v40, %v780_v5 }
 0x120   : > { %v1632_v10 = vpack.c.bf16 %v976_v2, %v975_v0  ;;  %v1712_v11 = vpack.c.bf16 %v1008_v3, %v1007_v1  ;;  %v1848_v14 = vpop.f32.mrf.mxu0  ;;  %v1880_v15 = vpop.f32.mrf.mxu1  ;;  %v915_v18 = vadd.f32 %v2066_v45, %v844_v62  ;;  %v947_v19 = vadd.f32 %v2066_v45, %v876_v63 }
 0x121   : > { %v1627_v16 = vpack.c.bf16 %v974_v8, %v973_v6  ;;  %v1707_v17 = vpack.c.bf16 %v1006_v9, %v1005_v7  ;;  %v845_v20 = vmul.f32 %v1848_v14, %v2059_v40  ;;  %v877_v21 = vmul.f32 %v1880_v15, %v2059_v40 }
 0x122   : > { %1744 = vst [vmem:[%s2089_s20 + $0x58] sm:$0xff] %v1632_v10   ;;  %1760 = vst [vmem:[%s2089_s20 + $0xd8] sm:$0xff] %v1712_v11   ;;  %v655_v22 = vpop.f32.mrf.mxu0  ;;  %v783_v23 = vpop.f32.mrf.mxu1  ;;  %v913_v24 = vadd.f32 %v2066_v45, %v842_v12  ;;  %v945_v25 = vadd.f32 %v2066_v45, %v874_v13  ;;  %v979_v32 = vmax.f32 %v915_v18, 0.0  ;;  %v1011_v33 = vmax.f32 %v947_v19, 0.0 }
 0x123   : > { %1743 = vst [vmem:[%s2089_s20 + $0x50] sm:$0xff] %v1627_v16   ;;  %1759 = vst [vmem:[%s2089_s20 + $0xd0] sm:$0xff] %v1707_v17   ;;  %v843_v26 = vmul.f32 %v2059_v40, %v655_v22  ;;  %v875_v27 = vmul.f32 %v2059_v40, %v783_v23  ;;  %v916_v28 = vadd.f32 %v2066_v45, %v845_v20 }
 0x124   : > { %v948_v29 = vadd.f32 %v2066_v45, %v877_v21  ;;  %v1851_v30 = vpop.f32.mrf.mxu0  ;;  %v1883_v31 = vpop.f32.mrf.mxu1  ;;  %v977_v43 = vmax.f32 %v913_v24, 0.0  ;;  %v1009_v44 = vmax.f32 %v945_v25, 0.0 }
 0x125   : > { %v914_v34 = vadd.f32 %v2066_v45, %v843_v26  ;;  %v946_v35 = vadd.f32 %v2066_v45, %v875_v27  ;;  %v980_v36 = vmax.f32 %v916_v28, 0.0  ;;  %v848_v38 = vmul.f32 %v1851_v30, %v2059_v40 }
 0x126   : > { %v1012_v37 = vmax.f32 %v948_v29, 0.0  ;;  %v880_v39 = vmul.f32 %v1883_v31, %v2059_v40  ;;  %v668_v41 = vpop.f32.mrf.mxu0  ;;  %v796_v42 = vpop.f32.mrf.mxu1 }
 0x127   : > { %v978_v46 = vmax.f32 %v914_v34, 0.0  ;;  %v1010_v47 = vmax.f32 %v946_v35, 0.0  ;;  %v1642_v48 = vpack.c.bf16 %v980_v36, %v979_v32  ;;  %v846_v50 = vmul.f32 %v2059_v40, %v668_v41 }
 0x128   : > { %v1722_v49 = vpack.c.bf16 %v1012_v37, %v1011_v33  ;;  %v878_v51 = vmul.f32 %v2059_v40, %v796_v42  ;;  %v1852_v52 = vpop.f32.mrf.mxu0  ;;  %v1884_v53 = vpop.f32.mrf.mxu1  ;;  %v919_v56 = vadd.f32 %v2066_v45, %v848_v38  ;;  %v951_v57 = vadd.f32 %v2066_v45, %v880_v39 }
 0x129   : > { %v1637_v54 = vpack.c.bf16 %v978_v46, %v977_v43  ;;  %v1717_v55 = vpack.c.bf16 %v1010_v47, %v1009_v44  ;;  %1746 = vst [vmem:[%s2089_s20 + $0x68] sm:$0xff] %v1642_v48   ;;  %v849_v58 = vmul.f32 %v1852_v52, %v2059_v40  ;;  %v881_v59 = vmul.f32 %v1884_v53, %v2059_v40 }
 0x12a   : > { %1762 = vst [vmem:[%s2089_s20 + $0xe8] sm:$0xff] %v1722_v49   ;;  %v671_v60 = vpop.f32.mrf.mxu0  ;;  %v799_v61 = vpop.f32.mrf.mxu1  ;;  %v917_v62 = vadd.f32 %v2066_v45, %v846_v50  ;;  %v949_v63 = vadd.f32 %v2066_v45, %v878_v51  ;;  %v983_v6 = vmax.f32 %v919_v56, 0.0  ;;  %v1015_v7 = vmax.f32 %v951_v57, 0.0 }
 0x12b   : > { %1745 = vst [vmem:[%s2089_s20 + $0x60] sm:$0xff] %v1637_v54   ;;  %1761 = vst [vmem:[%s2089_s20 + $0xe0] sm:$0xff] %v1717_v55   ;;  %v847_v0 = vmul.f32 %v2059_v40, %v671_v60  ;;  %v879_v1 = vmul.f32 %v2059_v40, %v799_v61  ;;  %v920_v2 = vadd.f32 %v2066_v45, %v849_v58 }
 0x12c   : > { %v952_v3 = vadd.f32 %v2066_v45, %v881_v59  ;;  %v981_v10 = vmax.f32 %v917_v62, 0.0  ;;  %v1013_v11 = vmax.f32 %v949_v63, 0.0 }
 0x12d   : > { %v918_v4 = vadd.f32 %v2066_v45, %v847_v0  ;;  %v950_v5 = vadd.f32 %v2066_v45, %v879_v1  ;;  %v984_v8 = vmax.f32 %v920_v2, 0.0 }
 0x12e   : > { %v1016_v9 = vmax.f32 %v952_v3, 0.0 }
 0x12f   : > { %v982_v12 = vmax.f32 %v918_v4, 0.0  ;;  %v1014_v40 = vmax.f32 %v950_v5, 0.0  ;;  %v1652_v13 = vpack.c.bf16 %v984_v8, %v983_v6 }
 0x130   : > { %v1732_v14 = vpack.c.bf16 %v1016_v9, %v1015_v7 }
 0x131   : > { %v1647_v15 = vpack.c.bf16 %v982_v12, %v981_v10  ;;  %v1727_v16 = vpack.c.bf16 %v1014_v40, %v1013_v11  ;;  %1748 = vst [vmem:[%s2089_s20 + $0x78] sm:$0xff] %v1652_v13  }
 0x132   : > { %1764 = vst [vmem:[%s2089_s20 + $0xf8] sm:$0xff] %v1732_v14  }
 0x133   : > { %1747 = vst [vmem:[%s2089_s20 + $0x70] sm:$0xff] %v1647_v15   ;;  %1763 = vst [vmem:[%s2089_s20 + $0xf0] sm:$0xff] %v1727_v16  }
 0x134 PF: > { %s14_s15 = sadd.s32 1, %s1955_s15  }
 0x135   : > { %p11_p4 = scmp.ge.s32.totalorder %s14_s15, 4  }
 0x137   :  { %13 = sbr.rel (!%p11_p4) target bundleno = 1 (0x1), region = 66 }

// kernel: bottleneck_forward.3
= control target key start
LH: loop header
LB: loop body
LE: loop exit
PB: predicated region body
PF: predicated region fallthrough
CT: control target
= control target key end

     0   :  { %s7903_s13 = smov 0   ;;  %s7905_s14 = smov 0   ;;  %s9811_s0 = inlined_call_operand.vmem [shape: bf16[2,10,10,10,128], index: 0, kind: input, shape index: {}, may-alias: {0,1,2}]   ;;  %s9812_s1 = inlined_call_operand.vmem [shape: bf16[2,10,10,10,128], index: 1, kind: input, shape index: {}, may-alias: {0,1,2}]   ;;  %s9813_s2 = inlined_call_operand.vmem [shape: bf16[2,10,10,10,128], index: 2, kind: input, shape index: {}, may-alias: {0,1,2}]   ;;  %s9814_s3 = inlined_call_operand.vmem [shape: bf16[3456,128], index: 3, kind: input, shape index: {}]   ;;  %s9815_s4 = inlined_call_operand.vmem [shape: f32[1,128], index: 4, kind: input, shape index: {}]   ;;  %s9816_s5 = inlined_call_operand.vmem [shape: f32[1,128], index: 5, kind: input, shape index: {}]   ;;  %s9817_s6 = inlined_call_operand.vmem [shape: bf16[128,128], index: 6, kind: input, shape index: {}]   ;;  %s9818_s7 = inlined_call_operand.vmem [shape: f32[1,128], index: 7, kind: input, shape index: {}]   ;;  %s9819_s8 = inlined_call_operand.vmem [shape: f32[1,128], index: 8, kind: input, shape index: {}]   ;;  %s9820_s9 = inlined_call_operand.vmem [shape: f32[2,8,64,128], index: 9, kind: input, shape index: {}]   ;;  %s9821_s10 = inlined_call_operand.vmem [shape: f32[2,8,64,128], index: 10, kind: output, shape index: {}]  }
   0x1   :  { %s7907_s15 = smov 0   ;;  %s7909_s16 = smov 0  }
   0x2   :  { %s7911_s17 = smov 0  }
   0x3 LB: > { %s29_s18 = sadd.s32 1, %s7838_s15  ;;  %s32_s19 = sadd.s32 1, %s7842_s16  ;;  %s7846_s17 = sphi %s7911_s17, %s20_s17   ;;  %s7842_s16 = sphi %s7909_s16, %s9925_s16   ;;  %s7838_s15 = sphi %s7907_s15, %s9924_s15   ;;  %s7834_s14 = sphi %s7905_s14, %s9923_s14   ;;  %s7830_s13 = sphi %s7903_s13, %s9922_s13  }
   0x4   : > { %p30_p0 = scmp.ge.s32.totalorder %s29_s18, 8  ;;  %p6080_p1 = scmp.ge.s32.totalorder %s7846_s17, 1 }
   0x5   : > { %p388_p2 = scmp.lt.s32.totalorder %s7846_s17, 17 }
   0x6   : > { %s9927_s18 = smov (%p30_p0, %s29_s18), 0  ;;  %s9929_s19 = smov (!%p30_p0, %s32_s19), %s7842_s16 }
   0x7   : > { %p389_p3 = pnand %p6080_p1, %p388_p2  ;;  %p34_p4 = scmp.ge.s32.totalorder %s9929_s19, 2 }
   0x9   : > { %s9931_s19 = smov (%p34_p4, %s9929_s19), 0  ;;  %392 = sbr.rel (%p389_p3) target bundleno = 817 (0x331), region = 60 }
   0xe   : > { %v7392_v0 = vld [vmem:[%s9814_s3 + $0x78] sm:$0xff]   ;;  %v7396_v4 = vld [vmem:[%s9814_s3 + $0x70] sm:$0xff]   ;;  %v7400_v8 = vld [vmem:[%s9814_s3 + $0x68] sm:$0xff]   ;;  %p463_p5 = scmp.lt.s32.totalorder %s7834_s14, 1  ;;  %p465_p6 = scmp.lt.s32.totalorder %s7830_s13, 9 }
   0xf   : > { %v7393_v1 = vld [vmem:[%s9814_s3 + $0xf8] sm:$0xff]   ;;  %6740 = vmatprep.subr.bf16.mxu0 %v7392_v0  ;;  %v7397_v5 = vld [vmem:[%s9814_s3 + $0xf0] sm:$0xff]   ;;  %v7401_v9 = vld [vmem:[%s9814_s3 + $0xe8] sm:$0xff]   ;;  %s472_s28 = sadd.s32 1, %s7830_s13  ;;  %s483_s24 = sadd.s32 2, %s7830_s13 }
  0x10   : > { %v7394_v2 = vld [vmem:[%s9814_s3 + $0x38] sm:$0xff]   ;;  %6780 = vmatprep.subr.bf16.mxu1 %v7393_v1  ;;  %v7398_v6 = vld [vmem:[%s9814_s3 + $0x30] sm:$0xff]   ;;  %v7402_v10 = vld [vmem:[%s9814_s3 + $0x28] sm:$0xff]   ;;  %s9933_s14 = smov (!%p463_p5, %s7834_s14), 1  ;;  %p8249_p7 = scmp.lt.s32.totalorder %s472_s28, 9 }
  0x11   : > { %v7395_v3 = vld [vmem:[%s9814_s3 + $0xb8] sm:$0xff]   ;;  %6741 = vmatpush3.bf16.msra.mxu0 %v7394_v2  ;;  %v7399_v7 = vld [vmem:[%s9814_s3 + $0xb0] sm:$0xff]   ;;  %v7403_v11 = vld [vmem:[%s9814_s3 + $0xa8] sm:$0xff]   ;;  %s466_s26 = scalar_select %p465_p6, %s7830_s13, 9 }
  0x12   : > { %6781 = vmatpush3.bf16.msra.mxu1 %v7395_v3  ;;  %6742 = vmatprep.subr.bf16.mxu0 %v7396_v4  ;;  %v7404_v12 = vld [vmem:[%s9814_s3 + $0x60] sm:$0xff]   ;;  %v7408_v16 = vld [vmem:[%s9814_s3 + $0x58] sm:$0xff]   ;;  %s8001_s20 = smul.u32 200, %s9933_s14  ;;  %v7412_v20 = vld [vmem:[%s9814_s3 + $0x50] sm:$0xff]   ;;  %s9935_s28 = smov (!%p8249_p7, %s472_s28), 9 }
  0x13   : > { %6782 = vmatprep.subr.bf16.mxu1 %v7397_v5  ;;  %v7405_v13 = vld [vmem:[%s9814_s3 + $0xe0] sm:$0xff]   ;;  %v7409_v17 = vld [vmem:[%s9814_s3 + $0xd8] sm:$0xff]   ;;  %s7348_s23 = smul.u32 20, %s466_s26  ;;  %v7413_v21 = vld [vmem:[%s9814_s3 + $0xd0] sm:$0xff]   ;;  %p8646_p8 = scmp.lt.s32.totalorder %s483_s24, 9 }
  0x14   : > { %v7406_v14 = vld [vmem:[%s9814_s3 + $0x20] sm:$0xff]   ;;  %v7410_v18 = vld [vmem:[%s9814_s3 + $0x18] sm:$0xff]   ;;  %v7414_v22 = vld [vmem:[%s9814_s3 + $0x10] sm:$0xff]   ;;  %s7350_s21 = smul.u32 20, %s9935_s28  ;;  %p496_p9 = scmp.lt.s32.totalorder %s7830_s13, 7 }
  0x15   : > { %6743 = vmatpush3.bf16.msra.mxu0 %v7398_v6  ;;  %v7407_v15 = vld [vmem:[%s9814_s3 + $0xa0] sm:$0xff]   ;;  %v7411_v19 = vld [vmem:[%s9814_s3 + $0x98] sm:$0xff]   ;;  %v7415_v23 = vld [vmem:[%s9814_s3 + $0x90] sm:$0xff]   ;;  %s469_s26 = sadd.s32 %s8001_s20, %s7348_s23  ;;  %s9937_s24 = smov (!%p8646_p8, %s483_s24), 9 }
  0x16   : > { %6783 = vmatpush3.bf16.msra.mxu1 %v7399_v7  ;;  %6744 = vmatprep.subr.bf16.mxu0 %v7400_v8  ;;  %v7416_v24 = vld [vmem:[%s9814_s3 + $0x48] sm:$0xff]   ;;  %s6081_s29 = sshll.u32 %s469_s26, 2  ;;  %v7420_v28 = vld [vmem:[%s9814_s3 + $0x40] sm:$0xff]   ;;  %v7434_v49 = vld [vmem:[%s9814_s3 + $0x178] sm:$0xff]   ;;  %s8433_s22 = sadd.s32 %s7350_s21, %s8001_s20 }
  0x17   : > { %6784 = vmatprep.subr.bf16.mxu1 %v7401_v9  ;;  %v7417_v25 = vld [vmem:[%s9814_s3 + $0xc8] sm:$0xff]   ;;  %v7421_v29 = vld [vmem:[%s9814_s3 + $0xc0] sm:$0xff]   ;;  %s8040_s27 = scalar_lea.vmem %s9811_s0, %s6081_s29  ;;  %v7436_v53 = vld [vmem:[%s9814_s3 + $0x1f8] sm:$0xff]   ;;  %s6082_s25 = sshll.u32 %s8433_s22, 2 }
  0x18   : > { %v7418_v26 = vld [vmem:[%s9814_s3 + $0x8] sm:$0xff]   ;;  %v7422_v30 = vld [vmem:[%s9814_s3] sm:$0xff]   ;;  %v8056_v38 = vld [vmem:[%s8040_s27 + $0x10] sm:$0xf]  ;;  %s8459_s12 = scalar_lea.vmem %s9812_s1, %s6082_s25  ;;  %s7351_s23 = smul.u32 20, %s9937_s24 }
  0x19   : > { %6745 = vmatpush3.bf16.msra.mxu0 %v7402_v10  ;;  %v7419_v27 = vld [vmem:[%s9814_s3 + $0x88] sm:$0xff]   ;;  %v7423_v31 = vld [vmem:[%s9814_s3 + $0x80] sm:$0xff]   ;;  %v7435_v55 = vld [vmem:[%s9814_s3 + $0x138] sm:$0xff]   ;;  %s9939_s13 = smov (!%p496_p9, %s7830_s13), 7 }
  0x1a   : > { %6785 = vmatpush3.bf16.msra.mxu1 %v7403_v11  ;;  %6746 = vmatprep.subr.bf16.mxu0 %v7404_v12  ;;  %v513_v32 = vld [vmem:[%s8040_s27] sm:$0xf]  ;;  %v514_v33 = vld [vmem:[%s8040_s27 + $0x8] sm:$0xf]  ;;  %v521_v34 = vld [vmem:[%s8040_s27 + $0x4] sm:$0x1] }
  0x1b   : > { %6786 = vmatprep.subr.bf16.mxu1 %v7405_v13  ;;  %v522_v35 = vld [vmem:[%s8040_s27 + $0xc] sm:$0x1]  ;;  %v6234_v36 = vcombine.low %v513_v32, %v521_v34  ;;  %v8053_v37 = vld [vmem:[%s8040_s27 + $0x8] sm:$0xf]  ;;  %v529_v43 = vld [vmem:[%s8040_s27] sm:$0xe]  ;;  %v6402_v56 = vcombine.low %v513_v32, %v514_v33 }
  0x1c   : > { %v6235_v39 = vcombine.low %v514_v33, %v522_v35  ;;  %v6405_v40 = vcombine.low %v8053_v37, %v8056_v38  ;;  %v530_v46 = vld [vmem:[%s8040_s27 + $0x8] sm:$0xe]  ;;  %v6242_v51 = vcombine.low %v529_v43, %v521_v34  ;;  %v7437_v60 = vld [vmem:[%s9814_s3 + $0x1b8] sm:$0xff]   ;;  %v7438_v62 = vld [vmem:[%s9814_s3 + $0x170] sm:$0xff]   ;;  %s6084_s29 = sshll.u32 %s9939_s13, 3 }
  0x1d   : > { %6747 = vmatpush3.bf16.msra.mxu0 %v7406_v14  ;;  %v776_v41 = vshrl.u32 %v6234_v36, 16  ;;  %v778_v42 = vshll.u32 %v6234_v36, 16  ;;  %v6243_v52 = vcombine.low %v530_v46, %v522_v35  ;;  %v7439_v63 = vld [vmem:[%s9814_s3 + $0x130] sm:$0xff]   ;;  %v516_v2 = vld [vmem:[%s8040_s27 + $0x18] sm:$0xf]  ;;  %v7450_v13 = vld [vmem:[%s9814_s3 + $0x168] sm:$0xff]  }
  0x1e   : > { %6787 = vmatpush3.bf16.msra.mxu1 %v7407_v15  ;;  %6748 = vmatprep.subr.bf16.mxu0 %v7408_v16  ;;  %v783_v44 = vshrl.u32 %v6235_v39, 16  ;;  %v785_v45 = vshll.u32 %v6235_v39, 16  ;;  %v855_v57 = vrot.slane %v6242_v51, 1  ;;  %v7440_v0 = vld [vmem:[%s9814_s3 + $0x1f0] sm:$0xff]   ;;  %v524_v4 = vld [vmem:[%s8040_s27 + $0x1c] sm:$0x1] }
  0x1f   : > { %6788 = vmatprep.subr.bf16.mxu1 %v7409_v17  ;;  %4872 = vmatprep.mubr.bf16.mxu1 %v6405_v40  ;;  %v780_v47 = vrot.slane %v778_v42, 1  ;;  %v856_v58 = vrot.slane %v6243_v52, 1  ;;  %v515_v1 = vld [vmem:[%s8040_s27 + $0x10] sm:$0xf]  ;;  %v523_v3 = vld [vmem:[%s8040_s27 + $0x14] sm:$0x1]  ;;  %v6237_v8 = vcombine.low %v516_v2, %v524_v4 }
  0x20   : > { %v787_v48 = vrot.slane %v785_v45, 1  ;;  %v6236_v5 = vcombine.low %v515_v1, %v523_v3  ;;  %v8088_v6 = vld [vmem:[%s8040_s27 + $0x18] sm:$0xf]  ;;  %v8091_v7 = vld [vmem:[%s8040_s27 + $0x20] sm:$0xf]  ;;  %v7446_v12 = vld [vmem:[%s9814_s3 + $0x1b0] sm:$0xff]   ;;  %v6429_v32 = vcombine.low %v515_v1, %v516_v2 }
  0x21   : > { %6749 = vmatpush3.bf16.msra.mxu0 %v7410_v18  ;;  %v781_v50 = vor.u32 %v780_v47, %v776_v41  ;;  %v6404_v61 = vcombine.low %v855_v57, %v856_v58  ;;  %v6432_v9 = vcombine.low %v8088_v6, %v8091_v7  ;;  %v797_v14 = vshrl.u32 %v6237_v8, 16  ;;  %v531_v16 = vld [vmem:[%s8040_s27 + $0x10] sm:$0xe]  ;;  %v532_v17 = vld [vmem:[%s8040_s27 + $0x18] sm:$0xe]  ;;  %v7455_v36 = vld [vmem:[%s9814_s3 + $0x120] sm:$0xff]  }
  0x22   : > { %6789 = vmatpush3.bf16.msra.mxu1 %v7411_v19  ;;  %6750 = vmatprep.subr.bf16.mxu0 %v7412_v20  ;;  %v788_v54 = vor.u32 %v787_v48, %v783_v44  ;;  %v790_v10 = vshrl.u32 %v6236_v5, 16  ;;  %v792_v11 = vshll.u32 %v6236_v5, 16  ;;  %v799_v15 = vshll.u32 %v6237_v8, 16  ;;  %v8104_v18 = vld [vmem:[%s8040_s27 + $0xc] sm:$0x1]  ;;  %v7456_v39 = vld [vmem:[%s9814_s3 + $0x1e0] sm:$0xff]  }
  0x23   : > { %6790 = vmatprep.subr.bf16.mxu1 %v7413_v21  ;;  %v6244_v20 = vcombine.low %v531_v16, %v523_v3  ;;  %v7451_v21 = vld [vmem:[%s9814_s3 + $0x128] sm:$0xff]   ;;  %v8123_v33 = vcombine.low %v8053_v37, %v8104_v18  ;;  %v517_v37 = vld [vmem:[%s8040_s27 + $0x20] sm:$0xf]  ;;  %v525_v41 = vld [vmem:[%s8040_s27 + $0x24] sm:$0x1] }
  0x24   : > { %v6403_v59 = vcombine.low %v781_v50, %v788_v54  ;;  %v794_v19 = vrot.slane %v792_v11, 1  ;;  %v518_v40 = vld [vmem:[%s8040_s27 + $0x28] sm:$0xf]  ;;  %v526_v44 = vld [vmem:[%s8040_s27 + $0x2c] sm:$0x1]  ;;  %v6238_v45 = vcombine.low %v517_v37, %v525_v41  ;;  %v7462_v54 = vld [vmem:[%s9814_s3 + $0x1a0] sm:$0xff]  }
  0x25   : > { %6751 = vmatpush3.bf16.msra.mxu0 %v7414_v22  ;;  %v801_v22 = vrot.slane %v799_v15, 1  ;;  %v6106_v42 = vld [vmem:[%s8040_s27 + $0x8] sm:$0xe]  ;;  %v8145_v47 = vld [vmem:[%s8040_s27 + $0x30] sm:$0xf]  ;;  %v906_v50 = vshll.u32 %v8123_v33, 16  ;;  %v6239_v51 = vcombine.low %v518_v40, %v526_v44 }
  0x26   : > { %6791 = vmatpush3.bf16.msra.mxu1 %v7415_v23  ;;  %6752 = vmatprep.subr.bf16.mxu0 %v7416_v24  ;;  %v6245_v23 = vcombine.low %v532_v17, %v524_v4  ;;  %v7452_v24 = vld [vmem:[%s9814_s3 + $0x1e8] sm:$0xff]   ;;  %v6107_v48 = vld [vmem:[%s8040_s27 + $0x10] sm:$0xe]  ;;  %v804_v52 = vshrl.u32 %v6238_v45, 16  ;;  %v533_v58 = vld [vmem:[%s8040_s27 + $0x20] sm:$0xe]  ;;  %v6258_v1 = vcombine.low %v6106_v42, %v8104_v18 }
  0x27   : > { %6792 = vmatprep.subr.bf16.mxu1 %v7417_v25  ;;  %4807 = vmatprep.mubr.bf16.mxu0 %v6403_v59  ;;  %v795_v25 = vor.u32 %v794_v19, %v790_v10  ;;  %v8142_v46 = vld [vmem:[%s8040_s27 + $0x28] sm:$0xf]  ;;  %v813_v57 = vshll.u32 %v6239_v51, 16  ;;  %v7468_v4 = vld [vmem:[%s9814_s3 + $0x1d8] sm:$0xff]   ;;  %v7471_v18 = vld [vmem:[%s9814_s3 + $0x110] sm:$0xff]  }
  0x28   : > { %v534_v59 = vld [vmem:[%s8040_s27 + $0x28] sm:$0xe]  ;;  %v7469_v10 = vld [vmem:[%s9814_s3 + $0x198] sm:$0xff]   ;;  %v8176_v15 = vrot.slane %v6258_v1, 1 }
  0x29   : > { %6753 = vmatpush3.bf16.msra.mxu0 %v7418_v26  ;;  %v857_v26 = vrot.slane %v6244_v20, 1  ;;  %v815_v2 = vrot.slane %v813_v57, 1  ;;  %v6247_v3 = vcombine.low %v534_v59, %v526_v44  ;;  %v7472_v20 = vld [vmem:[%s9814_s3 + $0x1d0] sm:$0xff]   ;;  %v536_v42 = vld [vmem:[%s8040_s27 + $0x38] sm:$0xe] }
  0x2a   : > { %6793 = vmatpush3.bf16.msra.mxu1 %v7419_v27  ;;  %6754 = vmatprep.subr.bf16.mxu0 %v7420_v28  ;;  %v7453_v27 = vld [vmem:[%s9814_s3 + $0x1a8] sm:$0xff]   ;;  %v8116_v28 = vld [vmem:[%s8040_s27 + $0x14] sm:$0x1]  ;;  %v8213_v44 = vld [vmem:[%s8040_s27 + $0x24] sm:$0x1] }
  0x2b   : > { %6794 = vmatprep.subr.bf16.mxu1 %v7421_v29  ;;  %v802_v29 = vor.u32 %v801_v22, %v797_v14  ;;  %v8138_v43 = vcombine.low %v8056_v38, %v8116_v28  ;;  %v6459_v38 = vcombine.low %v8142_v46, %v8145_v47  ;;  %v6259_v5 = vcombine.low %v6107_v48, %v8116_v28  ;;  %v520_v22 = vld [vmem:[%s8040_s27 + $0x38] sm:$0xf] }
  0x2c   : > { %v6456_v14 = vcombine.low %v517_v37, %v518_v40  ;;  %v908_v28 = vrot.slane %v906_v50, 1  ;;  %v7483_v50 = vld [vmem:[%s9814_s3 + $0x108] sm:$0xff]  }
  0x2d   : > { %6755 = vmatpush3.bf16.msra.mxu0 %v7422_v30  ;;  %v858_v30 = vrot.slane %v6245_v23, 1  ;;  %v6430_v34 = vcombine.low %v795_v25, %v802_v29  ;;  %v8181_v19 = vrot.slane %v6259_v5, 1  ;;  %v527_v23 = vld [vmem:[%s8040_s27 + $0x34] sm:$0x1] }
  0x2e   : > { %6795 = vmatpush3.bf16.msra.mxu1 %v7423_v31  ;;  %6820 = vmatprep.subr.bf16.mxu0 %v7434_v49  ;;  %v7454_v31 = vld [vmem:[%s9814_s3 + $0x160] sm:$0xff]   ;;  %v904_v49 = vshrl.u32 %v8123_v33, 16  ;;  %v8282_v33 = vld [vmem:[%s8040_s27 + $0x1c] sm:$0x1] }
  0x2f   : > { %6860 = vmatprep.subr.bf16.mxu1 %v7436_v53  ;;  %v6431_v35 = vcombine.low %v857_v26, %v858_v30  ;;  %v806_v53 = vshll.u32 %v6238_v45, 16  ;;  %v8194_v26 = vld [vmem:[%s8040_s27 + $0x38] sm:$0xf]  ;;  %v8200_v30 = vld [vmem:[%s8040_s27 + $0x1c] sm:$0x1] }
  0x30   : > { %4808 = vmatmul.mubr.bf16.vlgmr.msra.gmra.mxu0 %v6402_v56  ;;  %v811_v56 = vshrl.u32 %v6239_v51, 16 }
  0x31   : > { %4873 = vmatmul.mubr.bf16.vlgmr.msra.gmra.mxu1 %v6404_v61  ;;  %6821 = vmatpush3.bf16.msra.mxu0 %v7435_v55  ;;  %v7466_v55 = vld [vmem:[%s9814_s3 + $0x158] sm:$0xff]   ;;  %v913_v61 = vshll.u32 %v8138_v43, 16 }
  0x32   : > { %6861 = vmatpush3.bf16.msra.mxu1 %v7437_v60  ;;  %6822 = vmatprep.subr.bf16.mxu0 %v7438_v62  ;;  %v911_v60 = vshrl.u32 %v8138_v43, 16  ;;  %v808_v62 = vrot.slane %v806_v53, 1  ;;  %v816_v11 = vor.u32 %v815_v2, %v811_v56  ;;  %v8223_v53 = vcombine.low %v8088_v6, %v8200_v30  ;;  %v7486_v6 = vld [vmem:[%s9814_s3 + $0x140] sm:$0xff]  }
  0x33   : > { %6862 = vmatprep.subr.bf16.mxu1 %v7440_v0  ;;  %4880 = vmatprep.mubr.bf16.mxu1 %v6432_v9  ;;  %v7467_v0 = vld [vmem:[%s9814_s3 + $0x118] sm:$0xff]   ;;  %v915_v29 = vrot.slane %v913_v61, 1  ;;  %v7487_v2 = vld [vmem:[%s9814_s3 + $0x100] sm:$0xff]  }
  0x34   : > { %4815 = vmatprep.mubr.bf16.mxu0 %v6430_v34  ;;  %v809_v8 = vor.u32 %v808_v62, %v804_v52  ;;  %v7484_v52 = vld [vmem:[%s9814_s3 + $0x1c8] sm:$0xff]   ;;  %v8239_v62 = vcombine.low %v8091_v7, %v8213_v44  ;;  %v920_v7 = vshll.u32 %v8223_v53, 16 }
  0x35   : > { %6823 = vmatpush3.bf16.msra.mxu0 %v7439_v63  ;;  %v6246_v63 = vcombine.low %v533_v58, %v525_v41  ;;  %v535_v41 = vld [vmem:[%s8040_s27 + $0x30] sm:$0xe]  ;;  %v7485_v58 = vld [vmem:[%s9814_s3 + $0x188] sm:$0xff]  }
  0x36   : > { %6863 = vmatpush3.bf16.msra.mxu1 %v7446_v12  ;;  %6824 = vmatprep.subr.bf16.mxu0 %v7450_v13  ;;  %v860_v12 = vrot.slane %v6247_v3, 1  ;;  %v7470_v13 = vld [vmem:[%s9814_s3 + $0x150] sm:$0xff]   ;;  %v6457_v16 = vcombine.low %v809_v8, %v816_v11  ;;  %v6248_v48 = vcombine.low %v535_v41, %v527_v23  ;;  %v6407_v3 = vcombine.low %v8176_v15, %v8181_v19  ;;  %v6108_v41 = vld [vmem:[%s8040_s27 + $0x18] sm:$0xe] }
  0x37   : > { %6864 = vmatprep.subr.bf16.mxu1 %v7452_v24  ;;  %v859_v9 = vrot.slane %v6246_v63, 1  ;;  %v528_v24 = vld [vmem:[%s8040_s27 + $0x3c] sm:$0x1]  ;;  %v916_v11 = vor.u32 %v915_v29, %v911_v60  ;;  %v922_v60 = vrot.slane %v920_v7, 1 }
  0x38   : > { %4816 = vmatmul.mubr.bf16.gmra.mxu0 %v6429_v32  ;;  %v861_v57 = vrot.slane %v6248_v48, 1 }
  0x39   : > { %6825 = vmatpush3.bf16.msra.mxu0 %v7451_v21  ;;  %4881 = vmatmul.mubr.bf16.gmra.mxu1 %v6431_v35  ;;  %v6458_v17 = vcombine.low %v859_v9, %v860_v12  ;;  %v8187_v21 = vld [vmem:[%s8040_s27 + $0x30] sm:$0xf]  ;;  %v7489_v9 = vld [vmem:[%s9814_s3 + $0x180] sm:$0xff]  }
  0x3a   : > { %6865 = vmatpush3.bf16.msra.mxu1 %v7453_v27  ;;  %6826 = vmatprep.subr.bf16.mxu0 %v7454_v31  ;;  %v6240_v25 = vcombine.low %v8187_v21, %v527_v23  ;;  %v8197_v27 = vld [vmem:[%s8040_s27 + $0x40] sm:$0xf]  ;;  %v6241_v31 = vcombine.low %v520_v22, %v528_v24  ;;  %v6483_v63 = vcombine.low %v8187_v21, %v520_v22  ;;  %v6114_v12 = vld [vmem:[%s8040_s27 + $0x10] sm:$0xf]  ;;  %v7495_v23 = vld [vmem:[%s9814_s3 + $0x238] sm:$0xff]  }
  0x3b   : > { %6866 = vmatprep.subr.bf16.mxu1 %v7456_v39  ;;  %4888 = vmatprep.mubr.bf16.mxu1 %v6459_v38  ;;  %v6486_v32 = vcombine.low %v8194_v26, %v8197_v27  ;;  %v7482_v39 = vld [vmem:[%s9814_s3 + $0x148] sm:$0xff]   ;;  %v6249_v38 = vcombine.low %v536_v42, %v528_v24  ;;  %v7497_v24 = vld [vmem:[%s9814_s3 + $0x2f8] sm:$0xff]  }
  0x3c   : > { %4823 = vmatprep.mubr.bf16.mxu0 %v6457_v16  ;;  %v818_v34 = vshrl.u32 %v6240_v25, 16  ;;  %v820_v35 = vshll.u32 %v6240_v25, 16  ;;  %v825_v37 = vshrl.u32 %v6241_v31, 16  ;;  %v827_v40 = vshll.u32 %v6241_v31, 16  ;;  %v7499_v31 = vld [vmem:[%s9814_s3 + $0x270] sm:$0xff]  }
  0x3d   : > { %6827 = vmatpush3.bf16.msra.mxu0 %v7455_v36  ;;  %v7478_v36 = vld [vmem:[%s9814_s3 + $0x190] sm:$0xff]   ;;  %v862_v61 = vrot.slane %v6249_v38, 1  ;;  %v925_v25 = vshrl.u32 %v8239_v62, 16 }
  0x3e   : > { %6867 = vmatpush3.bf16.msra.mxu1 %v7462_v54  ;;  %6828 = vmatprep.subr.bf16.mxu0 %v7466_v55  ;;  %v822_v45 = vrot.slane %v820_v35, 1  ;;  %v829_v51 = vrot.slane %v827_v40, 1  ;;  %v8226_v54 = vld [vmem:[%s8040_s27 + $0x2c] sm:$0x1]  ;;  %v8229_v55 = vld [vmem:[%s8040_s27 + $0x34] sm:$0x1] }
  0x3f   : > { %6868 = vmatprep.subr.bf16.mxu1 %v7468_v4  ;;  %v6485_v1 = vcombine.low %v861_v57, %v862_v61  ;;  %v7488_v4 = vld [vmem:[%s9814_s3 + $0x1c0] sm:$0xff]   ;;  %v8259_v5 = vcombine.low %v8142_v46, %v8226_v54  ;;  %v8263_v8 = vcombine.low %v8145_v47, %v8229_v55  ;;  %v927_v46 = vshll.u32 %v8239_v62, 16  ;;  %v7490_v47 = vld [vmem:[%s9814_s3 + $0x278] sm:$0xff]   ;;  %v7500_v40 = vld [vmem:[%s9814_s3 + $0x230] sm:$0xff]  }
  0x40   : > { %4824 = vmatmul.mubr.bf16.gmra.mxu0 %v6456_v14  ;;  %v823_v56 = vor.u32 %v822_v45, %v818_v34  ;;  %v830_v59 = vor.u32 %v829_v51, %v825_v37  ;;  %v8279_v14 = vld [vmem:[%s8040_s27 + $0x14] sm:$0x1]  ;;  %v8307_v35 = vld [vmem:[%s8040_s27 + $0x3c] sm:$0x1]  ;;  %v8317_v45 = vld [vmem:[%s8040_s27 + $0x44] sm:$0x1]  ;;  %v6260_v51 = vcombine.low %v6108_v41, %v8200_v30 }
  0x41   : > { %6829 = vmatpush3.bf16.msra.mxu0 %v7467_v0  ;;  %4889 = vmatmul.mubr.bf16.gmra.mxu1 %v6458_v17  ;;  %v6266_v43 = vcombine.low %v6114_v12, %v8279_v14  ;;  %v934_v15 = vshll.u32 %v8259_v5, 16  ;;  %v941_v16 = vshll.u32 %v8263_v8, 16  ;;  %v932_v34 = vshrl.u32 %v8259_v5, 16  ;;  %v7498_v37 = vld [vmem:[%s9814_s3 + $0x2b8] sm:$0xff]   ;;  %v7505_v61 = vld [vmem:[%s9814_s3 + $0x268] sm:$0xff]  }
  0x42   : > { %6869 = vmatpush3.bf16.msra.mxu1 %v7469_v10  ;;  %6830 = vmatprep.subr.bf16.mxu0 %v7470_v13  ;;  %v6484_v0 = vcombine.low %v823_v56, %v830_v59  ;;  %v909_v10 = vor.u32 %v908_v28, %v904_v49  ;;  %v6115_v13 = vld [vmem:[%s8040_s27 + $0x18] sm:$0xf]  ;;  %v918_v49 = vshrl.u32 %v8223_v53, 16  ;;  %v929_v28 = vrot.slane %v927_v46, 1  ;;  %v7501_v56 = vld [vmem:[%s9814_s3 + $0x2f0] sm:$0xff]  }
  0x43   : > { %6870 = vmatprep.subr.bf16.mxu1 %v7472_v20  ;;  %4896 = vmatprep.mubr.bf16.mxu1 %v6486_v32  ;;  %v6267_v17 = vcombine.low %v6115_v13, %v8282_v33  ;;  %v1032_v19 = vshrl.u32 %v6266_v43, 16  ;;  %v1034_v20 = vshll.u32 %v6266_v43, 16  ;;  %v936_v42 = vrot.slane %v934_v15, 1  ;;  %v8333_v30 = vld [vmem:[%s8040_s27 + $0x28] sm:$0xf] }
  0x44   : > { %4831 = vmatprep.mubr.bf16.mxu0 %v6484_v0  ;;  %v6408_v48 = vcombine.low %v6114_v12, %v6115_v13  ;;  %v923_v38 = vor.u32 %v922_v60, %v918_v49  ;;  %v985_v59 = vrot.slane %v6260_v51, 1  ;;  %v8337_v62 = vcombine.low %v8194_v26, %v8307_v35  ;;  %v8343_v0 = vld [vmem:[%s8040_s27 + $0x24] sm:$0x1]  ;;  %v8395_v41 = vld [vmem:[%s8040_s27 + $0x3c] sm:$0x1] }
  0x45   : > { %6831 = vmatpush3.bf16.msra.mxu0 %v7471_v18  ;;  %v6406_v18 = vcombine.low %v909_v10, %v916_v11  ;;  %v1039_v21 = vshrl.u32 %v6267_v17, 16  ;;  %v1041_v22 = vshll.u32 %v6267_v17, 16  ;;  %v1036_v29 = vrot.slane %v1034_v20, 1  ;;  %v7512_v49 = vld [vmem:[%s9814_s3 + $0x260] sm:$0xff]   ;;  %v6110_v20 = vld [vmem:[%s8040_s27 + $0x28] sm:$0xe] }
  0x46   : > { %6871 = vmatpush3.bf16.msra.mxu1 %v7478_v36  ;;  %6832 = vmatprep.subr.bf16.mxu0 %v7482_v39  ;;  %v948_v12 = vshll.u32 %v8337_v62, 16  ;;  %v7513_v60 = vld [vmem:[%s9814_s3 + $0x220] sm:$0xff]   ;;  %v937_v15 = vor.u32 %v936_v42, %v932_v34  ;;  %v7521_v51 = vld [vmem:[%s9814_s3 + $0x218] sm:$0xff]  }
  0x47   : > { %6872 = vmatprep.subr.bf16.mxu1 %v7484_v52  ;;  %v1043_v32 = vrot.slane %v1041_v22, 1  ;;  %v1037_v36 = vor.u32 %v1036_v29, %v1032_v19  ;;  %v930_v52 = vor.u32 %v929_v28, %v925_v25  ;;  %v7514_v19 = vld [vmem:[%s9814_s3 + $0x2e0] sm:$0xff]   ;;  %v946_v29 = vshrl.u32 %v8337_v62, 16 }
  0x48   : > { %4832 = vmatmul.mubr.bf16.gmra.mxu0 %v6483_v63  ;;  %v7517_v28 = vld [vmem:[%s9814_s3 + $0x2a0] sm:$0xff]   ;;  %v950_v34 = vrot.slane %v948_v12, 1 }
  0x49   : > { %6833 = vmatpush3.bf16.msra.mxu0 %v7483_v50  ;;  %4897 = vmatmul.mubr.bf16.gmra.mxu1 %v6485_v1  ;;  %v1044_v39 = vor.u32 %v1043_v32, %v1039_v21  ;;  %v6109_v50 = vld [vmem:[%s8040_s27 + $0x20] sm:$0xe]  ;;  %v8346_v1 = vld [vmem:[%s8040_s27 + $0x2c] sm:$0x1]  ;;  %v6111_v21 = vld [vmem:[%s8040_s27 + $0x30] sm:$0xe] }
  0x4a   : > { %6873 = vmatpush3.bf16.msra.mxu1 %v7485_v58  ;;  %6834 = vmatprep.subr.bf16.mxu0 %v7486_v6  ;;  %v6261_v57 = vcombine.low %v6109_v50, %v8213_v44  ;;  %v939_v58 = vshrl.u32 %v8263_v8, 16  ;;  %v8330_v6 = vld [vmem:[%s8040_s27 + $0x20] sm:$0xf]  ;;  %v7504_v44 = vld [vmem:[%s9814_s3 + $0x2b0] sm:$0xff]   ;;  %v6269_v7 = vcombine.low %v8333_v30, %v8346_v1  ;;  %v7510_v8 = vld [vmem:[%s9814_s3 + $0x2e8] sm:$0xff]   ;;  %v6263_v25 = vcombine.low %v6111_v21, %v8229_v55 }
  0x4b   : > { %6874 = vmatprep.subr.bf16.mxu1 %v7488_v4  ;;  %4937 = vmatprep.mubr.bf16.mxu0 %v6407_v3  ;;  %v6409_v53 = vcombine.low %v1037_v36, %v1044_v39  ;;  %v6433_v3 = vcombine.low %v923_v38, %v930_v52  ;;  %v6268_v26 = vcombine.low %v8330_v6, %v8343_v0  ;;  %v7518_v32 = vld [vmem:[%s9814_s3 + $0x258] sm:$0xff]   ;;  %v7536_v21 = vld [vmem:[%s9814_s3 + $0x2c8] sm:$0xff]  }
  0x4c   : > { %v986_v63 = vrot.slane %v6261_v57, 1  ;;  %v8357_v4 = vcombine.low %v8197_v27, %v8317_v45  ;;  %v1053_v46 = vshrl.u32 %v6269_v7, 16  ;;  %v7511_v27 = vld [vmem:[%s9814_s3 + $0x2a8] sm:$0xff]   ;;  %v988_v39 = vrot.slane %v6263_v25, 1  ;;  %v7523_v52 = vld [vmem:[%s9814_s3 + $0x2d8] sm:$0xff]  }
  0x4d   : > { %6835 = vmatpush3.bf16.msra.mxu0 %v7487_v2  ;;  %5002 = vmatprep.mubr.bf16.mxu1 %v6409_v53  ;;  %v7508_v2 = vld [vmem:[%s9814_s3 + $0x228] sm:$0xff]   ;;  %v1046_v10 = vshrl.u32 %v6268_v26, 16  ;;  %v1048_v11 = vshll.u32 %v6268_v26, 16 }
  0x4e   : > { %6875 = vmatpush3.bf16.msra.mxu1 %v7489_v9  ;;  %6900 = vmatprep.subr.bf16.mxu0 %v7490_v47  ;;  %v6434_v5 = vcombine.low %v985_v59, %v986_v63  ;;  %v943_v9 = vrot.slane %v941_v16, 1  ;;  %v1055_v47 = vshll.u32 %v6269_v7, 16  ;;  %v955_v16 = vshll.u32 %v8357_v4, 16  ;;  %v7525_v63 = vld [vmem:[%s9814_s3 + $0x250] sm:$0xff]  }
  0x4f   : > { %6940 = vmatprep.subr.bf16.mxu1 %v7497_v24  ;;  %v1050_v13 = vrot.slane %v1048_v11, 1  ;;  %v6262_v24 = vcombine.low %v6110_v20, %v8226_v54  ;;  %v6119_v54 = vld [vmem:[%s8040_s27 + $0x38] sm:$0xf]  ;;  %v953_v38 = vshrl.u32 %v8357_v4, 16  ;;  %v7527_v4 = vld [vmem:[%s9814_s3 + $0x2d0] sm:$0xff]   ;;  %v7534_v20 = vld [vmem:[%s9814_s3 + $0x208] sm:$0xff]  }
  0x50   : > { %4938 = vmatmul.mubr.bf16.vlgmr.msra.gmra.mxu0 %v6406_v18  ;;  %v1057_v43 = vrot.slane %v1055_v47, 1  ;;  %v944_v22 = vor.u32 %v943_v9, %v939_v58  ;;  %v6271_v50 = vcombine.low %v6119_v54, %v8395_v41  ;;  %v957_v53 = vrot.slane %v955_v16, 1  ;;  %v7530_v47 = vld [vmem:[%s9814_s3 + $0x290] sm:$0xff]   ;;  %v8442_v16 = vld [vmem:[%s8040_s27 + $0x4c] sm:$0x1] }
  0x51   : > { %6901 = vmatpush3.bf16.msra.mxu0 %v7495_v23  ;;  %5003 = vmatmul.mubr.bf16.vlgmr.msra.gmra.mxu1 %v6408_v48  ;;  %v1051_v17 = vor.u32 %v1050_v13, %v1046_v10  ;;  %v6435_v23 = vcombine.low %v8330_v6, %v8333_v30  ;;  %v987_v36 = vrot.slane %v6262_v24, 1  ;;  %v7524_v6 = vld [vmem:[%s9814_s3 + $0x298] sm:$0xff]   ;;  %v7531_v13 = vld [vmem:[%s9814_s3 + $0x248] sm:$0xff]  }
  0x52   : > { %6902 = vmatprep.subr.bf16.mxu0 %v7499_v31  ;;  %6941 = vmatpush3.bf16.msra.mxu1 %v7498_v37  ;;  %v1058_v18 = vor.u32 %v1057_v43, %v1053_v46  ;;  %v6118_v37 = vld [vmem:[%s8040_s27 + $0x30] sm:$0xf]  ;;  %v6460_v55 = vcombine.low %v937_v15, %v944_v22  ;;  %v1067_v58 = vshrl.u32 %v6271_v50, 16  ;;  %v1069_v59 = vshll.u32 %v6271_v50, 16  ;;  %v6120_v43 = vld [vmem:[%s8040_s27 + $0x40] sm:$0xf] }
  0x53   : > { %6942 = vmatprep.subr.bf16.mxu1 %v7501_v56  ;;  %4945 = vmatprep.mubr.bf16.mxu0 %v6434_v5  ;;  %v6461_v42 = vcombine.low %v987_v36, %v988_v39  ;;  %v6112_v5 = vld [vmem:[%s8040_s27 + $0x38] sm:$0xe]  ;;  %v958_v9 = vor.u32 %v957_v53, %v953_v38  ;;  %v6462_v10 = vcombine.low %v6118_v37, %v6119_v54  ;;  %v7539_v36 = vld [vmem:[%s9814_s3 + $0x200] sm:$0xff]  }
  0x54   : > { %v6436_v31 = vcombine.low %v1051_v17, %v1058_v18  ;;  %v1071_v62 = vrot.slane %v1069_v59, 1  ;;  %v6264_v11 = vcombine.low %v6112_v5, %v8307_v35  ;;  %v7540_v54 = vld [vmem:[%s9814_s3 + $0x2c0] sm:$0xff]   ;;  %v7545_v59 = vld [vmem:[%s9814_s3 + $0x378] sm:$0xff]  }
  0x55   : > { %6903 = vmatpush3.bf16.msra.mxu0 %v7500_v40  ;;  %v8392_v40 = vld [vmem:[%s8040_s27 + $0x34] sm:$0x1]  ;;  %v595_v50 = vld [vmem:[%s8459_s12 + $0x4] sm:$0x1] }
  0x56   : > { %6904 = vmatprep.subr.bf16.mxu0 %v7505_v61  ;;  %6943 = vmatpush3.bf16.msra.mxu1 %v7504_v44  ;;  %v6270_v48 = vcombine.low %v6118_v37, %v8392_v40  ;;  %v6130_v61 = vld [vmem:[%s8040_s27 + $0x10] sm:$0xe]  ;;  %v1072_v7 = vor.u32 %v1071_v62, %v1067_v58  ;;  %v989_v35 = vrot.slane %v6264_v11, 1  ;;  %v7544_v58 = vld [vmem:[%s9814_s3 + $0x280] sm:$0xff]  }
  0x57   : > { %6944 = vmatprep.subr.bf16.mxu1 %v7510_v8  ;;  %5010 = vmatprep.mubr.bf16.mxu1 %v6436_v31  ;;  %v7526_v44 = vld [vmem:[%s9814_s3 + $0x210] sm:$0xff]   ;;  %v6113_v8 = vld [vmem:[%s8040_s27 + $0x40] sm:$0xe]  ;;  %v6274_v12 = vcombine.low %v6130_v61, %v8279_v14  ;;  %v8439_v14 = vld [vmem:[%s8040_s27 + $0x44] sm:$0x1] }
  0x58   : > { %4946 = vmatmul.mubr.bf16.gmra.mxu0 %v6433_v3  ;;  %v1060_v56 = vshrl.u32 %v6270_v48, 16  ;;  %v1062_v57 = vshll.u32 %v6270_v48, 16  ;;  %v951_v3 = vor.u32 %v950_v34, %v946_v29  ;;  %v6265_v46 = vcombine.low %v6113_v8, %v8317_v45  ;;  %v7537_v29 = vld [vmem:[%s9814_s3 + $0x288] sm:$0xff]   ;;  %v7538_v34 = vld [vmem:[%s9814_s3 + $0x240] sm:$0xff]  }
  0x59   : > { %6905 = vmatpush3.bf16.msra.mxu0 %v7508_v2  ;;  %5011 = vmatmul.mubr.bf16.gmra.mxu1 %v6435_v23  ;;  %v6131_v2 = vld [vmem:[%s8040_s27 + $0x18] sm:$0xe]  ;;  %v6272_v18 = vcombine.low %v6120_v43, %v8439_v14  ;;  %v603_v61 = vld [vmem:[%s8459_s12] sm:$0xe] }
  0x5a   : > { %6906 = vmatprep.subr.bf16.mxu0 %v7512_v49  ;;  %6945 = vmatpush3.bf16.msra.mxu1 %v7511_v27  ;;  %v1064_v30 = vrot.slane %v1062_v57, 1  ;;  %v990_v45 = vrot.slane %v6265_v46, 1  ;;  %v6121_v49 = vld [vmem:[%s8040_s27 + $0x48] sm:$0xf]  ;;  %v6487_v15 = vcombine.low %v951_v3, %v958_v9  ;;  %v7549_v9 = vld [vmem:[%s9814_s3 + $0x3f8] sm:$0xff]  }
  0x5b   : > { %6946 = vmatprep.subr.bf16.mxu1 %v7514_v19  ;;  %4953 = vmatprep.mubr.bf16.mxu0 %v6461_v42  ;;  %v6273_v19 = vcombine.low %v6121_v49, %v8442_v16  ;;  %v1074_v22 = vshrl.u32 %v6272_v18, 16  ;;  %v1076_v23 = vshll.u32 %v6272_v18, 16  ;;  %v588_v42 = vld [vmem:[%s8459_s12 + $0x8] sm:$0xf]  ;;  %v6489_v48 = vcombine.low %v6120_v43, %v6121_v49  ;;  %v7550_v46 = vld [vmem:[%s9814_s3 + $0x3b8] sm:$0xff]  }
  0x5c   : > { %v1065_v26 = vor.u32 %v1064_v30, %v1060_v56  ;;  %v6488_v17 = vcombine.low %v989_v35, %v990_v45  ;;  %v7553_v35 = vld [vmem:[%s9814_s3 + $0x3f0] sm:$0xff]   ;;  %v590_v43 = vld [vmem:[%s8459_s12 + $0x18] sm:$0xf] }
  0x5d   : > { %6907 = vmatpush3.bf16.msra.mxu0 %v7513_v60  ;;  %v6275_v60 = vcombine.low %v6131_v2, %v8282_v33  ;;  %v1111_v33 = vrot.slane %v6274_v12, 1  ;;  %v1081_v24 = vshrl.u32 %v6273_v19, 16  ;;  %v1083_v25 = vshll.u32 %v6273_v19, 16  ;;  %v7551_v12 = vld [vmem:[%s9814_s3 + $0x370] sm:$0xff]  }
  0x5e   : > { %6908 = vmatprep.subr.bf16.mxu0 %v7518_v32  ;;  %6947 = vmatpush3.bf16.msra.mxu1 %v7517_v28  ;;  %v6463_v27 = vcombine.low %v1065_v26, %v1072_v7  ;;  %v1078_v31 = vrot.slane %v1076_v23, 1  ;;  %v6290_v2 = vcombine.low %v603_v61, %v595_v50  ;;  %v7548_v26 = vld [vmem:[%s9814_s3 + $0x338] sm:$0xff]   ;;  %v589_v45 = vld [vmem:[%s8459_s12 + $0x10] sm:$0xf]  ;;  %v597_v49 = vld [vmem:[%s8459_s12 + $0x14] sm:$0x1] }
  0x5f   : > { %6948 = vmatprep.subr.bf16.mxu1 %v7523_v52  ;;  %v1112_v28 = vrot.slane %v6275_v60, 1  ;;  %v1085_v32 = vrot.slane %v1083_v25, 1  ;;  %v598_v60 = vld [vmem:[%s8459_s12 + $0x1c] sm:$0x1]  ;;  %v7557_v19 = vld [vmem:[%s9814_s3 + $0x3b0] sm:$0xff]   ;;  %v7560_v25 = vld [vmem:[%s9814_s3 + $0x368] sm:$0xff]  }
  0x60   : > { %4954 = vmatmul.mubr.bf16.gmra.mxu0 %v6460_v55  ;;  %5018 = vmatprep.mubr.bf16.mxu1 %v6463_v27  ;;  %v1079_v39 = vor.u32 %v1078_v31, %v1074_v22  ;;  %v587_v55 = vld [vmem:[%s8459_s12] sm:$0xf]  ;;  %v1239_v5 = vrot.slane %v6290_v2, 1  ;;  %v6285_v18 = vcombine.low %v590_v43, %v598_v60 }
  0x61   : > { %6909 = vmatpush3.bf16.msra.mxu0 %v7521_v51  ;;  %5019 = vmatmul.mubr.bf16.gmra.mxu1 %v6462_v10  ;;  %v1086_v37 = vor.u32 %v1085_v32, %v1081_v24  ;;  %v596_v51 = vld [vmem:[%s8459_s12 + $0xc] sm:$0x1]  ;;  %v6411_v38 = vcombine.low %v587_v55, %v588_v42  ;;  %v6410_v52 = vcombine.low %v1111_v33, %v1112_v28  ;;  %v6133_v33 = vld [vmem:[%s8040_s27 + $0x28] sm:$0xe]  ;;  %v605_v28 = vld [vmem:[%s8459_s12 + $0x10] sm:$0xe] }
  0x62   : > { %6949 = vmatpush3.bf16.msra.mxu1 %v7524_v6  ;;  %6910 = vmatprep.subr.bf16.mxu0 %v7525_v63  ;;  %v6282_v56 = vcombine.low %v587_v55, %v595_v50  ;;  %v6283_v57 = vcombine.low %v588_v42, %v596_v51  ;;  %v1183_v23 = vshll.u32 %v6285_v18, 16  ;;  %v6277_v24 = vcombine.low %v6133_v33, %v8346_v1  ;;  %v606_v32 = vld [vmem:[%s8459_s12 + $0x18] sm:$0xe]  ;;  %v7564_v1 = vld [vmem:[%s9814_s3 + $0x3e8] sm:$0xff]   ;;  %v591_v61 = vld [vmem:[%s8459_s12 + $0x20] sm:$0xf] }
  0x63   : > { %6950 = vmatprep.subr.bf16.mxu1 %v7527_v4  ;;  %4961 = vmatprep.mubr.bf16.mxu0 %v6488_v17  ;;  %v6490_v53 = vcombine.low %v1079_v39, %v1086_v37  ;;  %v6284_v17 = vcombine.low %v589_v45, %v597_v49 }
  0x64   : > { %v1160_v6 = vshrl.u32 %v6282_v56, 16  ;;  %v1162_v30 = vshll.u32 %v6282_v56, 16  ;;  %v1167_v62 = vshrl.u32 %v6283_v57, 16  ;;  %v1169_v63 = vshll.u32 %v6283_v57, 16  ;;  %v7567_v57 = vld [vmem:[%s9814_s3 + $0x320] sm:$0xff]  }
  0x65   : > { %6911 = vmatpush3.bf16.msra.mxu0 %v7526_v44  ;;  %5026 = vmatprep.mubr.bf16.mxu1 %v6490_v53  ;;  %v604_v44 = vld [vmem:[%s8459_s12 + $0x8] sm:$0xe]  ;;  %v1176_v22 = vshll.u32 %v6284_v17, 16  ;;  %v1114_v39 = vrot.slane %v6277_v24, 1  ;;  %v1185_v42 = vrot.slane %v1183_v23, 1  ;;  %v7566_v53 = vld [vmem:[%s9814_s3 + $0x360] sm:$0xff]  }
  0x66   : > { %6951 = vmatpush3.bf16.msra.mxu1 %v7530_v47  ;;  %6912 = vmatprep.subr.bf16.mxu0 %v7531_v13  ;;  %v6291_v3 = vcombine.low %v604_v44, %v596_v51  ;;  %v1164_v7 = vrot.slane %v1162_v30, 1  ;;  %v1171_v4 = vrot.slane %v1169_v63, 1  ;;  %v7552_v13 = vld [vmem:[%s9814_s3 + $0x330] sm:$0xff]   ;;  %v599_v30 = vld [vmem:[%s8459_s12 + $0x24] sm:$0x1] }
  0x67   : > { %6952 = vmatprep.subr.bf16.mxu1 %v7536_v21  ;;  %v1178_v37 = vrot.slane %v1176_v22, 1  ;;  %v6286_v63 = vcombine.low %v591_v61, %v599_v30  ;;  %v7582_v23 = vld [vmem:[%s9814_s3 + $0x310] sm:$0xff]  }
  0x68   : > { %4962 = vmatmul.mubr.bf16.gmra.mxu0 %v6487_v15  ;;  %v1240_v8 = vrot.slane %v6291_v3, 1  ;;  %v1165_v10 = vor.u32 %v1164_v7, %v1160_v6  ;;  %v1172_v11 = vor.u32 %v1171_v4, %v1167_v62  ;;  %v6438_v15 = vcombine.low %v589_v45, %v590_v43  ;;  %v592_v6 = vld [vmem:[%s8459_s12 + $0x28] sm:$0xf]  ;;  %v600_v62 = vld [vmem:[%s8459_s12 + $0x2c] sm:$0x1]  ;;  %v7572_v3 = vld [vmem:[%s9814_s3 + $0x3a0] sm:$0xff]  }
  0x69   : > { %6913 = vmatpush3.bf16.msra.mxu0 %v7534_v20  ;;  %5067 = vmatprep.mubr.bf16.mxu0 %v6411_v38  ;;  %v6132_v20 = vld [vmem:[%s8040_s27 + $0x20] sm:$0xe]  ;;  %v7565_v38 = vld [vmem:[%s9814_s3 + $0x3a8] sm:$0xff]   ;;  %v6465_v44 = vcombine.low %v591_v61, %v592_v6  ;;  %v6287_v2 = vcombine.low %v592_v6, %v600_v62  ;;  %v6135_v7 = vld [vmem:[%s8040_s27 + $0x38] sm:$0xe]  ;;  %v1190_v4 = vshll.u32 %v6286_v63, 16 }
  0x6a   : > { %6953 = vmatpush3.bf16.msra.mxu1 %v7537_v29  ;;  %6914 = vmatprep.subr.bf16.mxu0 %v7538_v34  ;;  %v6413_v47 = vcombine.low %v1239_v5, %v1240_v8  ;;  %v6412_v27 = vcombine.low %v1165_v10, %v1172_v11  ;;  %v6276_v21 = vcombine.low %v6132_v20, %v8343_v0  ;;  %v7563_v29 = vld [vmem:[%s9814_s3 + $0x328] sm:$0xff]   ;;  %v607_v11 = vld [vmem:[%s8459_s12 + $0x20] sm:$0xe]  ;;  %v7583_v24 = vld [vmem:[%s9814_s3 + $0x3d0] sm:$0xff]  }
  0x6b   : > { %6954 = vmatprep.subr.bf16.mxu1 %v7540_v54  ;;  %5027 = vmatmul.mubr.bf16.gmra.mxu1 %v6489_v48  ;;  %v6292_v34 = vcombine.low %v605_v28, %v597_v49  ;;  %v6293_v0 = vcombine.low %v606_v32, %v598_v60  ;;  %v1181_v54 = vshrl.u32 %v6285_v18, 16  ;;  %v6279_v8 = vcombine.low %v6135_v7, %v8395_v41  ;;  %v7580_v18 = vld [vmem:[%s9814_s3 + $0x398] sm:$0xff]  }
  0x6c   : > { %5132 = vmatprep.mubr.bf16.mxu1 %v6413_v47  ;;  %v1113_v31 = vrot.slane %v6276_v21, 1  ;;  %v1197_v10 = vshll.u32 %v6287_v2, 16  ;;  %v7578_v47 = vld [vmem:[%s9814_s3 + $0x318] sm:$0xff]   ;;  %v1192_v41 = vrot.slane %v1190_v4, 1  ;;  %v1195_v45 = vshrl.u32 %v6287_v2, 16  ;;  %v7581_v21 = vld [vmem:[%s9814_s3 + $0x350] sm:$0xff]  }
  0x6d   : > { %6915 = vmatpush3.bf16.msra.mxu0 %v7539_v36  ;;  %v1174_v36 = vshrl.u32 %v6284_v17, 16  ;;  %v1241_v55 = vrot.slane %v6292_v34, 1  ;;  %v1242_v50 = vrot.slane %v6293_v0, 1  ;;  %v7579_v17 = vld [vmem:[%s9814_s3 + $0x3d8] sm:$0xff]   ;;  %v6136_v0 = vld [vmem:[%s8040_s27 + $0x40] sm:$0xe] }
  0x6e   : > { %6955 = vmatpush3.bf16.msra.mxu1 %v7544_v58  ;;  %6980 = vmatprep.subr.bf16.mxu0 %v7545_v59  ;;  %v6437_v48 = vcombine.low %v1113_v31, %v1114_v39  ;;  %v7568_v59 = vld [vmem:[%s9814_s3 + $0x3e0] sm:$0xff]   ;;  %v1199_v43 = vrot.slane %v1197_v10, 1  ;;  %v594_v28 = vld [vmem:[%s8459_s12 + $0x38] sm:$0xf]  ;;  %v602_v31 = vld [vmem:[%s8459_s12 + $0x3c] sm:$0x1] }
  0x6f   : > { %7020 = vmatprep.subr.bf16.mxu1 %v7549_v9  ;;  %v1179_v51 = vor.u32 %v1178_v37, %v1174_v36  ;;  %v6440_v56 = vcombine.low %v1241_v55, %v1242_v50  ;;  %v7575_v9 = vld [vmem:[%s9814_s3 + $0x358] sm:$0xff]   ;;  %v6289_v34 = vcombine.low %v594_v28, %v602_v31  ;;  %v7587_v39 = vld [vmem:[%s9814_s3 + $0x390] sm:$0xff]   ;;  %v6137_v37 = vld [vmem:[%s8040_s27 + $0x48] sm:$0xe]  ;;  %v6280_v55 = vcombine.low %v6136_v0, %v8439_v14 }
  0x70   : > { %5068 = vmatmul.mubr.bf16.vlgmr.msra.gmra.mxu0 %v6410_v52  ;;  %v1186_v52 = vor.u32 %v1185_v42, %v1181_v54  ;;  %v1200_v20 = vor.u32 %v1199_v43, %v1195_v45  ;;  %v6281_v42 = vcombine.low %v6137_v37, %v8442_v16  ;;  %v7593_v50 = vld [vmem:[%s9814_s3 + $0x308] sm:$0xff]   ;;  %v7597_v4 = vld [vmem:[%s9814_s3 + $0x300] sm:$0xff]  }
  0x71   : > { %6981 = vmatpush3.bf16.msra.mxu0 %v7548_v26  ;;  %5075 = vmatprep.mubr.bf16.mxu0 %v6438_v15  ;;  %v6134_v26 = vld [vmem:[%s8040_s27 + $0x30] sm:$0xe]  ;;  %v6146_v10 = vld [vmem:[%s8459_s12 + $0xc] sm:$0x1]  ;;  %s8844_s27 = sadd.s32 %s7351_s23, %s8001_s20 }
  0x72   : > { %6982 = vmatprep.subr.bf16.mxu0 %v7551_v12  ;;  %v6439_v58 = vcombine.low %v1179_v51, %v1186_v52  ;;  %v6278_v5 = vcombine.low %v6134_v26, %v8392_v40  ;;  %v1188_v40 = vshrl.u32 %v6286_v63, 16  ;;  %v609_v51 = vld [vmem:[%s8459_s12 + $0x30] sm:$0xe]  ;;  %v1117_v52 = vrot.slane %v6280_v55, 1  ;;  %v7595_v63 = vld [vmem:[%s9814_s3 + $0x388] sm:$0xff]   ;;  %v7596_v26 = vld [vmem:[%s9814_s3 + $0x340] sm:$0xff]  }
  0x73   : > { %5133 = vmatmul.mubr.bf16.vlgmr.msra.gmra.mxu1 %v6412_v27  ;;  %v1116_v27 = vrot.slane %v6279_v8, 1  ;;  %v8603_v8 = vld [vmem:[%s8459_s12 + $0x8] sm:$0xf]  ;;  %v7612_v55 = vld [vmem:[%s9814_s3 + $0x4f8] sm:$0xff]   ;;  %s6083_s25 = sshll.u32 %s8844_s27, 2  ;;  %s6085_s27 = sshll.u32 %s9933_s14, 6 }
  0x74   : > { %7021 = vmatpush3.bf16.msra.mxu1 %v7550_v46  ;;  %5140 = vmatprep.mubr.bf16.mxu1 %v6440_v56  ;;  %v608_v46 = vld [vmem:[%s8459_s12 + $0x28] sm:$0xe]  ;;  %v1115_v12 = vrot.slane %v6278_v5, 1  ;;  %v7598_v5 = vld [vmem:[%s9814_s3 + $0x3c0] sm:$0xff]   ;;  %s8894_s22 = scalar_lea.vmem %s9813_s2, %s6083_s25  ;;  %s500_s21 = sadd.s32 %s6085_s27, %s6084_s29 }
  0x75   : > { %6983 = vmatpush3.bf16.msra.mxu0 %v7552_v13  ;;  %7022 = vmatprep.subr.bf16.mxu1 %v7553_v35  ;;  %v6294_v13 = vcombine.low %v607_v11, %v599_v30  ;;  %v6295_v35 = vcombine.low %v608_v46, %v600_v62  ;;  %v7594_v62 = vld [vmem:[%s9814_s3 + $0x3c8] sm:$0xff]   ;;  %v6147_v11 = vld [vmem:[%s8459_s12 + $0x14] sm:$0x1]  ;;  %s6086_s20 = sshll.u32 %s500_s21, 3 }
  0x76   : > { %6984 = vmatprep.subr.bf16.mxu0 %v7560_v25  ;;  %v6464_v49 = vcombine.low %v1115_v12, %v1116_v27  ;;  %v593_v25 = vld [vmem:[%s8459_s12 + $0x30] sm:$0xf]  ;;  %v6154_v46 = vld [vmem:[%s8459_s12 + $0x8] sm:$0xe]  ;;  %v6298_v12 = vcombine.low %v8603_v8, %v6146_v10  ;;  %s9770_s25 = scalar_lea.vmem %s9820_s9, %s6086_s20  ;;  %s9780_s30 = scalar_lea.vmem %s9821_s10, %s6086_s20 }
  0x77   : > { %v1243_v60 = vrot.slane %v6294_v13, 1  ;;  %v1244_v15 = vrot.slane %v6295_v35, 1  ;;  %v6492_v36 = vcombine.low %v593_v25, %v594_v28  ;;  %v6306_v13 = vcombine.low %v6154_v46, %v6146_v10  ;;  %v6165_v46 = vld [vmem:[%s8459_s12 + $0x28] sm:$0xf] }
  0x78   : > { %7023 = vmatpush3.bf16.msra.mxu1 %v7557_v19  ;;  %5076 = vmatmul.mubr.bf16.gmra.mxu0 %v6437_v48  ;;  %v1193_v19 = vor.u32 %v1192_v41, %v1188_v40  ;;  %v7590_v48 = vld [vmem:[%s9814_s3 + $0x348] sm:$0xff]   ;;  %v7603_v40 = vld [vmem:[%s9814_s3 + $0x380] sm:$0xff]   ;;  %v1288_v41 = vshrl.u32 %v6298_v12, 16  ;;  %v1290_v45 = vshll.u32 %v6298_v12, 16 }
  0x79   : > { %6985 = vmatpush3.bf16.msra.mxu0 %v7563_v29  ;;  %7024 = vmatprep.subr.bf16.mxu1 %v7564_v1  ;;  %v6467_v33 = vcombine.low %v1243_v60, %v1244_v15  ;;  %v601_v29 = vld [vmem:[%s8459_s12 + $0x34] sm:$0x1]  ;;  %v1211_v1 = vshll.u32 %v6289_v34, 16  ;;  %v7605_v60 = vld [vmem:[%s9814_s3 + $0x478] sm:$0xff]   ;;  %v1367_v15 = vrot.slane %v6306_v13, 1 }
  0x7a   : > { %6986 = vmatprep.subr.bf16.mxu0 %v7566_v53  ;;  %5083 = vmatprep.mubr.bf16.mxu0 %v6465_v44  ;;  %v6466_v22 = vcombine.low %v1193_v19, %v1200_v20  ;;  %v6288_v32 = vcombine.low %v593_v25, %v601_v29  ;;  %v1118_v53 = vrot.slane %v6281_v42, 1  ;;  %v6296_v56 = vcombine.low %v609_v51, %v601_v29  ;;  %v6163_v19 = vld [vmem:[%s8459_s12 + $0x18] sm:$0xf]  ;;  %v6173_v12 = vld [vmem:[%s8459_s12 + $0x2c] sm:$0x1] }
  0x7b   : > { %5141 = vmatmul.mubr.bf16.gmra.mxu1 %v6439_v58  ;;  %v1213_v16 = vrot.slane %v1211_v1, 1  ;;  %v1292_v20 = vrot.slane %v1290_v45, 1  ;;  %v6179_v25 = vld [vmem:[%s8459_s12 + $0x18] sm:$0xe] }
  0x7c   : > { %7025 = vmatpush3.bf16.msra.mxu1 %v7565_v38  ;;  %5148 = vmatprep.mubr.bf16.mxu1 %v6467_v33  ;;  %v1204_v54 = vshll.u32 %v6288_v32, 16  ;;  %v610_v38 = vld [vmem:[%s8459_s12 + $0x38] sm:$0xe]  ;;  %v1202_v58 = vshrl.u32 %v6288_v32, 16  ;;  %v6491_v61 = vcombine.low %v1117_v52, %v1118_v53  ;;  %v1245_v6 = vrot.slane %v6296_v56, 1 }
  0x7d   : > { %6987 = vmatpush3.bf16.msra.mxu0 %v7567_v57  ;;  %7026 = vmatprep.subr.bf16.mxu1 %v7568_v59  ;;  %v6297_v57 = vcombine.low %v610_v38, %v602_v31  ;;  %v1209_v59 = vshrl.u32 %v6289_v34, 16  ;;  %v1293_v32 = vor.u32 %v1292_v20, %v1288_v41  ;;  %v7613_v42 = vld [vmem:[%s9814_s3 + $0x4b8] sm:$0xff]   ;;  %v6181_v41 = vld [vmem:[%s8459_s12 + $0x28] sm:$0xe] }
  0x7e   : > { %6988 = vmatprep.subr.bf16.mxu0 %v7575_v9  ;;  %v1206_v14 = vrot.slane %v1204_v54, 1  ;;  %v8606_v9 = vld [vmem:[%s8459_s12 + $0x10] sm:$0xf]  ;;  %v7611_v52 = vld [vmem:[%s9814_s3 + $0x438] sm:$0xff]  }
  0x7f   : > { %v1246_v30 = vrot.slane %v6297_v57, 1  ;;  %v1214_v2 = vor.u32 %v1213_v16, %v1209_v59  ;;  %v6299_v27 = vcombine.low %v8606_v9, %v6147_v11  ;;  %v6414_v0 = vcombine.low %v8603_v8, %v8606_v9  ;;  %v7615_v59 = vld [vmem:[%s9814_s3 + $0x430] sm:$0xff]  }
  0x80   : > { %7027 = vmatpush3.bf16.msra.mxu1 %v7572_v3  ;;  %5084 = vmatmul.mubr.bf16.gmra.mxu0 %v6464_v49  ;;  %v1207_v44 = vor.u32 %v1206_v14, %v1202_v58  ;;  %v7614_v58 = vld [vmem:[%s9814_s3 + $0x470] sm:$0xff]  }
  0x81   : > { %6989 = vmatpush3.bf16.msra.mxu0 %v7578_v47  ;;  %7028 = vmatprep.subr.bf16.mxu1 %v7579_v17  ;;  %v6494_v3 = vcombine.low %v1245_v6, %v1246_v30  ;;  %v6155_v47 = vld [vmem:[%s8459_s12 + $0x10] sm:$0xe]  ;;  %v1295_v43 = vshrl.u32 %v6299_v27, 16  ;;  %v1297_v49 = vshll.u32 %v6299_v27, 16  ;;  %v6140_v30 = vld [vmem:[%s8459_s12 + $0x18] sm:$0xf] }
  0x82   : > { %6990 = vmatprep.subr.bf16.mxu0 %v7581_v21  ;;  %5091 = vmatprep.mubr.bf16.mxu0 %v6492_v36  ;;  %v6493_v7 = vcombine.low %v1207_v44, %v1214_v2  ;;  %v6307_v35 = vcombine.low %v6155_v47, %v6147_v11  ;;  %v6170_v21 = vld [vmem:[%s8459_s12 + $0x14] sm:$0x1]  ;;  %v6149_v44 = vld [vmem:[%s8459_s12 + $0x24] sm:$0x1]  ;;  %v6180_v27 = vld [vmem:[%s8459_s12 + $0x20] sm:$0xe] }
  0x83   : > { %5149 = vmatmul.mubr.bf16.gmra.mxu1 %v6466_v22  ;;  %v1299_v33 = vrot.slane %v1297_v49, 1  ;;  %v6171_v22 = vld [vmem:[%s8459_s12 + $0x1c] sm:$0x1]  ;;  %v7616_v16 = vld [vmem:[%s9814_s3 + $0x4f0] sm:$0xff]   ;;  %v6172_v47 = vld [vmem:[%s8459_s12 + $0x24] sm:$0x1] }
  0x84   : > { %7029 = vmatpush3.bf16.msra.mxu1 %v7580_v18  ;;  %5156 = vmatprep.mubr.bf16.mxu1 %v6494_v3  ;;  %v1368_v17 = vrot.slane %v6307_v35, 1  ;;  %v6162_v18 = vld [vmem:[%s8459_s12 + $0x10] sm:$0xf]  ;;  %v8629_v29 = vcombine.low %v6163_v19, %v6171_v22  ;;  %v8691_v49 = vcombine.low %v6180_v27, %v6172_v47 }
  0x85   : > { %6991 = vmatpush3.bf16.msra.mxu0 %v7582_v23  ;;  %7030 = vmatprep.subr.bf16.mxu1 %v7583_v24  ;;  %v6417_v23 = vcombine.low %v6162_v18, %v6163_v19  ;;  %v6178_v24 = vld [vmem:[%s8459_s12 + $0x10] sm:$0xe]  ;;  %v8627_v28 = vcombine.low %v6162_v18, %v6170_v21  ;;  %v1300_v34 = vor.u32 %v1299_v33, %v1295_v43 }
  0x86   : > { %6992 = vmatprep.subr.bf16.mxu0 %v7590_v48  ;;  %v6416_v31 = vcombine.low %v1367_v15, %v1368_v17  ;;  %v6322_v36 = vcombine.low %v6178_v24, %v6170_v21  ;;  %v2127_v1 = vshll.u32 %v8629_v29, 16  ;;  %v2125_v38 = vshrl.u32 %v8629_v29, 16  ;;  %v7619_v6 = vld [vmem:[%s9814_s3 + $0x4b0] sm:$0xff]   ;;  %v7627_v15 = vld [vmem:[%s9814_s3 + $0x428] sm:$0xff]   ;;  %v6156_v17 = vld [vmem:[%s8459_s12 + $0x18] sm:$0xe] }
  0x87   : > { %v2048_v37 = vshrl.u32 %v8627_v28, 16  ;;  %v2050_v54 = vshll.u32 %v8627_v28, 16  ;;  %v6415_v48 = vcombine.low %v1293_v32, %v1300_v34  ;;  %v8689_v43 = vcombine.low %v6165_v46, %v6173_v12  ;;  %v6157_v21 = vld [vmem:[%s8459_s12 + $0x20] sm:$0xe]  ;;  %v7672_v29 = vld [vmem:[%s9814_s3 + $0x578] sm:$0xff]  }
  0x88   : > { %7031 = vmatpush3.bf16.msra.mxu1 %v7587_v39  ;;  %5092 = vmatmul.mubr.bf16.gmra.mxu0 %v6491_v61  ;;  %v8631_v39 = vcombine.low %v6179_v25, %v6171_v22  ;;  %v1442_v51 = vshll.u32 %v6322_v36, 16  ;;  %v8661_v14 = vrot.slane %v2127_v1, 1  ;;  %v1456_v24 = vshll.u32 %v8691_v49, 16 }
  0x89   : > { %6993 = vmatpush3.bf16.msra.mxu0 %v7593_v50  ;;  %7032 = vmatprep.subr.bf16.mxu1 %v7594_v62  ;;  %v1440_v50 = vshrl.u32 %v6322_v36, 16  ;;  %v8656_v57 = vrot.slane %v2050_v54, 1  ;;  %v6141_v62 = vld [vmem:[%s8459_s12 + $0x20] sm:$0xf]  ;;  %v7630_v54 = vld [vmem:[%s9814_s3 + $0x4e8] sm:$0xff]  }
  0x8a   : > { %6994 = vmatprep.subr.bf16.mxu0 %v7596_v26  ;;  %v1447_v53 = vshrl.u32 %v8631_v39, 16  ;;  %v1449_v56 = vshll.u32 %v8631_v39, 16  ;;  %5197 = vmatprep.mubr.bf16.mxu0 %v6415_v48  ;;  %v1444_v61 = vrot.slane %v1442_v51, 1  ;;  %v6301_v3 = vcombine.low %v6141_v62, %v6149_v44 }
  0x8b   : > { %5157 = vmatmul.mubr.bf16.gmra.mxu1 %v6493_v7  ;;  %v7621_v7 = vld [vmem:[%s9814_s3 + $0x468] sm:$0xff]   ;;  %v6441_v33 = vcombine.low %v6140_v30, %v6141_v62 }
  0x8c   : > { %7033 = vmatpush3.bf16.msra.mxu1 %v7595_v63  ;;  %5262 = vmatprep.mubr.bf16.mxu1 %v6417_v23  ;;  %v6148_v63 = vld [vmem:[%s8459_s12 + $0x1c] sm:$0x1]  ;;  %v1451_v26 = vrot.slane %v1449_v56, 1  ;;  %v1309_v10 = vshrl.u32 %v6301_v3, 16  ;;  %v1311_v11 = vshll.u32 %v6301_v3, 16  ;;  %v1454_v23 = vshrl.u32 %v8691_v49, 16 }
  0x8d   : > { %6995 = vmatpush3.bf16.msra.mxu0 %v7597_v4  ;;  %7034 = vmatprep.subr.bf16.mxu1 %v7598_v5  ;;  %v6300_v2 = vcombine.low %v6140_v30, %v6148_v63  ;;  %v6164_v4 = vld [vmem:[%s8459_s12 + $0x20] sm:$0xf]  ;;  %v8680_v5 = vor.u32 %v1444_v61, %v1440_v50  ;;  %v6308_v36 = vcombine.low %v6156_v17, %v6148_v63  ;;  %v6143_v30 = vld [vmem:[%s8459_s12 + $0x30] sm:$0xf]  ;;  %v6150_v62 = vld [vmem:[%s8459_s12 + $0x2c] sm:$0x1] }
  0x8e   : > { %7060 = vmatprep.subr.bf16.mxu0 %v7605_v60  ;;  %v6444_v13 = vcombine.low %v6164_v4, %v6165_v46  ;;  %v8687_v45 = vcombine.low %v6164_v4, %v6172_v47  ;;  %v8693_v60 = vcombine.low %v6181_v41, %v6173_v12  ;;  %v7633_v56 = vld [vmem:[%s9814_s3 + $0x420] sm:$0xff]   ;;  %v6151_v63 = vld [vmem:[%s8459_s12 + $0x34] sm:$0x1]  ;;  %v7639_v3 = vld [vmem:[%s9814_s3 + $0x458] sm:$0xff]  }
  0x8f   : > { %v1302_v8 = vshrl.u32 %v6300_v2, 16  ;;  %v1304_v9 = vshll.u32 %v6300_v2, 16  ;;  %v2057_v18 = vshll.u32 %v8680_v5, 16  ;;  %v2055_v22 = vshrl.u32 %v8680_v5, 16  ;;  %v7634_v61 = vld [vmem:[%s9814_s3 + $0x4e0] sm:$0xff]  }
  0x90   : > { %7035 = vmatpush3.bf16.msra.mxu1 %v7603_v40  ;;  %5198 = vmatmul.mubr.bf16.vlgmr.msra.gmra.mxu0 %v6414_v0  ;;  %v1313_v40 = vrot.slane %v1311_v11, 1  ;;  %v2204_v25 = vshll.u32 %v8687_v45, 16  ;;  %v1463_v34 = vshll.u32 %v8693_v60, 16  ;;  %v6309_v0 = vcombine.low %v6157_v21, %v6149_v44  ;;  %v7637_v44 = vld [vmem:[%s9814_s3 + $0x4a0] sm:$0xff]   ;;  %v6167_v11 = vld [vmem:[%s8459_s12 + $0x38] sm:$0xf] }
  0x91   : > { %7100 = vmatprep.subr.bf16.mxu1 %v7612_v55  ;;  %7061 = vmatpush3.bf16.msra.mxu0 %v7611_v52  ;;  %v1306_v35 = vrot.slane %v1304_v9, 1  ;;  %v1461_v1 = vshrl.u32 %v8693_v60, 16  ;;  %v7631_v55 = vld [vmem:[%s9814_s3 + $0x4a8] sm:$0xff]   ;;  %v8723_v48 = vrot.slane %v2057_v18, 1  ;;  %v1369_v50 = vrot.slane %v6308_v36, 1 }
  0x92   : > { %7062 = vmatprep.subr.bf16.mxu0 %v7614_v58  ;;  %v1314_v20 = vor.u32 %v1313_v40, %v1309_v10  ;;  %v1370_v51 = vrot.slane %v6309_v0, 1  ;;  %v1458_v52 = vrot.slane %v1456_v24, 1  ;;  %v8730_v58 = vor.u32 %v1451_v26, %v1447_v53  ;;  %v6166_v10 = vld [vmem:[%s8459_s12 + $0x30] sm:$0xf]  ;;  %v6174_v46 = vld [vmem:[%s8459_s12 + $0x34] sm:$0x1] }
  0x93   : > { %5263 = vmatmul.mubr.bf16.vlgmr.msra.gmra.mxu1 %v6416_v31  ;;  %v1307_v19 = vor.u32 %v1306_v35, %v1302_v8  ;;  %v2281_v31 = vshll.u32 %v8689_v43, 16  ;;  %v6303_v53 = vcombine.low %v6143_v30, %v6151_v63  ;;  %v6175_v47 = vld [vmem:[%s8459_s12 + $0x3c] sm:$0x1]  ;;  %v6182_v35 = vld [vmem:[%s8459_s12 + $0x30] sm:$0xe]  ;;  %v8757_v41 = vcombine.low %v6166_v10, %v6174_v46 }
  0x94   : > { %7101 = vmatpush3.bf16.msra.mxu1 %v7613_v42  ;;  %5270 = vmatprep.mubr.bf16.mxu1 %v6444_v13  ;;  %v7632_v42 = vld [vmem:[%s9814_s3 + $0x460] sm:$0xff]   ;;  %v2132_v2 = vshrl.u32 %v8730_v58, 16  ;;  %v2134_v26 = vshll.u32 %v8730_v58, 16  ;;  %v8753_v12 = vor.u32 %v1458_v52, %v1454_v23  ;;  %v6183_v40 = vld [vmem:[%s8459_s12 + $0x38] sm:$0xe]  ;;  %v8759_v49 = vcombine.low %v6167_v11, %v6175_v47 }
  0x95   : > { %7102 = vmatprep.subr.bf16.mxu1 %v7616_v16  ;;  %7063 = vmatpush3.bf16.msra.mxu0 %v7615_v59  ;;  %v6442_v32 = vcombine.low %v1307_v19, %v1314_v20  ;;  %v8732_v59 = vrot.slane %v1463_v34, 1  ;;  %v6443_v16 = vcombine.low %v1369_v50, %v1370_v51  ;;  %v1323_v8 = vshrl.u32 %v6303_v53, 16  ;;  %v7645_v20 = vld [vmem:[%s9814_s3 + $0x418] sm:$0xff]   ;;  %v6158_v23 = vld [vmem:[%s8459_s12 + $0x28] sm:$0xe] }
  0x96   : > { %7064 = vmatprep.subr.bf16.mxu0 %v7621_v7  ;;  %v1325_v9 = vshll.u32 %v6303_v53, 16  ;;  %v8761_v17 = vcombine.low %v6182_v35, %v6174_v46  ;;  %v8763_v18 = vcombine.low %v6183_v40, %v6175_v47  ;;  %v6471_v19 = vcombine.low %v6166_v10, %v6167_v11  ;;  %v6159_v24 = vld [vmem:[%s8459_s12 + $0x30] sm:$0xe]  ;;  %v7657_v35 = vld [vmem:[%s9814_s3 + $0x448] sm:$0xff]   ;;  %v6168_v40 = vld [vmem:[%s8459_s12 + $0x40] sm:$0xf] }
  0x97   : > { %5205 = vmatprep.mubr.bf16.mxu0 %v6442_v32  ;;  %v8771_v32 = vrot.slane %v2134_v26, 1  ;;  %v2209_v34 = vshrl.u32 %v8753_v12, 16  ;;  %v6310_v51 = vcombine.low %v6158_v23, %v6150_v62  ;;  %v6311_v52 = vcombine.low %v6159_v24, %v6151_v63  ;;  %v7651_v53 = vld [vmem:[%s9814_s3 + $0x410] sm:$0xff]   ;;  %v6161_v58 = vld [vmem:[%s8459_s12 + $0x40] sm:$0xe] }
  0x98   : > { %7103 = vmatpush3.bf16.msra.mxu1 %v7619_v6  ;;  %5206 = vmatmul.mubr.bf16.gmra.mxu0 %v6441_v33  ;;  %v6142_v6 = vld [vmem:[%s8459_s12 + $0x28] sm:$0xf]  ;;  %v1327_v13 = vrot.slane %v1325_v9, 1  ;;  %v1468_v36 = vshrl.u32 %v8761_v17, 16  ;;  %v1470_v0 = vshll.u32 %v8761_v17, 16  ;;  %v1477_v50 = vshll.u32 %v8763_v18, 16 }
  0x99   : > { %7065 = vmatpush3.bf16.msra.mxu0 %v7627_v15  ;;  %7104 = vmatprep.subr.bf16.mxu1 %v7630_v54  ;;  %v6302_v39 = vcombine.low %v6142_v6, %v6150_v62  ;;  %v6468_v15 = vcombine.low %v6142_v6, %v6143_v30  ;;  %v2358_v54 = vshll.u32 %v8757_v41, 16  ;;  %v7650_v6 = vld [vmem:[%s9814_s3 + $0x450] sm:$0xff]   ;;  %v2211_v30 = vshll.u32 %v8753_v12, 16  ;;  %v6153_v9 = vld [vmem:[%s8459_s12 + $0x44] sm:$0x1]  ;;  %v7680_v12 = vld [vmem:[%s9814_s3 + $0x5f8] sm:$0xff]  }
  0x9a   : > { %7066 = vmatprep.subr.bf16.mxu0 %v7632_v42  ;;  %v1328_v21 = vor.u32 %v1327_v13, %v1323_v8  ;;  %v1371_v62 = vrot.slane %v6310_v51, 1  ;;  %v1372_v63 = vrot.slane %v6311_v52, 1  ;;  %v7652_v26 = vld [vmem:[%s9814_s3 + $0x4d0] sm:$0xff]   ;;  %v6152_v8 = vld [vmem:[%s8459_s12 + $0x3c] sm:$0x1]  ;;  %v8829_v23 = vor.u32 %v8732_v59, %v1461_v1  ;;  %v7666_v52 = vld [vmem:[%s9814_s3 + $0x4c8] sm:$0xff]  }
  0x9b   : > { %5271 = vmatmul.mubr.bf16.gmra.mxu1 %v6443_v16  ;;  %v1316_v7 = vshrl.u32 %v6302_v39, 16  ;;  %v1318_v4 = vshll.u32 %v6302_v39, 16  ;;  %v1475_v16 = vshrl.u32 %v8763_v18, 16  ;;  %v8790_v39 = vrot.slane %v1470_v0, 1  ;;  %v7655_v46 = vld [vmem:[%s9814_s3 + $0x490] sm:$0xff]  }
  0x9c   : > { %7105 = vmatpush3.bf16.msra.mxu1 %v7631_v55  ;;  %v2435_v55 = vshll.u32 %v8759_v49, 16  ;;  %5278 = vmatprep.mubr.bf16.mxu1 %v6471_v19  ;;  %v8813_v47 = vrot.slane %v2211_v30, 1  ;;  %v8832_v0 = vld [vmem:[%s8459_s12 + $0x4c] sm:$0x1]  ;;  %v6185_v1 = vld [vmem:[%s8459_s12 + $0x48] sm:$0xe] }
  0x9d   : > { %7067 = vmatpush3.bf16.msra.mxu0 %v7633_v56  ;;  %7106 = vmatprep.subr.bf16.mxu1 %v7634_v61  ;;  %v1320_v27 = vrot.slane %v1318_v4, 1  ;;  %v7648_v56 = vld [vmem:[%s9814_s3 + $0x4d8] sm:$0xff]   ;;  %v8804_v4 = vld [vmem:[%s8459_s12 + $0x40] sm:$0xf]  ;;  %v2286_v5 = vshrl.u32 %v8829_v23, 16 }
  0x9e   : > { %7068 = vmatprep.subr.bf16.mxu0 %v7639_v3  ;;  %v7649_v61 = vld [vmem:[%s9814_s3 + $0x498] sm:$0xff]   ;;  %v6470_v3 = vcombine.low %v1371_v62, %v1372_v63  ;;  %v6305_v11 = vcombine.low %v8804_v4, %v6153_v9  ;;  %v8859_v62 = vcombine.low %v6185_v1, %v8832_v0 }
  0x9f   : > { %v1321_v33 = vor.u32 %v1320_v27, %v1316_v7  ;;  %v8801_v7 = vld [vmem:[%s8459_s12 + $0x38] sm:$0xf] }
  0xa0   : > { %7107 = vmatpush3.bf16.msra.mxu1 %v7637_v44  ;;  %v8795_v44 = vrot.slane %v1477_v50, 1  ;;  %v6304_v10 = vcombine.low %v8801_v7, %v6152_v8  ;;  %v1337_v19 = vshrl.u32 %v6305_v11, 16  ;;  %v6160_v63 = vld [vmem:[%s8459_s12 + $0x38] sm:$0xe] }
  0xa1   : > { %7069 = vmatpush3.bf16.msra.mxu0 %v7645_v20  ;;  %v6469_v42 = vcombine.low %v1321_v33, %v1328_v21  ;;  %7108 = vmatprep.subr.bf16.mxu1 %v7648_v56  ;;  %v1339_v20 = vshll.u32 %v6305_v11, 16  ;;  %v8823_v33 = vld [vmem:[%s8459_s12 + $0x48] sm:$0xf]  ;;  %v6176_v21 = vld [vmem:[%s8459_s12 + $0x44] sm:$0x1]  ;;  %v6312_v11 = vcombine.low %v6160_v63, %v6152_v8  ;;  %v2053_v8 = vor.u32 %v8656_v57, %v2048_v37 }
  0xa2   : > { %7070 = vmatprep.subr.bf16.mxu0 %v7650_v6  ;;  %v1330_v27 = vshrl.u32 %v6304_v10, 16  ;;  %v1332_v13 = vshll.u32 %v6304_v10, 16  ;;  %v8835_v50 = vcombine.low %v6168_v40, %v6176_v21  ;;  %v6498_v51 = vcombine.low %v6168_v40, %v8823_v33  ;;  %v7667_v56 = vld [vmem:[%s9814_s3 + $0x488] sm:$0xff]   ;;  %v661_v37 = vld [vmem:[%s8894_s22] sm:$0xf] }
  0xa3   : > { %5213 = vmatprep.mubr.bf16.mxu0 %v6469_v42  ;;  %5279 = vmatmul.mubr.bf16.gmra.mxu1 %v6470_v3  ;;  %v6184_v42 = vld [vmem:[%s8459_s12 + $0x40] sm:$0xe]  ;;  %v1341_v60 = vrot.slane %v1339_v20, 1  ;;  %v2137_v6 = vor.u32 %v8771_v32, %v2132_v2  ;;  %v2288_v32 = vshll.u32 %v8829_v23, 16  ;;  %v1373_v40 = vrot.slane %v6312_v11, 1 }
  0xa4   : > { %5214 = vmatmul.mubr.bf16.gmra.mxu0 %v6468_v15  ;;  %7109 = vmatpush3.bf16.msra.mxu1 %v7649_v61  ;;  %v7663_v15 = vld [vmem:[%s9814_s3 + $0x408] sm:$0xff]   ;;  %v1334_v24 = vrot.slane %v1332_v13, 1  ;;  %v8847_v59 = vcombine.low %v6184_v42, %v6176_v21  ;;  %v2060_v61 = vor.u32 %v8723_v48, %v2055_v22  ;;  %v6495_v22 = vcombine.low %v8801_v7, %v8804_v4  ;;  %v7669_v2 = vld [vmem:[%s9814_s3 + $0x400] sm:$0xff]  }
  0xa5   : > { %7071 = vmatpush3.bf16.msra.mxu0 %v7651_v53  ;;  %7110 = vmatprep.subr.bf16.mxu1 %v7652_v26  ;;  %v7668_v53 = vld [vmem:[%s9814_s3 + $0x440] sm:$0xff]   ;;  %v1342_v3 = vor.u32 %v1341_v60, %v1337_v19  ;;  %v2512_v48 = vshll.u32 %v8835_v50, 16  ;;  %v1489_v7 = vshrl.u32 %v8859_v62, 16  ;;  %v2290_v57 = vrot.slane %v2288_v32, 1  ;;  %v670_v21 = vld [vmem:[%s8894_s22 + $0xc] sm:$0x1] }
  0xa6   : > { %7072 = vmatprep.subr.bf16.mxu0 %v7657_v35  ;;  %v1335_v30 = vor.u32 %v1334_v24, %v1330_v27  ;;  %5286 = vmatprep.mubr.bf16.mxu1 %v6498_v51  ;;  %v1482_v26 = vshrl.u32 %v8847_v59, 16  ;;  %v1484_v10 = vshll.u32 %v8847_v59, 16  ;;  %v7670_v4 = vld [vmem:[%s9814_s3 + $0x4c0] sm:$0xff]   ;;  %v6419_v13 = vcombine.low %v2060_v61, %v2137_v6  ;;  %v7686_v59 = vld [vmem:[%s9814_s3 + $0x568] sm:$0xff]  }
  0xa7   : > { %v1491_v35 = vshll.u32 %v8859_v62, 16  ;;  %v7671_v19 = vld [vmem:[%s9814_s3 + $0x480] sm:$0xff]   ;;  %v6330_v24 = vcombine.low %v661_v37, %v661_v37  ;;  %v2214_v51 = vor.u32 %v8813_v47, %v2209_v34  ;;  %v2291_v61 = vor.u32 %v2290_v57, %v2286_v5 }
  0xa8   : > { %7111 = vmatpush3.bf16.msra.mxu1 %v7655_v46  ;;  %v6313_v46 = vcombine.low %v6161_v58, %v6153_v9  ;;  %v6496_v27 = vcombine.low %v1335_v30, %v1342_v3  ;;  %v2130_v9 = vor.u32 %v8661_v14, %v2125_v38  ;;  %v662_v38 = vld [vmem:[%s8894_s22 + $0x8] sm:$0xf]  ;;  %v669_v20 = vld [vmem:[%s8894_s22 + $0x4] sm:$0x1]  ;;  %v677_v23 = vld [vmem:[%s8894_s22] sm:$0xe]  ;;  %v8942_v18 = vcombine.low %v8823_v33, %v8832_v0 }
  0xa9   : > { %7073 = vmatpush3.bf16.msra.mxu0 %v7663_v15  ;;  %7112 = vmatprep.subr.bf16.mxu1 %v7666_v52  ;;  %v6331_v42 = vcombine.low %v662_v38, %v662_v38  ;;  %v678_v52 = vld [vmem:[%s8894_s22 + $0x8] sm:$0xe]  ;;  %v6338_v60 = vcombine.low %v661_v37, %v669_v20  ;;  %v6339_v1 = vcombine.low %v662_v38, %v670_v21  ;;  %v1520_v6 = vshrl.u32 %v6330_v24, 16  ;;  %v7679_v3 = vld [vmem:[%s9814_s3 + $0x538] sm:$0xff]  }
  0xaa   : > { %7074 = vmatprep.subr.bf16.mxu0 %v7668_v53  ;;  %v1374_v15 = vrot.slane %v6313_v46, 1  ;;  %5221 = vmatprep.mubr.bf16.mxu0 %v6496_v27  ;;  %v6418_v14 = vcombine.low %v2053_v8, %v2130_v9  ;;  %v1523_v30 = vshll.u32 %v6330_v24, 16  ;;  %v1486_v34 = vrot.slane %v1484_v10, 1 }
  0xab   : > { %v1527_v63 = vshrl.u32 %v6331_v42, 16  ;;  %v1530_v53 = vshll.u32 %v6331_v42, 16  ;;  %v1493_v47 = vrot.slane %v1491_v35, 1  ;;  %v2069_v32 = vshrl.u32 %v6338_v60, 16  ;;  %v7682_v35 = vld [vmem:[%s9814_s3 + $0x570] sm:$0xff]  }
  0xac   : > { %7113 = vmatpush3.bf16.msra.mxu1 %v7667_v56  ;;  %5222 = vmatmul.mubr.bf16.gmra.mxu0 %v6495_v22  ;;  %v6497_v28 = vcombine.low %v1373_v40, %v1374_v15  ;;  %v8908_v56 = vcombine.low %v677_v23, %v669_v20  ;;  %v8916_v22 = vcombine.low %v678_v52, %v670_v21  ;;  %v2071_v11 = vshll.u32 %v6338_v60, 16  ;;  %v7683_v20 = vld [vmem:[%s9814_s3 + $0x530] sm:$0xff]  }
  0xad   : > { %7075 = vmatpush3.bf16.msra.mxu0 %v7669_v2  ;;  %7114 = vmatprep.subr.bf16.mxu1 %v7670_v4  ;;  %v1522_v2 = vrot.slane %v1520_v6, 7  ;;  %v1529_v5 = vrot.slane %v1527_v63, 7  ;;  %v2146_v4 = vshrl.u32 %v6339_v1, 16  ;;  %v8946_v24 = vor.u32 %v1486_v34, %v1482_v26  ;;  %v7681_v34 = vld [vmem:[%s9814_s3 + $0x5b8] sm:$0xff]  }
  0xae   : > { %5327 = vmatprep.mubr.bf16.mxu0 %v6419_v13  ;;  %5287 = vmatmul.mubr.bf16.gmra.mxu1 %v6497_v28  ;;  %v1626_v58 = vshll.u32 %v8908_v56, 16  ;;  %v1624_v46 = vshrl.u32 %v8908_v56, 16  ;;  %v1633_v27 = vshll.u32 %v8916_v22, 16  ;;  %v2148_v13 = vshll.u32 %v6339_v1, 16  ;;  %v663_v56 = vld [vmem:[%s8894_s22 + $0x10] sm:$0xf] }
  0xaf   : > { %7140 = vmatprep.subr.bf16.mxu0 %v7672_v29  ;;  %v1525_v40 = vor.u32 %v1523_v30, %v1522_v2  ;;  %v1532_v15 = vor.u32 %v1530_v53, %v1529_v5  ;;  %v2073_v10 = vrot.slane %v2071_v11, 1  ;;  %v8927_v28 = vor.u32 %v8790_v39, %v1468_v36  ;;  %v671_v53 = vld [vmem:[%s8894_s22 + $0x14] sm:$0x1]  ;;  %v679_v11 = vld [vmem:[%s8894_s22 + $0x10] sm:$0xe] }
  0xb0   : > { %7115 = vmatpush3.bf16.msra.mxu1 %v7671_v19  ;;  %v6446_v19 = vcombine.low %v2214_v51, %v2291_v61  ;;  %v1628_v8 = vrot.slane %v1626_v58, 1  ;;  %v2150_v9 = vrot.slane %v2148_v13, 1  ;;  %v8932_v29 = vor.u32 %v8795_v44, %v1475_v16 }
  0xb1   : > { %7180 = vmatprep.subr.bf16.mxu1 %v7680_v12  ;;  %v1631_v37 = vshrl.u32 %v8916_v22, 16  ;;  %v2074_v38 = vor.u32 %v2073_v10, %v2069_v32  ;;  %v2062_v57 = vshrl.u32 %v1525_v40, 16  ;;  %v2139_v16 = vshrl.u32 %v1532_v15, 16 }
  0xb2   : > { %v2151_v36 = vor.u32 %v2150_v9, %v2146_v4  ;;  %v2141_v39 = vshll.u32 %v1532_v15, 16  ;;  %v1635_v44 = vrot.slane %v1633_v27, 1  ;;  %v8950_v42 = vor.u32 %v1493_v47, %v1489_v7  ;;  %v7693_v27 = vld [vmem:[%s9814_s3 + $0x528] sm:$0xff]  }
  0xb3   : > { %v2202_v0 = vshrl.u32 %v8687_v45, 16  ;;  %v2206_v1 = vrot.slane %v2204_v25, 1  ;;  %v2279_v62 = vshrl.u32 %v8689_v43, 16  ;;  %v2283_v7 = vrot.slane %v2281_v31, 1  ;;  %v664_v25 = vld [vmem:[%s8894_s22 + $0x18] sm:$0xf] }
  0xb4   : > { %5328 = vmatmul.mubr.bf16.vlgmr.msra.gmra.mxu0 %v6418_v14  ;;  %v2064_v14 = vshll.u32 %v1525_v40, 16  ;;  %v6421_v60 = vcombine.low %v2074_v38, %v2151_v36  ;;  %v2143_v33 = vrot.slane %v2141_v39, 1  ;;  %v6332_v12 = vcombine.low %v663_v56, %v663_v56  ;;  %v7684_v43 = vld [vmem:[%s9814_s3 + $0x5f0] sm:$0xff]  }
  0xb5   : > { %7141 = vmatpush3.bf16.msra.mxu0 %v7679_v3  ;;  %5335 = vmatprep.mubr.bf16.mxu0 %v6446_v19  ;;  %v2207_v45 = vor.u32 %v2206_v1, %v2202_v0  ;;  %v8965_v3 = vld [vmem:[%s8894_s22 + $0x1c] sm:$0x1]  ;;  %v2284_v31 = vor.u32 %v2283_v7, %v2279_v62  ;;  %v6333_v47 = vcombine.low %v664_v25, %v664_v25  ;;  %v7685_v40 = vld [vmem:[%s9814_s3 + $0x5b0] sm:$0xff]   ;;  %v7697_v0 = vld [vmem:[%s9814_s3 + $0x520] sm:$0xff]   ;;  %v2363_v1 = vshrl.u32 %v8927_v28, 16 }
  0xb6   : > { %7142 = vmatprep.subr.bf16.mxu0 %v7682_v35  ;;  %v2066_v23 = vrot.slane %v2064_v14, 1  ;;  %5392 = vmatprep.mubr.bf16.mxu1 %v6421_v60  ;;  %v2144_v63 = vor.u32 %v2143_v33, %v2139_v16  ;;  %v6340_v22 = vcombine.low %v663_v56, %v671_v53  ;;  %v6341_v58 = vcombine.low %v664_v25, %v8965_v3 }
  0xb7   : > { %v8974_v2 = vor.u32 %v1628_v8, %v1624_v46  ;;  %v8976_v5 = vor.u32 %v1635_v44, %v1631_v37  ;;  %v1534_v4 = vshrl.u32 %v6332_v12, 16  ;;  %v6445_v15 = vcombine.low %v2207_v45, %v2284_v31  ;;  %v7698_v31 = vld [vmem:[%s9814_s3 + $0x5e0] sm:$0xff]  }
  0xb8   : > { %v2067_v26 = vor.u32 %v2066_v23, %v2062_v57  ;;  %v2223_v10 = vshrl.u32 %v6340_v22, 16  ;;  %v2225_v35 = vshll.u32 %v6340_v22, 16  ;;  %v2300_v19 = vshrl.u32 %v6341_v58, 16  ;;  %v680_v22 = vld [vmem:[%s8894_s22 + $0x18] sm:$0xe] }
  0xb9   : > { %7143 = vmatpush3.bf16.msra.mxu0 %v7683_v20  ;;  %v2302_v8 = vshll.u32 %v6341_v58, 16  ;;  %v1536_v9 = vrot.slane %v1534_v4, 7  ;;  %v1537_v37 = vshll.u32 %v6332_v12, 16  ;;  %v1541_v38 = vshrl.u32 %v6333_v47, 16  ;;  %v7694_v20 = vld [vmem:[%s9814_s3 + $0x5e8] sm:$0xff]  }
  0xba   : > { %7144 = vmatprep.subr.bf16.mxu0 %v7686_v59  ;;  %v6420_v32 = vcombine.low %v2067_v26, %v2144_v63  ;;  %v2227_v57 = vrot.slane %v2225_v35, 1  ;;  %v1544_v14 = vshll.u32 %v6333_v47, 16  ;;  %v8992_v60 = vcombine.low %v679_v11, %v671_v53 }
  0xbb   : > { %v2304_v39 = vrot.slane %v2302_v8, 1  ;;  %v1539_v44 = vor.u32 %v1537_v37, %v1536_v9  ;;  %v1543_v23 = vrot.slane %v1541_v38, 7  ;;  %v2440_v63 = vshrl.u32 %v8932_v29, 16  ;;  %v666_v8 = vld [vmem:[%s8894_s22 + $0x28] sm:$0xf] }
  0xbc   : > { %5393 = vmatmul.mubr.bf16.vlgmr.msra.gmra.mxu1 %v6420_v32  ;;  %5336 = vmatmul.mubr.bf16.gmra.mxu0 %v6445_v15  ;;  %v2228_v33 = vor.u32 %v2227_v57, %v2223_v10  ;;  %v2356_v32 = vshrl.u32 %v8757_v41, 16  ;;  %v2360_v11 = vrot.slane %v2358_v54, 1  ;;  %v2437_v15 = vrot.slane %v2435_v55, 1  ;;  %v7700_v10 = vld [vmem:[%s9814_s3 + $0x558] sm:$0xff]   ;;  %v673_v9 = vld [vmem:[%s8894_s22 + $0x24] sm:$0x1] }
  0xbd   : > { %7145 = vmatpush3.bf16.msra.mxu0 %v7693_v27  ;;  %7181 = vmatpush3.bf16.msra.mxu1 %v7681_v34  ;;  %v2216_v62 = vshrl.u32 %v1539_v44, 16  ;;  %v2218_v7 = vshll.u32 %v1539_v44, 16  ;;  %v2589_v38 = vshll.u32 %v8942_v18, 16  ;;  %v674_v57 = vld [vmem:[%s8894_s22 + $0x2c] sm:$0x1] }
  0xbe   : > { %7182 = vmatprep.subr.bf16.mxu1 %v7684_v43  ;;  %v6343_v44 = vcombine.low %v666_v8, %v674_v57 }
  0xbf   : > { %v2220_v12 = vrot.slane %v2218_v7, 1 }
  0xc1   : > { %7183 = vmatpush3.bf16.msra.mxu1 %v7685_v40  ;;  %v2221_v4 = vor.u32 %v2220_v12, %v2216_v62  ;;  %v2433_v40 = vshrl.u32 %v8759_v49, 16 }
  0xc2   : > { %7184 = vmatprep.subr.bf16.mxu1 %v7694_v20 }
  0xc3   : > { %v2438_v55 = vor.u32 %v2437_v15, %v2433_v40  ;;  %v7711_v15 = vld [vmem:[%s9814_s3 + $0x510] sm:$0xff]  }
  0xf0   : > { %v6756_v17 = vpop.f32.mrf.mxu0 }
  0xf1   : > { %v8938_v21 = vpop.f32.mrf.mxu1 }
  0xf2   : > { %v6757_v51 = vpop.f32.mrf.mxu0 }
  0xf3   : > { %v6797_v52 = vpop.f32.mrf.mxu1  ;;  %v6758_v61 = vadd.f32 %v6757_v51, %v6756_v17  ;;  %v7696_v17 = vld [vmem:[%s9814_s3 + $0x560] sm:$0xff]  }
  0xf4   : > { %v6759_v6 = vpop.f32.mrf.mxu0  ;;  %v6798_v36 = vadd.f32 %v6797_v52, %v8938_v21  ;;  %7146 = vmatprep.subr.bf16.mxu0 %v7696_v17  ;;  %v2305_v21 = vor.u32 %v2304_v39, %v2300_v19  ;;  %v1546_v52 = vor.u32 %v1544_v14, %v1543_v23  ;;  %v2361_v19 = vor.u32 %v2360_v11, %v2356_v32  ;;  %v681_v14 = vld [vmem:[%s8894_s22 + $0x20] sm:$0xe]  ;;  %v7707_v23 = vld [vmem:[%s9814_s3 + $0x518] sm:$0xff]  }
  0xf5   : > { %v6799_v30 = vpop.f32.mrf.mxu1  ;;  %7147 = vmatpush3.bf16.msra.mxu0 %v7697_v0 }
  0xf6   : > { %v6760_v13 = vpop.f32.mrf.mxu0  ;;  %v8998_v59 = vadd.f32 %v6798_v36, %v6758_v61  ;;  %v2442_v61 = vshll.u32 %v8932_v29, 16  ;;  %v6448_v53 = vcombine.low %v2228_v33, %v2305_v21  ;;  %v2293_v34 = vshrl.u32 %v1546_v52, 16  ;;  %v7699_v29 = vld [vmem:[%s9814_s3 + $0x5a0] sm:$0xff]   ;;  %7148 = vmatprep.subr.bf16.mxu0 %v7700_v10  ;;  %v682_v36 = vld [vmem:[%s8894_s22 + $0x28] sm:$0xe] }
  0xf7   : > { %v6800_v46 = vpop.f32.mrf.mxu1  ;;  %v6761_v16 = vadd.f32 %v6760_v13, %v6759_v6  ;;  %v7695_v6 = vld [vmem:[%s9814_s3 + $0x5a8] sm:$0xff]   ;;  %v2295_v43 = vshll.u32 %v1546_v52, 16  ;;  %v9039_v33 = vcombine.low %v680_v22, %v8965_v3  ;;  %v9041_v21 = vcombine.low %v681_v14, %v673_v9  ;;  %v7708_v52 = vld [vmem:[%s9814_s3 + $0x5d8] sm:$0xff]  }
  0xf8   : > { %v6801_v51 = vadd.f32 %v6800_v46, %v6799_v30  ;;  %v6762_v56 = vpop.f32.mrf.mxu0  ;;  %v2365_v30 = vshll.u32 %v8927_v28, 16  ;;  %v2444_v58 = vrot.slane %v2442_v61, 1  ;;  %5400 = vmatprep.mubr.bf16.mxu1 %v6448_v53  ;;  %7185 = vmatpush3.bf16.msra.mxu1 %v7695_v6  ;;  %v665_v46 = vld [vmem:[%s8894_s22 + $0x20] sm:$0xf]  ;;  %v2454_v6 = vshrl.u32 %v6343_v44, 16 }
  0xf9   : > { %v9000_v26 = vpop.f32.mrf.mxu1  ;;  %v2297_v13 = vrot.slane %v2295_v43, 1  ;;  %7186 = vmatprep.subr.bf16.mxu1 %v7698_v31  ;;  %v6334_v20 = vcombine.low %v665_v46, %v665_v46  ;;  %v6342_v39 = vcombine.low %v665_v46, %v673_v9  ;;  %7149 = vmatpush3.bf16.msra.mxu0 %v7707_v23  ;;  %v7709_v43 = vld [vmem:[%s9814_s3 + $0x598] sm:$0xff]   ;;  %v7710_v31 = vld [vmem:[%s9814_s3 + $0x550] sm:$0xff]   ;;  %v2517_v10 = vshrl.u32 %v8946_v24, 16 }
  0xfa   : > { %v9008_v45 = vadd.f32 %v6801_v51, %v6761_v16  ;;  %v6763_v47 = vpop.f32.mrf.mxu0  ;;  %v2367_v28 = vrot.slane %v2365_v30, 1  ;;  %v2445_v54 = vor.u32 %v2444_v58, %v2440_v63  ;;  %v6335_v16 = vcombine.low %v666_v8, %v666_v8  ;;  %7150 = vmatprep.subr.bf16.mxu0 %v7710_v31  ;;  %v7713_v46 = vld [vmem:[%s9814_s3 + $0x590] sm:$0xff]  }
  0xfb   : > { %v9010_v25 = vpop.f32.mrf.mxu1  ;;  %v6764_v37 = vadd.f32 %v6763_v47, %v6762_v56  ;;  %v2298_v49 = vor.u32 %v2297_v13, %v2293_v34  ;;  %v2377_v7 = vshrl.u32 %v6342_v39, 16  ;;  %v2379_v56 = vshll.u32 %v6342_v39, 16 }
  0xfc   : > { %v6765_v35 = vpop.f32.mrf.mxu0  ;;  %v2368_v41 = vor.u32 %v2367_v28, %v2363_v1  ;;  %v6472_v1 = vcombine.low %v2361_v19, %v2438_v55  ;;  %7187 = vmatpush3.bf16.msra.mxu1 %v7699_v29  ;;  %v2456_v30 = vshll.u32 %v6343_v44, 16  ;;  %v1548_v63 = vshrl.u32 %v6334_v20, 16 }
  0xfd   : > { %v6805_v27 = vpop.f32.mrf.mxu1  ;;  %v6447_v0 = vcombine.low %v2221_v4, %v2298_v49  ;;  %v1551_v3 = vshll.u32 %v6334_v20, 16  ;;  %v1555_v61 = vshrl.u32 %v6335_v16, 16  ;;  %v1558_v53 = vshll.u32 %v6335_v16, 16  ;;  %7188 = vmatprep.subr.bf16.mxu1 %v7708_v52  ;;  %7151 = vmatpush3.bf16.msra.mxu0 %v7711_v15  ;;  %v667_v52 = vld [vmem:[%s8894_s22 + $0x30] sm:$0xf]  ;;  %v7722_v15 = vld [vmem:[%s9814_s3 + $0x5c8] sm:$0xff]  }
  0xfe   : > { %v6473_v17 = vcombine.low %v2368_v41, %v2445_v54  ;;  %v6766_v62 = vpop.f32.mrf.mxu0  ;;  %v2381_v12 = vrot.slane %v2379_v56, 1  ;;  %v2458_v34 = vrot.slane %v2456_v30, 1  ;;  %v6804_v47 = vadd.f32 %v9010_v25, %v9000_v26  ;;  %v676_v30 = vld [vmem:[%s8894_s22 + $0x3c] sm:$0x1] }
  0xff   : > { %v6806_v51 = vpop.f32.mrf.mxu1  ;;  %5401 = vmatmul.mubr.bf16.gmra.mxu1 %v6447_v0  ;;  %v6767_v22 = vadd.f32 %v6766_v62, %v6765_v35  ;;  %v9056_v58 = vcombine.low %v682_v36, %v674_v57  ;;  %v1550_v29 = vrot.slane %v1548_v63, 7  ;;  %v1557_v32 = vrot.slane %v1555_v61, 7 }
 0x100   : > { %5343 = vmatprep.mubr.bf16.mxu0 %v6473_v17  ;;  %v6807_v11 = vadd.f32 %v6806_v51, %v6805_v27  ;;  %v6768_v4 = vpop.f32.mrf.mxu0  ;;  %v2382_v13 = vor.u32 %v2381_v12, %v2377_v7  ;;  %v2459_v40 = vor.u32 %v2458_v34, %v2454_v6  ;;  %7189 = vmatpush3.bf16.msra.mxu1 %v7709_v43  ;;  %v7712_v27 = vld [vmem:[%s9814_s3 + $0x5d0] sm:$0xff]   ;;  %v2519_v54 = vshll.u32 %v8946_v24, 16  ;;  %v684_v12 = vld [vmem:[%s8894_s22 + $0x38] sm:$0xe] }
 0x101   : > { %5344 = vmatmul.mubr.bf16.gmra.mxu0 %v6472_v1  ;;  %v9054_v28 = vpop.f32.mrf.mxu1  ;;  %v9062_v26 = vadd.f32 %v6804_v47, %v6764_v37  ;;  %v1553_v35 = vor.u32 %v1551_v3, %v1550_v29  ;;  %v1560_v41 = vor.u32 %v1558_v53, %v1557_v32  ;;  %v2594_v19 = vshrl.u32 %v8950_v42, 16  ;;  %7190 = vmatprep.subr.bf16.mxu1 %v7712_v27  ;;  %v7714_v1 = vld [vmem:[%s9814_s3 + $0x548] sm:$0xff]  }
 0x102   : > { %v6769_v8 = vpop.f32.mrf.mxu0  ;;  %v6475_v9 = vcombine.low %v2382_v13, %v2459_v40  ;;  %v2596_v37 = vshll.u32 %v8950_v42, 16  ;;  %v2510_v49 = vshrl.u32 %v8835_v50, 16  ;;  %v9076_v55 = vadd.f32 %v6807_v11, %v6767_v22  ;;  %v668_v50 = vld [vmem:[%s8894_s22 + $0x38] sm:$0xf]  ;;  %7152 = vmatprep.subr.bf16.mxu0 %v7714_v1  ;;  %v7721_v32 = vld [vmem:[%s9814_s3 + $0x508] sm:$0xff]  }
 0x103   : > { %v9064_v25 = vpop.f32.mrf.mxu1  ;;  %v2370_v14 = vshrl.u32 %v1553_v35, 16  ;;  %v2372_v24 = vshll.u32 %v1553_v35, 16  ;;  %v2447_v20 = vshrl.u32 %v1560_v41, 16  ;;  %v2449_v17 = vshll.u32 %v1560_v41, 16  ;;  %7153 = vmatpush3.bf16.msra.mxu0 %v7721_v32 }
 0x104   : > { %9824 = vst [vmem:[#allocation2_spill] sm:$0xff] %v9076_v55  ;;  %v6771_v36 = vpop.f32.mrf.mxu0  ;;  %5408 = vmatprep.mubr.bf16.mxu1 %v6475_v9  ;;  %v2521_v16 = vrot.slane %v2519_v54, 1  ;;  %v2598_v39 = vrot.slane %v2596_v37, 1  ;;  %7191 = vmatpush3.bf16.msra.mxu1 %v7713_v46  ;;  %v2514_v42 = vrot.slane %v2512_v48, 1  ;;  %v2587_v44 = vshrl.u32 %v8942_v18, 16  ;;  %v7723_v37 = vld [vmem:[%s9814_s3 + $0x588] sm:$0xff]  }
 0x105   : > { %v9078_v57 = vpop.f32.mrf.mxu1  ;;  %v2374_v23 = vrot.slane %v2372_v24, 1  ;;  %v2451_v51 = vrot.slane %v2449_v17, 1  ;;  %v2591_v0 = vrot.slane %v2589_v38, 1  ;;  %v6770_v62 = vadd.f32 %v6769_v8, %v6768_v4  ;;  %v675_v48 = vld [vmem:[%s8894_s22 + $0x34] sm:$0x1]  ;;  %7192 = vmatprep.subr.bf16.mxu1 %v7722_v15 }
 0x106   : > { %v2522_v7 = vor.u32 %v2521_v16, %v2517_v10  ;;  %v2599_v56 = vor.u32 %v2598_v39, %v2594_v19  ;;  %v2515_v6 = vor.u32 %v2514_v42, %v2510_v49  ;;  %v6336_v63 = vcombine.low %v667_v52, %v667_v52  ;;  %v683_v38 = vld [vmem:[%s8894_s22 + $0x30] sm:$0xe]  ;;  %v6772_v43 = vpop.f32.mrf.mxu0  ;;  %v7724_v49 = vld [vmem:[%s9814_s3 + $0x540] sm:$0xff]  }
 0x107   : > { %v6812_v3 = vpop.f32.mrf.mxu1  ;;  %v2375_v61 = vor.u32 %v2374_v23, %v2370_v14  ;;  %v2452_v53 = vor.u32 %v2451_v51, %v2447_v20  ;;  %v2592_v18 = vor.u32 %v2591_v0, %v2587_v44  ;;  %v6337_v34 = vcombine.low %v668_v50, %v668_v50  ;;  %7154 = vmatprep.subr.bf16.mxu0 %v7724_v49  ;;  %v7725_v23 = vld [vmem:[%s9814_s3 + $0x500] sm:$0xff]  }
 0x108   : > { %v6500_v31 = vcombine.low %v2522_v7, %v2599_v56  ;;  %v6344_v47 = vcombine.low %v667_v52, %v675_v48  ;;  %v6345_v22 = vcombine.low %v668_v50, %v676_v30  ;;  %v9094_v29 = vcombine.low %v683_v38, %v675_v48  ;;  %v6774_v14 = vpop.f32.mrf.mxu0  ;;  %7193 = vmatpush3.bf16.msra.mxu1 %v7723_v37  ;;  %v6186_v48 = vld [vmem:[%s8894_s22 + $0x8] sm:$0xf] }
 0x109   : > { %v6474_v11 = vcombine.low %v2375_v61, %v2452_v53  ;;  %v6499_v4 = vcombine.low %v2515_v6, %v2592_v18  ;;  %v9099_v13 = vcombine.low %v684_v12, %v676_v30  ;;  %v1562_v40 = vshrl.u32 %v6336_v63, 16  ;;  %v6814_v54 = vpop.f32.mrf.mxu1  ;;  %7155 = vmatpush3.bf16.msra.mxu0 %v7725_v23  ;;  %v6187_v30 = vld [vmem:[%s8894_s22 + $0x10] sm:$0xf]  ;;  %v7729_v18 = vld [vmem:[%s9814_s3 + $0x580] sm:$0xff]  }
 0x10a   : > { %5351 = vmatprep.mubr.bf16.mxu0 %v6500_v31  ;;  %v2531_v10 = vshrl.u32 %v6344_v47, 16  ;;  %v2533_v35 = vshll.u32 %v6344_v47, 16  ;;  %v2608_v41 = vshrl.u32 %v6345_v22, 16  ;;  %v2610_v27 = vshll.u32 %v6345_v22, 16  ;;  %v6775_v0 = vpop.f32.mrf.mxu0 }
 0x10b   : > { %5409 = vmatmul.mubr.bf16.gmra.mxu1 %v6474_v11  ;;  %5352 = vmatmul.mubr.bf16.gmra.mxu0 %v6499_v4  ;;  %v1564_v19 = vrot.slane %v1562_v40, 7  ;;  %v1565_v46 = vshll.u32 %v6336_v63, 16  ;;  %v1569_v8 = vshrl.u32 %v6337_v34, 16  ;;  %v1572_v9 = vshll.u32 %v6337_v34, 16  ;;  %v6815_v39 = vpop.f32.mrf.mxu1 }
 0x10c   : > { %v2535_v24 = vrot.slane %v2533_v35, 1  ;;  %v2612_v20 = vrot.slane %v2610_v27, 1  ;;  %v6810_v17 = vadd.f32 %v9064_v25, %v9054_v28  ;;  %v6773_v16 = vadd.f32 %v6772_v43, %v6771_v36  ;;  %v7726_v28 = vld [vmem:[%s9814_s3 + $0x5c0] sm:$0xff]   ;;  %v9128_v63 = vpop.f32.mrf.mxu0  ;;  %v6194_v35 = vld [vmem:[%s8894_s22 + $0xc] sm:$0x1] }
 0x10d   : > { %v1567_v42 = vor.u32 %v1565_v46, %v1564_v19  ;;  %v1571_v44 = vrot.slane %v1569_v8, 7  ;;  %v6813_v51 = vadd.f32 %v6812_v3, %v9078_v57  ;;  %v9116_v1 = vadd.f32 %v6815_v39, %v6814_v54  ;;  %7194 = vmatprep.subr.bf16.mxu1 %v7726_v28  ;;  %v6195_v46 = vld [vmem:[%s8894_s22 + $0x14] sm:$0x1]  ;;  %v6202_v8 = vld [vmem:[%s8894_s22 + $0x8] sm:$0xe] }
 0x10e   : > { %v2536_v52 = vor.u32 %v2535_v24, %v2531_v10  ;;  %v2613_v7 = vor.u32 %v2612_v20, %v2608_v41  ;;  %v2076_v25 = vshrl.u32 %v8974_v2, 16  ;;  %v9122_v36 = vadd.f32 %v6810_v17, %v6770_v62  ;;  %v9135_v31 = vpop.f32.mrf.mxu0  ;;  %7195 = vmatpush3.bf16.msra.mxu1 %v7729_v18  ;;  %v7730_v10 = vld [vmem:[%s9814_s3 + $0x678] sm:$0xff]   ;;  %v9142_v41 = vpop.f32.mrf.mxu1  ;;  %v6203_v20 = vld [vmem:[%s8894_s22 + $0x10] sm:$0xe] }
 0x10f   : > { %v1574_v56 = vor.u32 %v1572_v9, %v1571_v44  ;;  %v2524_v6 = vshrl.u32 %v1567_v42, 16  ;;  %v2526_v50 = vshll.u32 %v1567_v42, 16  ;;  %v9126_v57 = vadd.f32 %v6813_v51, %v6773_v16  ;;  %7220 = vmatprep.subr.bf16.mxu0 %v7730_v10 }
 0x110   : > { %9825 = vst [vmem:[#allocation3_spill] sm:$0xff] %v9122_v36  ;;  %v6502_v3 = vcombine.low %v2536_v52, %v2613_v7  ;;  %v6354_v61 = vcombine.low %v6186_v48, %v6186_v48  ;;  %v6355_v53 = vcombine.low %v6187_v30, %v6187_v30  ;;  %v2078_v62 = vshll.u32 %v8974_v2, 16  ;;  %v9144_v27 = vpop.f32.mrf.mxu0 }
 0x111   : > { %9826 = vst [vmem:[#allocation4_spill] sm:$0xff] %v9126_v57  ;;  %v2528_v38 = vrot.slane %v2526_v50, 1  ;;  %v2601_v12 = vshrl.u32 %v1574_v56, 16  ;;  %v2603_v34 = vshll.u32 %v1574_v56, 16  ;;  %v2153_v43 = vshrl.u32 %v8976_v5, 16 }
 0x112   : > { %5416 = vmatprep.mubr.bf16.mxu1 %v6502_v3  ;;  %v1704_v47 = vshrl.u32 %v6354_v61, 16  ;;  %v1707_v22 = vshll.u32 %v6354_v61, 16  ;;  %v1711_v32 = vshrl.u32 %v6355_v53, 16  ;;  %v1714_v11 = vshll.u32 %v6355_v53, 16  ;;  %v9153_v16 = vpop.f32.mrf.mxu0 }
 0x113   : > { %v2529_v4 = vor.u32 %v2528_v38, %v2524_v6  ;;  %v2605_v40 = vrot.slane %v2603_v34, 1  ;;  %v2080_v15 = vrot.slane %v2078_v62, 1  ;;  %v2155_v2 = vshll.u32 %v8976_v5, 16 }
 0x114   : > { %v1706_v54 = vrot.slane %v1704_v47, 7  ;;  %v1713_v19 = vrot.slane %v1711_v32, 7  ;;  %v6362_v9 = vcombine.low %v6186_v48, %v6194_v35  ;;  %v9148_v37 = vadd.f32 %v6775_v0, %v6774_v14  ;;  %v9158_v14 = vld [vmem:[%s9814_s3 + $0x6b8] sm:$0xff]   ;;  %v9160_v0 = vpop.f32.mrf.mxu1 }
 0x115   : > { %v2606_v49 = vor.u32 %v2605_v40, %v2601_v12  ;;  %v9150_v24 = vor.u32 %v2080_v15, %v2076_v25  ;;  %v2157_v5 = vrot.slane %v2155_v2, 1  ;;  %v6363_v17 = vcombine.low %v6187_v30, %v6195_v46  ;;  %v9162_v25 = vpop.f32.mrf.mxu0  ;;  %7284 = vmatprep.subr.bf16.mxu1 %v9158_v14 }
 0x116   : > { %v1709_v39 = vor.u32 %v1707_v22, %v1706_v54  ;;  %v1716_v42 = vor.u32 %v1714_v11, %v1713_v19  ;;  %v6370_v44 = vcombine.low %v6202_v8, %v6194_v35  ;;  %v6371_v23 = vcombine.low %v6203_v20, %v6195_v46  ;;  %v9166_v18 = vpop.f32.mrf.mxu1  ;;  %v9171_v11 = vld [vmem:[%s8894_s22 + $0x18] sm:$0xf]  ;;  %v9179_v54 = vld [vmem:[%s8894_s22 + $0x20] sm:$0xf] }
 0x117   : > { %v6501_v51 = vcombine.low %v2529_v4, %v2606_v49  ;;  %v2158_v52 = vor.u32 %v2157_v5, %v2153_v43  ;;  %v2090_v7 = vshrl.u32 %v6362_v9, 16  ;;  %v2092_v28 = vshll.u32 %v6362_v9, 16  ;;  %v9168_v62 = vpop.f32.mrf.mxu0  ;;  %v7735_v46 = vld [vmem:[%s9814_s3 + $0x638] sm:$0xff]  }
 0x118   : > { %v2083_v56 = vshrl.u32 %v1709_v39, 16  ;;  %v2085_v6 = vshll.u32 %v1709_v39, 16  ;;  %v2160_v50 = vshrl.u32 %v1716_v42, 16  ;;  %v2162_v48 = vshll.u32 %v1716_v42, 16  ;;  %v9174_v40 = vpop.f32.mrf.mxu1 }
 0x119   : > { %5417 = vmatmul.mubr.bf16.gmra.mxu1 %v6501_v51  ;;  %v6422_v30 = vcombine.low %v9150_v24, %v2158_v52  ;;  %v1808_v3 = vshrl.u32 %v6370_v44, 16  ;;  %v1810_v61 = vshll.u32 %v6370_v44, 16  ;;  %v1815_v53 = vshrl.u32 %v6371_v23, 16  ;;  %v9190_v5 = vpop.f32.mrf.mxu0  ;;  %v9195_v44 = vld [vmem:[%s8894_s22 + $0x1c] sm:$0x1] }
 0x11a   : > { %v2087_v38 = vrot.slane %v2085_v6, 1  ;;  %v2164_v12 = vrot.slane %v2162_v48, 1  ;;  %v1817_v34 = vshll.u32 %v6371_v23, 16  ;;  %v2094_v43 = vrot.slane %v2092_v28, 1  ;;  %v9188_v24 = vpop.f32.mrf.mxu1  ;;  %v7738_v48 = vld [vmem:[%s9814_s3 + $0x630] sm:$0xff]  }
 0x11b   : > { %v1812_v47 = vrot.slane %v1810_v61, 1  ;;  %v2167_v22 = vshrl.u32 %v6363_v17, 16  ;;  %v2169_v32 = vshll.u32 %v6363_v17, 16  ;;  %v1638_v4 = vshrl.u32 %v8992_v60, 16  ;;  %v9203_v6 = vpop.f32.mrf.mxu0 }
 0x11c   : > { %v2088_v15 = vor.u32 %v2087_v38, %v2083_v56  ;;  %v2165_v2 = vor.u32 %v2164_v12, %v2160_v50  ;;  %v1819_v10 = vrot.slane %v1817_v34, 1  ;;  %v9176_v35 = vor.u32 %v2094_v43, %v2090_v7  ;;  %v7736_v7 = vld [vmem:[%s9814_s3 + $0x670] sm:$0xff]   ;;  %v9201_v56 = vld [vmem:[%s8894_s22 + $0x24] sm:$0x1]  ;;  %v9209_v38 = vpop.f32.mrf.mxu1 }
 0x11d   : > { %v1813_v19 = vor.u32 %v1812_v47, %v1808_v3  ;;  %v2171_v8 = vrot.slane %v2169_v32, 1  ;;  %v6356_v9 = vcombine.low %v9171_v11, %v9171_v11  ;;  %v6357_v49 = vcombine.low %v9179_v54, %v9179_v54  ;;  %v6205_v32 = vld [vmem:[%s8894_s22 + $0x20] sm:$0xe] }
 0x11e   : > { %v6423_v20 = vcombine.low %v2088_v15, %v2165_v2  ;;  %v1820_v17 = vor.u32 %v1819_v10, %v1815_v53  ;;  %v1640_v39 = vshll.u32 %v8992_v60, 16  ;;  %v1645_v42 = vshrl.u32 %v9039_v33, 16  ;;  %v6204_v53 = vld [vmem:[%s8894_s22 + $0x18] sm:$0xe]  ;;  %v9216_v15 = vpop.f32.mrf.mxu0  ;;  %v9223_v57 = vpop.f32.mrf.mxu1 }
 0x11f   : > { %v2097_v23 = vshrl.u32 %v1813_v19, 16  ;;  %v2099_v51 = vshll.u32 %v1813_v19, 16  ;;  %v2172_v52 = vor.u32 %v2171_v8, %v2167_v22  ;;  %v1718_v28 = vshrl.u32 %v6356_v9, 16  ;;  %v7741_v22 = vld [vmem:[%s9814_s3 + $0x668] sm:$0xff]  }
 0x120   : > { %5457 = vmatprep.mubr.bf16.mxu0 %v6423_v20  ;;  %v2174_v60 = vshrl.u32 %v1820_v17, 16  ;;  %v2176_v50 = vshll.u32 %v1820_v17, 16  ;;  %v1721_v3 = vshll.u32 %v6356_v9, 16  ;;  %v1725_v61 = vshrl.u32 %v6357_v49, 16  ;;  %v9221_v20 = vpop.f32.mrf.mxu0 }
 0x121   : > { %5458 = vmatmul.mubr.bf16.vlgmr.msra.gmra.mxu0 %v6422_v30  ;;  %v2101_v12 = vrot.slane %v2099_v51, 1  ;;  %v6424_v34 = vcombine.low %v9176_v35, %v2172_v52  ;;  %v1720_v43 = vrot.slane %v1718_v28, 7  ;;  %v1728_v47 = vshll.u32 %v6357_v49, 16 }
 0x122   : > { %v2178_v2 = vrot.slane %v2176_v50, 1  ;;  %7221 = vmatpush3.bf16.msra.mxu0 %v7735_v46  ;;  %v1727_v10 = vrot.slane %v1725_v61, 7  ;;  %v1642_v19 = vrot.slane %v1640_v39, 1  ;;  %v1647_v8 = vshll.u32 %v9039_v33, 16 }
 0x123   : > { %v2102_v9 = vor.u32 %v2101_v12, %v2097_v23  ;;  %7222 = vmatprep.subr.bf16.mxu0 %v7736_v7  ;;  %v1723_v30 = vor.u32 %v1721_v3, %v1720_v43  ;;  %v6372_v35 = vcombine.low %v6204_v53, %v9195_v44  ;;  %v6373_v49 = vcombine.low %v6205_v32, %v9201_v56  ;;  %v7745_v53 = vld [vmem:[%s9814_s3 + $0x628] sm:$0xff]   ;;  %v9228_v12 = vpop.f32.mrf.mxu1 }
 0x124   : > { %v2179_v17 = vor.u32 %v2178_v2, %v2174_v60  ;;  %v1730_v51 = vor.u32 %v1728_v47, %v1727_v10  ;;  %v1643_v52 = vor.u32 %v1642_v19, %v1638_v4  ;;  %v1649_v28 = vrot.slane %v1647_v8, 1  ;;  %v7742_v47 = vld [vmem:[%s9814_s3 + $0x6b0] sm:$0xff]  }
 0x125   : > { %v2237_v46 = vshrl.u32 %v1723_v30, 16  ;;  %v2239_v50 = vshll.u32 %v1723_v30, 16  ;;  %v1822_v39 = vshrl.u32 %v6372_v35, 16  ;;  %v1824_v61 = vshll.u32 %v6372_v35, 16 }
 0x126   : > { %v6425_v33 = vcombine.low %v2102_v9, %v2179_v17  ;;  %7223 = vmatpush3.bf16.msra.mxu0 %v7738_v48  ;;  %v2314_v23 = vshrl.u32 %v1730_v51, 16  ;;  %v2316_v7 = vshll.u32 %v1730_v51, 16  ;;  %v1650_v3 = vor.u32 %v1649_v28, %v1645_v42  ;;  %v7748_v42 = vld [vmem:[%s9814_s3 + $0x660] sm:$0xff]   ;;  %v9236_v48 = vpop.f32.mrf.mxu0  ;;  %v9238_v9 = vpop.f32.mrf.mxu1  ;;  %v9241_v51 = vld [vmem:[%s8894_s22 + $0x28] sm:$0xf] }
 0x127   : > { %v2241_v60 = vrot.slane %v2239_v50, 1  ;;  %v2230_v4 = vshrl.u32 %v1643_v52, 16  ;;  %v2232_v43 = vshll.u32 %v1643_v52, 16  ;;  %7224 = vmatprep.subr.bf16.mxu0 %v7741_v22  ;;  %v1826_v32 = vrot.slane %v1824_v61, 1 }
 0x128   : > { %5522 = vmatprep.mubr.bf16.mxu1 %v6425_v33  ;;  %v2318_v2 = vrot.slane %v2316_v7, 1  ;;  %v2307_v10 = vshrl.u32 %v1650_v3, 16  ;;  %v2309_v19 = vshll.u32 %v1650_v3, 16  ;;  %v1829_v8 = vshrl.u32 %v6373_v49, 16  ;;  %v9243_v52 = vpop.f32.mrf.mxu0 }
 0x129   : > { %5523 = vmatmul.mubr.bf16.vlgmr.msra.gmra.mxu1 %v6424_v34  ;;  %v2242_v22 = vor.u32 %v2241_v60, %v2237_v46  ;;  %v2234_v30 = vrot.slane %v2232_v43, 1  ;;  %v1827_v35 = vor.u32 %v1826_v32, %v1822_v39  ;;  %v1831_v17 = vshll.u32 %v6373_v49, 16  ;;  %v7749_v49 = vld [vmem:[%s9814_s3 + $0x6a8] sm:$0xff]   ;;  %v7753_v60 = vld [vmem:[%s9814_s3 + $0x658] sm:$0xff]  }
 0x12a   : > { %7285 = vmatpush3.bf16.msra.mxu1 %v9158_v14  ;;  %v2319_v28 = vor.u32 %v2318_v2, %v2314_v23  ;;  %v2311_v50 = vrot.slane %v2309_v19, 1  ;;  %7225 = vmatpush3.bf16.msra.mxu0 %v7745_v53  ;;  %v6364_v61 = vcombine.low %v9171_v11, %v9195_v44  ;;  %v6365_v34 = vcombine.low %v9179_v54, %v9201_v56  ;;  %v7750_v14 = vld [vmem:[%s9814_s3 + $0x620] sm:$0xff]   ;;  %v9257_v23 = vld [vmem:[%s8894_s22 + $0x30] sm:$0xf]  ;;  %v9259_v11 = vpop.f32.mrf.mxu1  ;;  %v9261_v44 = vpop.f32.mrf.mxu0 }
 0x12b   : > { %v2235_v46 = vor.u32 %v2234_v30, %v2230_v4  ;;  %7286 = vmatprep.subr.bf16.mxu1 %v7742_v47  ;;  %v1833_v39 = vrot.slane %v1831_v17, 1  ;;  %v2251_v33 = vshrl.u32 %v1827_v35, 16  ;;  %v2253_v7 = vshll.u32 %v1827_v35, 16  ;;  %7226 = vmatprep.subr.bf16.mxu0 %v7748_v42  ;;  %9827 = vst [vmem:[#allocation5_spill] sm:$0xff] %v9261_v44  ;;  %v7754_v30 = vld [vmem:[%s9814_s3 + $0x6a0] sm:$0xff]  }
 0x12c   : > { %v6450_v54 = vcombine.low %v2242_v22, %v2319_v28  ;;  %v2312_v56 = vor.u32 %v2311_v50, %v2307_v10  ;;  %v2244_v3 = vshrl.u32 %v6364_v61, 16  ;;  %v2246_v53 = vshll.u32 %v6364_v61, 16  ;;  %v6206_v35 = vld [vmem:[%s8894_s22 + $0x28] sm:$0xe]  ;;  %v9277_v17 = vpop.f32.mrf.mxu0 }
 0x12d   : > { %v1834_v4 = vor.u32 %v1833_v39, %v1829_v8  ;;  %v2255_v43 = vrot.slane %v2253_v7, 1  ;;  %v2321_v32 = vshrl.u32 %v6365_v34, 16  ;;  %v2323_v42 = vshll.u32 %v6365_v34, 16  ;;  %v9274_v8 = vld [vmem:[%s8894_s22 + $0x2c] sm:$0x1]  ;;  %9828 = vst [vmem:[#allocation6_spill] sm:$0xff] %v9277_v17  ;;  %v9286_v7 = vpop.f32.mrf.mxu1 }
 0x12e   : > { %5465 = vmatprep.mubr.bf16.mxu0 %v6450_v54  ;;  %v6449_v2 = vcombine.low %v2235_v46, %v2312_v56  ;;  %7287 = vmatpush3.bf16.msra.mxu1 %v7742_v47  ;;  %v2248_v19 = vrot.slane %v2246_v53, 1  ;;  %v6358_v10 = vcombine.low %v9241_v51, %v9241_v51  ;;  %v6359_v22 = vcombine.low %v9257_v23, %v9257_v23  ;;  %v9280_v34 = vld [vmem:[%s8894_s22 + $0x34] sm:$0x1]  ;;  %v6207_v46 = vld [vmem:[%s8894_s22 + $0x30] sm:$0xe]  ;;  %v7757_v39 = vld [vmem:[%s9814_s3 + $0x618] sm:$0xff]  }
 0x12f   : > { %v2256_v28 = vor.u32 %v2255_v43, %v2251_v33  ;;  %v2328_v50 = vshrl.u32 %v1834_v4, 16  ;;  %v2330_v61 = vshll.u32 %v1834_v4, 16  ;;  %v2325_v47 = vrot.slane %v2323_v42, 1  ;;  %7288 = vmatprep.subr.bf16.mxu1 %v7749_v49  ;;  %7227 = vmatpush3.bf16.msra.mxu0 %v7750_v14  ;;  %9829 = vst [vmem:[#allocation7_spill] sm:$0xff] %v9286_v7  ;;  %v7760_v33 = vld [vmem:[%s9814_s3 + $0x650] sm:$0xff]   ;;  %v9292_v17 = vpop.f32.mrf.mxu1 }
 0x130   : > { %5466 = vmatmul.mubr.bf16.gmra.mxu0 %v6449_v2  ;;  %v2249_v54 = vor.u32 %v2248_v19, %v2244_v3  ;;  %v1732_v56 = vshrl.u32 %v6358_v10, 16  ;;  %v1735_v53 = vshll.u32 %v6358_v10, 16  ;;  %v1739_v36 = vshrl.u32 %v6359_v22, 16  ;;  %7228 = vmatprep.subr.bf16.mxu0 %v7753_v60  ;;  %v9296_v19 = vpop.f32.mrf.mxu0 }
 0x131   : > { %v2332_v14 = vrot.slane %v2330_v61, 1  ;;  %v2326_v4 = vor.u32 %v2325_v47, %v2321_v32  ;;  %v1742_v43 = vshll.u32 %v6359_v22, 16  ;;  %v1652_v42 = vshrl.u32 %v9041_v21, 16  ;;  %9830 = vst [vmem:[#allocation8_spill] sm:$0xff] %v9296_v19  ;;  %v9303_v22 = vpop.f32.mrf.mxu1 }
 0x132   : > { %7289 = vmatpush3.bf16.msra.mxu1 %v7749_v49  ;;  %v1734_v44 = vrot.slane %v1732_v56, 7  ;;  %v1741_v55 = vrot.slane %v1739_v36, 7  ;;  %v1654_v3 = vshll.u32 %v9041_v21, 16  ;;  %v1659_v2 = vshrl.u32 %v9056_v58, 16  ;;  %v7761_v49 = vld [vmem:[%s9814_s3 + $0x698] sm:$0xff]  }
 0x133   : > { %v2333_v60 = vor.u32 %v2332_v14, %v2328_v50  ;;  %v6451_v10 = vcombine.low %v2249_v54, %v2326_v4  ;;  %v1661_v7 = vshll.u32 %v9056_v58, 16  ;;  %7290 = vmatprep.subr.bf16.mxu1 %v7754_v30  ;;  %v6374_v32 = vcombine.low %v6206_v35, %v9274_v8  ;;  %7229 = vmatpush3.bf16.msra.mxu0 %v7757_v39  ;;  %v7762_v58 = vld [vmem:[%s9814_s3 + $0x610] sm:$0xff]   ;;  %v7765_v35 = vld [vmem:[%s9814_s3 + $0x648] sm:$0xff]   ;;  %v9312_v50 = vpop.f32.mrf.mxu0  ;;  %v9317_v4 = vpop.f32.mrf.mxu1 }
 0x134   : > { %v1737_v36 = vor.u32 %v1735_v53, %v1734_v44  ;;  %v1744_v21 = vor.u32 %v1742_v43, %v1741_v55  ;;  %v1656_v61 = vrot.slane %v1654_v3, 1  ;;  %v6375_v47 = vcombine.low %v6207_v46, %v9280_v34  ;;  %7230 = vmatprep.subr.bf16.mxu0 %v7760_v33  ;;  %9831 = vst [vmem:[#allocation9_spill] sm:$0xff] %v9312_v50  ;;  %v7766_v55 = vld [vmem:[%s9814_s3 + $0x690] sm:$0xff]  }
 0x135   : > { %v6452_v39 = vcombine.low %v2256_v28, %v2333_v60  ;;  %v1663_v54 = vrot.slane %v1661_v7, 1  ;;  %v1836_v56 = vshrl.u32 %v6374_v32, 16  ;;  %v1838_v14 = vshll.u32 %v6374_v32, 16  ;;  %9832 = vst [vmem:[#allocation10_spill] sm:$0xff] %v9317_v4  ;;  %v9319_v43 = vpop.f32.mrf.mxu0 }
 0x136   : > { %v2391_v44 = vshrl.u32 %v1737_v36, 16  ;;  %v2393_v46 = vshll.u32 %v1737_v36, 16  ;;  %v2468_v53 = vshrl.u32 %v1744_v21, 16  ;;  %v2470_v33 = vshll.u32 %v1744_v21, 16  ;;  %7291 = vmatpush3.bf16.msra.mxu1 %v7754_v30  ;;  %9833 = vst [vmem:[#allocation11_spill] sm:$0xff] %v9319_v43  ;;  %v7769_v30 = vld [vmem:[%s9814_s3 + $0x608] sm:$0xff]  }
 0x137   : > { %5530 = vmatprep.mubr.bf16.mxu1 %v6452_v39  ;;  %v1657_v3 = vor.u32 %v1656_v61, %v1652_v42  ;;  %v1664_v50 = vor.u32 %v1663_v54, %v1659_v2  ;;  %v1840_v28 = vrot.slane %v1838_v14, 1  ;;  %v1843_v7 = vshrl.u32 %v6375_v47, 16  ;;  %7292 = vmatprep.subr.bf16.mxu1 %v7761_v49  ;;  %v9326_v21 = vpop.f32.mrf.mxu0  ;;  %v9335_v14 = vld [vmem:[%s8894_s22 + $0x40] sm:$0xf] }
 0x138   : > { %5531 = vmatmul.mubr.bf16.gmra.mxu1 %v6451_v10  ;;  %v2395_v60 = vrot.slane %v2393_v46, 1  ;;  %v2472_v32 = vrot.slane %v2470_v33, 1  ;;  %v1845_v19 = vshll.u32 %v6375_v47, 16  ;;  %v6366_v36 = vcombine.low %v9241_v51, %v9274_v8  ;;  %7231 = vmatpush3.bf16.msra.mxu0 %v7762_v58  ;;  %9834 = vst [vmem:[#allocation12_spill] sm:$0xff] %v9326_v21  ;;  %v7772_v10 = vld [vmem:[%s9814_s3 + $0x640] sm:$0xff]   ;;  %v7773_v46 = vld [vmem:[%s9814_s3 + $0x688] sm:$0xff]   ;;  %v9340_v33 = vpop.f32.mrf.mxu1 }
 0x139   : > { %v2384_v42 = vshrl.u32 %v1657_v3, 16  ;;  %v2386_v2 = vshll.u32 %v1657_v3, 16  ;;  %v2461_v61 = vshrl.u32 %v1664_v50, 16  ;;  %v2463_v39 = vshll.u32 %v1664_v50, 16  ;;  %7232 = vmatprep.subr.bf16.mxu0 %v7765_v35  ;;  %v9332_v58 = vld [vmem:[%s8894_s22 + $0x38] sm:$0xf]  ;;  %v9342_v35 = vpop.f32.mrf.mxu0 }
 0x13a   : > { %v2396_v47 = vor.u32 %v2395_v60, %v2391_v44  ;;  %v2473_v54 = vor.u32 %v2472_v32, %v2468_v53  ;;  %v1841_v51 = vor.u32 %v1840_v28, %v1836_v56  ;;  %v1847_v8 = vrot.slane %v1845_v19, 1  ;;  %7293 = vmatpush3.bf16.msra.mxu1 %v7761_v49  ;;  %9835 = vst [vmem:[#allocation13_spill] sm:$0xff] %v9340_v33  ;;  %v7774_v19 = vld [vmem:[%s9814_s3 + $0x600] sm:$0xff]   ;;  %v9349_v32 = vpop.f32.mrf.mxu1 }
 0x13b   : > { %9836 = vst [vmem:[#allocation14_spill] sm:$0xff] %v9342_v35  ;;  %v2388_v50 = vrot.slane %v2386_v2, 1  ;;  %v2465_v3 = vrot.slane %v2463_v39, 1  ;;  %v6367_v44 = vcombine.low %v9257_v23, %v9280_v34  ;;  %v2398_v56 = vshrl.u32 %v6366_v36, 16  ;;  %7294 = vmatprep.subr.bf16.mxu1 %v7766_v55  ;;  %9837 = vst [vmem:[#allocation15_spill] sm:$0xff] %v9349_v32 }
 0x13c   : > { %v6477_v49 = vcombine.low %v2396_v47, %v2473_v54  ;;  %v1848_v53 = vor.u32 %v1847_v8, %v1843_v7  ;;  %v2405_v28 = vshrl.u32 %v1841_v51, 16  ;;  %v2407_v60 = vshll.u32 %v1841_v51, 16  ;;  %7233 = vmatpush3.bf16.msra.mxu0 %v7769_v30  ;;  %v9351_v4 = vpop.f32.mrf.mxu1  ;;  %v9353_v7 = vpop.f32.mrf.mxu0  ;;  %v6200_v51 = vld [vmem:[%s8894_s22 + $0x3c] sm:$0x1] }
 0x13d   : > { %v2389_v21 = vor.u32 %v2388_v50, %v2384_v42  ;;  %v2466_v35 = vor.u32 %v2465_v3, %v2461_v61  ;;  %v2400_v2 = vshll.u32 %v6366_v36, 16  ;;  %v2475_v39 = vshrl.u32 %v6367_v44, 16  ;;  %7234 = vmatprep.subr.bf16.mxu0 %v7772_v10  ;;  %9838 = vst [vmem:[#allocation16_spill] sm:$0xff] %v9351_v4  ;;  %9839 = vst [vmem:[#allocation17_spill] sm:$0xff] %v9353_v7  ;;  %v7781_v61 = vld [vmem:[%s9814_s3 + $0x680] sm:$0xff]  }
 0x13e   : > { %5473 = vmatprep.mubr.bf16.mxu0 %v6477_v49  ;;  %v2409_v23 = vrot.slane %v2407_v60, 1  ;;  %v2482_v34 = vshrl.u32 %v1848_v53, 16  ;;  %v2484_v43 = vshll.u32 %v1848_v53, 16  ;;  %v2477_v33 = vshll.u32 %v6367_v44, 16  ;;  %7295 = vmatpush3.bf16.msra.mxu1 %v7766_v55  ;;  %v9364_v8 = vpop.f32.mrf.mxu1  ;;  %v6208_v49 = vld [vmem:[%s8894_s22 + $0x38] sm:$0xe]  ;;  %v9372_v7 = vpop.f32.mrf.mxu0 }
 0x13f   : > { %v6476_v47 = vcombine.low %v2389_v21, %v2466_v35  ;;  %v2402_v30 = vrot.slane %v2400_v2, 1  ;;  %v6360_v42 = vcombine.low %v9332_v58, %v9332_v58  ;;  %v6361_v36 = vcombine.low %v9335_v14, %v9335_v14  ;;  %7296 = vmatprep.subr.bf16.mxu1 %v7773_v46  ;;  %9840 = vst [vmem:[#allocation18_spill] sm:$0xff] %v9364_v8 }
 0x140   : > { %v2410_v10 = vor.u32 %v2409_v23, %v2405_v28  ;;  %v2486_v55 = vrot.slane %v2484_v43, 1  ;;  %v2479_v54 = vrot.slane %v2477_v33, 1  ;;  %v1666_v21 = vshrl.u32 %v9094_v29, 16  ;;  %7235 = vmatpush3.bf16.msra.mxu0 %v7774_v19  ;;  %v6201_v28 = vld [vmem:[%s8894_s22 + $0x44] sm:$0x1]  ;;  %v9370_v23 = vpop.f32.mrf.mxu1  ;;  %9842 = vst [vmem:[#allocation20_spill] sm:$0xff] %v9372_v7  ;;  %v9379_v4 = vpop.f32.mrf.mxu0 }
 0x141   : > { %5474 = vmatmul.mubr.bf16.gmra.mxu0 %v6476_v47  ;;  %v2403_v35 = vor.u32 %v2402_v30, %v2398_v56  ;;  %v1746_v50 = vshrl.u32 %v6360_v42, 16  ;;  %v1749_v3 = vshll.u32 %v6360_v42, 16  ;;  %v1753_v44 = vshrl.u32 %v6361_v36, 16  ;;  %v6209_v33 = vld [vmem:[%s8894_s22 + $0x40] sm:$0xe]  ;;  %9841 = vst [vmem:[#allocation19_spill] sm:$0xff] %v9370_v23 }
 0x142   : > { %v2487_v53 = vor.u32 %v2486_v55, %v2482_v34  ;;  %v2480_v60 = vor.u32 %v2479_v54, %v2475_v39  ;;  %v1756_v2 = vshll.u32 %v6361_v36, 16  ;;  %v1668_v43 = vshll.u32 %v9094_v29, 16  ;;  %7297 = vmatpush3.bf16.msra.mxu1 %v7773_v46  ;;  %v9376_v36 = vpop.f32.mrf.mxu1  ;;  %9844 = vst [vmem:[#allocation22_spill] sm:$0xff] %v9379_v4 }
 0x143   : > { %v1748_v19 = vrot.slane %v1746_v50, 7  ;;  %v1755_v8 = vrot.slane %v1753_v44, 7  ;;  %v1673_v56 = vshrl.u32 %v9099_v13, 16  ;;  %v1675_v47 = vshll.u32 %v9099_v13, 16  ;;  %7298 = vmatprep.subr.bf16.mxu1 %v7781_v61  ;;  %9843 = vst [vmem:[#allocation21_spill] sm:$0xff] %v9376_v36 }
 0x144   : > { %v6479_v30 = vcombine.low %v2410_v10, %v2487_v53  ;;  %v6478_v34 = vcombine.low %v2403_v35, %v2480_v60  ;;  %v1670_v39 = vrot.slane %v1668_v43, 1  ;;  %v6376_v42 = vcombine.low %v6208_v49, %v6200_v51  ;;  %v9381_v13 = vpop.f32.mrf.mxu1 }
 0x145   : > { %v1751_v29 = vor.u32 %v1749_v3, %v1748_v19  ;;  %v1758_v55 = vor.u32 %v1756_v2, %v1755_v8  ;;  %v1677_v46 = vrot.slane %v1675_v47, 1  ;;  %v6377_v54 = vcombine.low %v6209_v33, %v6201_v28  ;;  %9845 = vst [vmem:[#allocation23_spill] sm:$0xff] %v9381_v13 }
 0x146   : > { %5538 = vmatprep.mubr.bf16.mxu1 %v6479_v30  ;;  %v1671_v23 = vor.u32 %v1670_v39, %v1666_v21  ;;  %v1850_v7 = vshrl.u32 %v6376_v42, 16  ;;  %v1852_v50 = vshll.u32 %v6376_v42, 16  ;;  %v6368_v44 = vcombine.low %v9332_v58, %v6200_v51  ;;  %7299 = vmatpush3.bf16.msra.mxu1 %v7781_v61  ;;  %v9383_v58 = vpop.f32.mrf.mxu1 }
 0x147   : > { %5539 = vmatmul.mubr.bf16.gmra.mxu1 %v6478_v34  ;;  %v2545_v10 = vshrl.u32 %v1751_v29, 16  ;;  %v2547_v35 = vshll.u32 %v1751_v29, 16  ;;  %v2622_v49 = vshrl.u32 %v1758_v55, 16  ;;  %v2624_v53 = vshll.u32 %v1758_v55, 16  ;;  %9846 = vst [vmem:[#allocation24_spill] sm:$0xff] %v9383_v58  ;;  %v9385_v34 = vpop.f32.mrf.mxu0 }
 0x148   : > { %v1678_v3 = vor.u32 %v1677_v46, %v1673_v56  ;;  %v2538_v8 = vshrl.u32 %v1671_v23, 16  ;;  %v2540_v60 = vshll.u32 %v1671_v23, 16  ;;  %v1854_v2 = vrot.slane %v1852_v50, 1  ;;  %9847 = vst [vmem:[#allocation25_spill] sm:$0xff] %v9385_v34  ;;  %v9392_v58 = vpop.f32.mrf.mxu1  ;;  %v9407_v34 = vld [vmem:[%s8894_s22 + $0x24] sm:$0x1] }
 0x149   : > { %v2549_v43 = vrot.slane %v2547_v35, 1  ;;  %v2626_v21 = vrot.slane %v2624_v53, 1  ;;  %v1857_v33 = vshrl.u32 %v6377_v54, 16  ;;  %v1859_v19 = vshll.u32 %v6377_v54, 16  ;;  %v6210_v35 = vld [vmem:[%s8894_s22 + $0x10] sm:$0xf]  ;;  %v9389_v54 = vpop.f32.mrf.mxu0 }
 0x14a   : > { %v2542_v61 = vrot.slane %v2540_v60, 1  ;;  %v2615_v51 = vshrl.u32 %v1678_v3, 16  ;;  %v2617_v47 = vshll.u32 %v1678_v3, 16  ;;  %v1855_v30 = vor.u32 %v1854_v2, %v1850_v7  ;;  %9848 = vst [vmem:[#allocation26_spill] sm:$0xff] %v9389_v54  ;;  %v6211_v2 = vld [vmem:[%s8894_s22 + $0x18] sm:$0xf] }
 0x14b   : > { %v2550_v39 = vor.u32 %v2549_v43, %v2545_v10  ;;  %v2627_v42 = vor.u32 %v2626_v21, %v2622_v49  ;;  %v1861_v56 = vrot.slane %v1859_v19, 1  ;;  %v6369_v23 = vcombine.low %v9335_v14, %v6201_v28  ;;  %9849 = vst [vmem:[#allocation27_spill] sm:$0xff] %v9392_v58 }
 0x14c   : > { %v2543_v29 = vor.u32 %v2542_v61, %v2538_v8  ;;  %v2619_v55 = vrot.slane %v2617_v47, 1  ;;  %v2559_v46 = vshrl.u32 %v1855_v30, 16  ;;  %v2561_v50 = vshll.u32 %v1855_v30, 16  ;;  %v9394_v8 = vpop.f32.mrf.mxu0  ;;  %v6218_v61 = vld [vmem:[%s8894_s22 + $0x14] sm:$0x1]  ;;  %v9397_v47 = vpop.f32.mrf.mxu1 }
 0x14d   : > { %v6504_v53 = vcombine.low %v2550_v39, %v2627_v42  ;;  %v1862_v60 = vor.u32 %v1861_v56, %v1857_v33  ;;  %v2552_v3 = vshrl.u32 %v6368_v44, 16  ;;  %v2554_v7 = vshll.u32 %v6368_v44, 16  ;;  %9850 = vst [vmem:[#allocation28_spill] sm:$0xff] %v9394_v8  ;;  %9851 = vst [vmem:[#allocation29_spill] sm:$0xff] %v9397_v47  ;;  %v6219_v42 = vld [vmem:[%s8894_s22 + $0x1c] sm:$0x1] }
 0x14e   : > { %v2620_v10 = vor.u32 %v2619_v55, %v2615_v51  ;;  %v2563_v49 = vrot.slane %v2561_v50, 1  ;;  %v2629_v14 = vshrl.u32 %v6369_v23, 16  ;;  %v2631_v28 = vshll.u32 %v6369_v23, 16  ;;  %v6226_v51 = vld [vmem:[%s8894_s22 + $0x10] sm:$0xe] }
 0x14f   : > { %5481 = vmatprep.mubr.bf16.mxu0 %v6504_v53  ;;  %v2636_v43 = vshrl.u32 %v1862_v60, 16  ;;  %v2638_v21 = vshll.u32 %v1862_v60, 16  ;;  %v2556_v19 = vrot.slane %v2554_v7, 1  ;;  %v6378_v33 = vcombine.low %v6210_v35, %v6210_v35  ;;  %v6227_v23 = vld [vmem:[%s8894_s22 + $0x18] sm:$0xe]  ;;  %v9402_v53 = vpop.f32.mrf.mxu0  ;;  %v9404_v60 = vpop.f32.mrf.mxu1 }
 0x150   : > { %v6503_v44 = vcombine.low %v2543_v29, %v2620_v10  ;;  %v2564_v30 = vor.u32 %v2563_v49, %v2559_v46  ;;  %v2633_v39 = vrot.slane %v2631_v28, 1  ;;  %v6379_v56 = vcombine.low %v6211_v2, %v6211_v2  ;;  %9852 = vst [vmem:[#allocation30_spill] sm:$0xff] %v9402_v53  ;;  %9853 = vst [vmem:[#allocation31_spill] sm:$0xff] %v9404_v60  ;;  %v6228_v53 = vld [vmem:[%s8894_s22 + $0x20] sm:$0xe] }
 0x151   : > { %v2640_v55 = vrot.slane %v2638_v21, 1  ;;  %v2557_v50 = vor.u32 %v2556_v19, %v2552_v3  ;;  %v1888_v58 = vshrl.u32 %v6378_v33, 16  ;;  %v1891_v8 = vshll.u32 %v6378_v33, 16  ;;  %v9410_v13 = vpop.f32.mrf.mxu1  ;;  %v6229_v60 = vld [vmem:[%s8894_s22 + $0x28] sm:$0xe] }
 0x152   : > { %5482 = vmatmul.mubr.bf16.gmra.mxu0 %v6503_v44  ;;  %v2634_v7 = vor.u32 %v2633_v39, %v2629_v14  ;;  %v1895_v47 = vshrl.u32 %v6379_v56, 16  ;;  %v1898_v29 = vshll.u32 %v6379_v56, 16  ;;  %v6386_v46 = vcombine.low %v6210_v35, %v6218_v61  ;;  %9854 = vst [vmem:[#allocation32_spill] sm:$0xff] %v9410_v13  ;;  %v6221_v35 = vld [vmem:[%s8894_s22 + $0x2c] sm:$0x1] }
 0x153   : > { %v2641_v10 = vor.u32 %v2640_v55, %v2636_v43  ;;  %v1890_v49 = vrot.slane %v1888_v58, 7  ;;  %v6387_v28 = vcombine.low %v6211_v2, %v6219_v42  ;;  %v6394_v3 = vcombine.low %v6226_v51, %v6218_v61  ;;  %v9414_v43 = vpop.f32.mrf.mxu0 }
 0x154   : > { %v6505_v21 = vcombine.low %v2557_v50, %v2634_v7  ;;  %v1897_v19 = vrot.slane %v1895_v47, 7  ;;  %v6395_v33 = vcombine.low %v6227_v23, %v6219_v42  ;;  %v2111_v54 = vshrl.u32 %v6386_v46, 16  ;;  %9855 = vst [vmem:[#allocation33_spill] sm:$0xff] %v9414_v43 }
 0x155   : > { %v6506_v44 = vcombine.low %v2564_v30, %v2641_v10  ;;  %v1893_v14 = vor.u32 %v1891_v8, %v1890_v49  ;;  %v2113_v39 = vshll.u32 %v6386_v46, 16  ;;  %v2188_v56 = vshrl.u32 %v6387_v28, 16  ;;  %v9416_v23 = vpop.f32.mrf.mxu0  ;;  %v9418_v10 = vpop.f32.mrf.mxu1 }
 0x156   : > { %v1900_v58 = vor.u32 %v1898_v29, %v1897_v19  ;;  %v2190_v2 = vshll.u32 %v6387_v28, 16  ;;  %v1992_v61 = vshrl.u32 %v6394_v3, 16  ;;  %v1994_v51 = vshll.u32 %v6394_v3, 16  ;;  %9856 = vst [vmem:[#allocation34_spill] sm:$0xff] %v9416_v23  ;;  %9857 = vst [vmem:[#allocation35_spill] sm:$0xff] %v9418_v10 }
 0x157   : > { %5546 = vmatprep.mubr.bf16.mxu1 %v6506_v44  ;;  %v2115_v47 = vrot.slane %v2113_v39, 1  ;;  %v2104_v42 = vshrl.u32 %v1893_v14, 16  ;;  %v2106_v55 = vshll.u32 %v1893_v14, 16  ;;  %v1999_v50 = vshrl.u32 %v6395_v33, 16  ;;  %v6212_v19 = vld [vmem:[%s8894_s22 + $0x20] sm:$0xf]  ;;  %v9423_v39 = vpop.f32.mrf.mxu0 }
 0x158   : > { %5547 = vmatmul.mubr.bf16.gmra.mxu1 %v6505_v21  ;;  %v2192_v8 = vrot.slane %v2190_v2, 1  ;;  %v2181_v30 = vshrl.u32 %v1900_v58, 16  ;;  %v2183_v7 = vshll.u32 %v1900_v58, 16  ;;  %v1996_v46 = vrot.slane %v1994_v51, 1  ;;  %v6213_v44 = vld [vmem:[%s8894_s22 + $0x28] sm:$0xf]  ;;  %v9425_v21 = vpop.f32.mrf.mxu1 }
 0x159   : > { %v2116_v29 = vor.u32 %v2115_v47, %v2111_v54  ;;  %v2108_v49 = vrot.slane %v2106_v55, 1  ;;  %v2001_v28 = vshll.u32 %v6395_v33, 16  ;;  %v6396_v3 = vcombine.low %v6228_v53, %v9407_v34  ;;  %9858 = vst [vmem:[#allocation36_spill] sm:$0xff] %v9423_v39 }
 0x15a   : > { %v2193_v14 = vor.u32 %v2192_v8, %v2188_v56  ;;  %v2185_v43 = vrot.slane %v2183_v7, 1  ;;  %v1997_v13 = vor.u32 %v1996_v46, %v1992_v61  ;;  %v6397_v23 = vcombine.low %v6229_v60, %v6221_v35  ;;  %v9427_v55 = vpop.f32.mrf.mxu1  ;;  %v9429_v56 = vpop.f32.mrf.mxu0 }
 0x15b   : > { %v2109_v2 = vor.u32 %v2108_v49, %v2104_v42  ;;  %v2003_v58 = vrot.slane %v2001_v28, 1  ;;  %v2006_v51 = vshrl.u32 %v6396_v3, 16  ;;  %v2008_v4 = vshll.u32 %v6396_v3, 16  ;;  %9859 = vst [vmem:[#allocation37_spill] sm:$0xff] %v9427_v55  ;;  %9860 = vst [vmem:[#allocation38_spill] sm:$0xff] %v9429_v56 }
 0x15c   : > { %v6427_v10 = vcombine.low %v2116_v29, %v2193_v14  ;;  %v2186_v54 = vor.u32 %v2185_v43, %v2181_v30  ;;  %v2118_v47 = vshrl.u32 %v1997_v13, 16  ;;  %v2120_v33 = vshll.u32 %v1997_v13, 16  ;;  %v9434_v14 = vpop.f32.mrf.mxu0 }
 0x15d   : > { %v2004_v53 = vor.u32 %v2003_v58, %v1999_v50  ;;  %v2010_v36 = vrot.slane %v2008_v4, 1  ;;  %v2013_v32 = vshrl.u32 %v6397_v23, 16  ;;  %v2015_v39 = vshll.u32 %v6397_v23, 16  ;;  %v9432_v50 = vpop.f32.mrf.mxu1  ;;  %9862 = vst [vmem:[#allocation40_spill] sm:$0xff] %v9434_v14  ;;  %v6231_v14 = vld [vmem:[%s8894_s22 + $0x38] sm:$0xe] }
 0x15e   : > { %5587 = vmatprep.mubr.bf16.mxu0 %v6427_v10  ;;  %v6426_v60 = vcombine.low %v2109_v2, %v2186_v54  ;;  %v2122_v61 = vrot.slane %v2120_v33, 1  ;;  %v6380_v8 = vcombine.low %v6212_v19, %v6212_v19  ;;  %v6381_v42 = vcombine.low %v6213_v44, %v6213_v44  ;;  %9861 = vst [vmem:[#allocation39_spill] sm:$0xff] %v9432_v50 }
 0x15f   : > { %v2195_v7 = vshrl.u32 %v2004_v53, 16  ;;  %v2197_v46 = vshll.u32 %v2004_v53, 16  ;;  %v2011_v49 = vor.u32 %v2010_v36, %v2006_v51  ;;  %v2017_v29 = vrot.slane %v2015_v39, 1  ;;  %v6215_v53 = vld [vmem:[%s8894_s22 + $0x38] sm:$0xf] }
 0x160   : > { %5588 = vmatmul.mubr.bf16.vlgmr.msra.gmra.mxu0 %v6426_v60  ;;  %v2123_v43 = vor.u32 %v2122_v61, %v2118_v47  ;;  %v6388_v13 = vcombine.low %v6212_v19, %v9407_v34  ;;  %v6389_v30 = vcombine.low %v6213_v44, %v6221_v35  ;;  %v1902_v4 = vshrl.u32 %v6380_v8, 16  ;;  %v6214_v35 = vld [vmem:[%s8894_s22 + $0x30] sm:$0xf]  ;;  %v9438_v60 = vpop.f32.mrf.mxu0  ;;  %v9440_v61 = vpop.f32.mrf.mxu1 }
 0x161   : > { %v2199_v23 = vrot.slane %v2197_v46, 1  ;;  %v2018_v28 = vor.u32 %v2017_v29, %v2013_v32  ;;  %v2272_v10 = vshrl.u32 %v2011_v49, 16  ;;  %v2274_v3 = vshll.u32 %v2011_v49, 16  ;;  %9863 = vst [vmem:[#allocation41_spill] sm:$0xff] %v9438_v60  ;;  %9864 = vst [vmem:[#allocation42_spill] sm:$0xff] %v9440_v61 }
 0x162   : > { %v2265_v2 = vshrl.u32 %v6388_v13, 16  ;;  %v2267_v58 = vshll.u32 %v6388_v13, 16  ;;  %v2342_v36 = vshrl.u32 %v6389_v30, 16  ;;  %v2344_v39 = vshll.u32 %v6389_v30, 16  ;;  %v6223_v60 = vld [vmem:[%s8894_s22 + $0x3c] sm:$0x1] }
 0x163   : > { %v2200_v51 = vor.u32 %v2199_v23, %v2195_v7  ;;  %v2276_v54 = vrot.slane %v2274_v3, 1  ;;  %v2349_v47 = vshrl.u32 %v2018_v28, 16  ;;  %v2351_v34 = vshll.u32 %v2018_v28, 16  ;;  %v6222_v3 = vld [vmem:[%s8894_s22 + $0x34] sm:$0x1] }
 0x164   : > { %v2269_v19 = vrot.slane %v2267_v58, 1  ;;  %v2346_v44 = vrot.slane %v2344_v39, 1  ;;  %v1904_v33 = vrot.slane %v1902_v4, 7  ;;  %v1905_v32 = vshll.u32 %v6380_v8, 16  ;;  %v6230_v58 = vld [vmem:[%s8894_s22 + $0x30] sm:$0xe]  ;;  %v9444_v39 = vpop.f32.mrf.mxu1 }
 0x165   : > { %v6428_v46 = vcombine.low %v2123_v43, %v2200_v51  ;;  %v2277_v49 = vor.u32 %v2276_v54, %v2272_v10  ;;  %v2353_v7 = vrot.slane %v2351_v34, 1  ;;  %v1909_v29 = vshrl.u32 %v6381_v42, 16  ;;  %9865 = vst [vmem:[#allocation43_spill] sm:$0xff] %v9444_v39  ;;  %v9448_v54 = vpop.f32.mrf.mxu0 }
 0x166   : > { %v2270_v13 = vor.u32 %v2269_v19, %v2265_v2  ;;  %v2347_v30 = vor.u32 %v2346_v44, %v2342_v36  ;;  %v1907_v23 = vor.u32 %v1905_v32, %v1904_v33  ;;  %v1912_v28 = vshll.u32 %v6381_v42, 16  ;;  %9866 = vst [vmem:[#allocation44_spill] sm:$0xff] %v9448_v54  ;;  %v9450_v19 = vpop.f32.mrf.mxu1 }
 0x167   : > { %7300 = vmatprep.mubr.bf16.mxu1 %v6428_v46  ;;  %v2354_v8 = vor.u32 %v2353_v7, %v2349_v47  ;;  %v1911_v4 = vrot.slane %v1909_v29, 7  ;;  %v6382_v50 = vcombine.low %v6214_v35, %v6214_v35  ;;  %v6383_v61 = vcombine.low %v6215_v53, %v6215_v53  ;;  %9867 = vst [vmem:[#allocation45_spill] sm:$0xff] %v9450_v19 }
 0x168   : > { %v6454_v55 = vcombine.low %v2270_v13, %v2347_v30  ;;  %v2258_v43 = vshrl.u32 %v1907_v23, 16  ;;  %v2260_v10 = vshll.u32 %v1907_v23, 16  ;;  %v6390_v51 = vcombine.low %v6214_v35, %v6222_v3  ;;  %v9453_v13 = vld [vmem:[%s8894_s22 + $0x44] sm:$0x1] }
 0x169   : > { %v6455_v2 = vcombine.low %v2277_v49, %v2354_v8  ;;  %v1914_v42 = vor.u32 %v1912_v28, %v1911_v4  ;;  %v6391_v36 = vcombine.low %v6215_v53, %v6223_v60  ;;  %v6398_v34 = vcombine.low %v6230_v58, %v6222_v3  ;;  %v9456_v28 = vld [vmem:[%s8894_s22 + $0x4c] sm:$0x1]  ;;  %v6232_v8 = vld [vmem:[%s8894_s22 + $0x40] sm:$0xe]  ;;  %v9461_v4 = vpop.f32.mrf.mxu1 }
 0x16a   : > { %5595 = vmatprep.mubr.bf16.mxu0 %v6454_v55  ;;  %v2262_v47 = vrot.slane %v2260_v10, 1  ;;  %v6399_v44 = vcombine.low %v6231_v14, %v6223_v60  ;;  %v2419_v33 = vshrl.u32 %v6390_v51, 16  ;;  %v2421_v32 = vshll.u32 %v6390_v51, 16  ;;  %v9458_v55 = vpop.f32.mrf.mxu0 }
 0x16b   : > { %7301 = vmatmul.mubr.bf16.vlgmr.msra.gmra.mxu1 %v6455_v2  ;;  %v2335_v46 = vshrl.u32 %v1914_v42, 16  ;;  %v2337_v7 = vshll.u32 %v1914_v42, 16  ;;  %v2496_v35 = vshrl.u32 %v6391_v36, 16  ;;  %v2498_v29 = vshll.u32 %v6391_v36, 16  ;;  %9868 = vst [vmem:[#allocation46_spill] sm:$0xff] %v9458_v55 }
 0x16c   : > { %v2263_v49 = vor.u32 %v2262_v47, %v2258_v43  ;;  %v2423_v53 = vrot.slane %v2421_v32, 1  ;;  %v1916_v30 = vshrl.u32 %v6382_v50, 16  ;;  %v1919_v23 = vshll.u32 %v6382_v50, 16  ;;  %v6233_v43 = vld [vmem:[%s8894_s22 + $0x48] sm:$0xe] }
 0x16d   : > { %v2339_v14 = vrot.slane %v2337_v7, 1  ;;  %v2500_v60 = vrot.slane %v2498_v29, 1  ;;  %v1923_v3 = vshrl.u32 %v6383_v61, 16  ;;  %v1926_v58 = vshll.u32 %v6383_v61, 16  ;;  %v9465_v29 = vpop.f32.mrf.mxu0 }
 0x16e   : > { %v2424_v10 = vor.u32 %v2423_v53, %v2419_v33  ;;  %v1918_v51 = vrot.slane %v1916_v30, 7  ;;  %v2020_v2 = vshrl.u32 %v6398_v34, 16  ;;  %v2022_v42 = vshll.u32 %v6398_v34, 16  ;;  %9869 = vst [vmem:[#allocation47_spill] sm:$0xff] %v9465_v29  ;;  %v9468_v53 = vpop.f32.mrf.mxu1 }
 0x16f   : > { %v2340_v36 = vor.u32 %v2339_v14, %v2335_v46  ;;  %v2501_v47 = vor.u32 %v2500_v60, %v2496_v35  ;;  %v1925_v32 = vrot.slane %v1923_v3, 7  ;;  %v2027_v50 = vshrl.u32 %v6399_v44, 16  ;;  %9870 = vst [vmem:[#allocation48_spill] sm:$0xff] %v9468_v53  ;;  %v9470_v14 = vpop.f32.mrf.mxu0 }
 0x170   : > { %v1921_v19 = vor.u32 %v1919_v23, %v1918_v51  ;;  %v2024_v54 = vrot.slane %v2022_v42, 1  ;;  %v2029_v39 = vshll.u32 %v6399_v44, 16  ;;  %v6400_v7 = vcombine.low %v6232_v8, %v9453_v13  ;;  %9871 = vst [vmem:[#allocation49_spill] sm:$0xff] %v9470_v14  ;;  %v6216_v51 = vld [vmem:[%s8894_s22 + $0x40] sm:$0xf] }
 0x171   : > { %v6453_v61 = vcombine.low %v2263_v49, %v2340_v36  ;;  %v6481_v55 = vcombine.low %v2424_v10, %v2501_v47  ;;  %v1928_v56 = vor.u32 %v1926_v58, %v1925_v32  ;;  %v6401_v33 = vcombine.low %v6233_v43, %v9456_v28 }
 0x172   : > { %v2412_v34 = vshrl.u32 %v1921_v19, 16  ;;  %v2414_v46 = vshll.u32 %v1921_v19, 16  ;;  %v2025_v35 = vor.u32 %v2024_v54, %v2020_v2  ;;  %v2031_v30 = vrot.slane %v2029_v39, 1  ;;  %v6217_v54 = vld [vmem:[%s8894_s22 + $0x48] sm:$0xf]  ;;  %v9474_v39 = vpop.f32.mrf.mxu1 }
 0x173   : > { %5596 = vmatmul.mubr.bf16.gmra.mxu0 %v6453_v61  ;;  %v2489_v44 = vshrl.u32 %v1928_v56, 16  ;;  %v2491_v23 = vshll.u32 %v1928_v56, 16  ;;  %v2034_v60 = vshrl.u32 %v6400_v7, 16  ;;  %v2036_v3 = vshll.u32 %v6400_v7, 16  ;;  %9872 = vst [vmem:[#allocation50_spill] sm:$0xff] %v9474_v39  ;;  %v9476_v56 = vpop.f32.mrf.mxu0 }
 0x174   : > { %5603 = vmatprep.mubr.bf16.mxu0 %v6481_v55  ;;  %v2416_v49 = vrot.slane %v2414_v46, 1  ;;  %v2032_v58 = vor.u32 %v2031_v30, %v2027_v50  ;;  %v2426_v8 = vshrl.u32 %v2025_v35, 16  ;;  %v2428_v10 = vshll.u32 %v2025_v35, 16  ;;  %v9479_v39 = vpop.f32.mrf.mxu1 }
 0x175   : > { %v2493_v42 = vrot.slane %v2491_v23, 1  ;;  %v2038_v43 = vrot.slane %v2036_v3, 1  ;;  %v2041_v36 = vshrl.u32 %v6401_v33, 16  ;;  %v2043_v19 = vshll.u32 %v6401_v33, 16 }
 0x176   : > { %v2417_v2 = vor.u32 %v2416_v49, %v2412_v34  ;;  %v2430_v47 = vrot.slane %v2428_v10, 1  ;;  %v2503_v32 = vshrl.u32 %v2032_v58, 16  ;;  %v2505_v61 = vshll.u32 %v2032_v58, 16 }
 0x177   : > { %v2494_v7 = vor.u32 %v2493_v42, %v2489_v44  ;;  %v2039_v55 = vor.u32 %v2038_v43, %v2034_v60  ;;  %v2045_v46 = vrot.slane %v2043_v19, 1  ;;  %v6384_v50 = vcombine.low %v6216_v51, %v6216_v51  ;;  %v9482_v44 = vpop.f32.mrf.mxu0 }
 0x178   : > { %v2431_v30 = vor.u32 %v2430_v47, %v2426_v8  ;;  %v2507_v35 = vrot.slane %v2505_v61, 1  ;;  %v6385_v53 = vcombine.low %v6217_v54, %v6217_v54  ;;  %v6392_v23 = vcombine.low %v6216_v51, %v9453_v13 }
 0x179   : > { %v6480_v3 = vcombine.low %v2417_v2, %v2494_v7  ;;  %v2046_v33 = vor.u32 %v2045_v46, %v2041_v36  ;;  %v2580_v14 = vshrl.u32 %v2039_v55, 16  ;;  %v2582_v29 = vshll.u32 %v2039_v55, 16 }
 0x17a   : > { %v2508_v34 = vor.u32 %v2507_v35, %v2503_v32  ;;  %v6393_v49 = vcombine.low %v6217_v54, %v9456_v28  ;;  %v2573_v58 = vshrl.u32 %v6392_v23, 16  ;;  %v2575_v10 = vshll.u32 %v6392_v23, 16  ;;  %v9484_v32 = vpop.f32.mrf.mxu1  ;;  %v9486_v35 = vpop.f32.mrf.mxu0 }
 0x17b   : > { %5604 = vmatmul.mubr.bf16.gmra.mxu0 %v6480_v3  ;;  %v2584_v60 = vrot.slane %v2582_v29, 1  ;;  %v2657_v8 = vshrl.u32 %v2046_v33, 16  ;;  %v2659_v42 = vshll.u32 %v2046_v33, 16  ;;  %v1930_v43 = vshrl.u32 %v6384_v50, 16 }
 0x17c   : > { %v6482_v19 = vcombine.low %v2431_v30, %v2508_v34  ;;  %v2577_v13 = vrot.slane %v2575_v10, 1  ;;  %v2650_v51 = vshrl.u32 %v6393_v49, 16  ;;  %v2652_v36 = vshll.u32 %v6393_v49, 16  ;;  %v9496_v49 = vpop.f32.mrf.mxu0 }
 0x17d   : > { %v2585_v2 = vor.u32 %v2584_v60, %v2580_v14  ;;  %v2661_v47 = vrot.slane %v2659_v42, 1  ;;  %v1932_v61 = vrot.slane %v1930_v43, 7  ;;  %v1933_v7 = vshll.u32 %v6384_v50, 16 }
 0x17e   : > { %7304 = vmatprep.mubr.bf16.mxu1 %v6482_v19  ;;  %v2578_v28 = vor.u32 %v2577_v13, %v2573_v58  ;;  %v2654_v54 = vrot.slane %v2652_v36, 1  ;;  %v1937_v55 = vshrl.u32 %v6385_v53, 16  ;;  %v1940_v46 = vshll.u32 %v6385_v53, 16  ;;  %v9513_v19 = vpop.f32.mrf.mxu0 }
 0x17f   : > { %v2662_v29 = vor.u32 %v2661_v47, %v2657_v8  ;;  %v1935_v23 = vor.u32 %v1933_v7, %v1932_v61  ;;  %v4899_v30 = vadd.f32 %v9116_v1, %v9148_v37  ;;  %v6779_v14 = vadd.f32 %v9135_v31, %v9128_v63  ;;  %v9500_v1 = vpop.f32.mrf.mxu1  ;;  %v9876_v61 = vld [vmem:[#allocation6_spill] sm:$0xff] }
 0x180   : > { %v2655_v3 = vor.u32 %v2654_v54, %v2650_v51  ;;  %v1939_v33 = vrot.slane %v1937_v55, 7  ;;  %v6819_v50 = vadd.f32 %v9160_v0, %v9142_v41  ;;  %v6838_v34 = vadd.f32 %v9153_v16, %v9144_v27  ;;  %v9873_v51 = vld [vmem:[#allocation7_spill] sm:$0xff]  ;;  %v9879_v54 = vld [vmem:[#allocation8_spill] sm:$0xff]  ;;  %v7006_v55 = vpop.f32.mrf.mxu0 }
 0x181   : > { %v6509_v53 = vcombine.low %v2585_v2, %v2662_v29  ;;  %v2566_v58 = vshrl.u32 %v1935_v23, 16  ;;  %v2568_v10 = vshll.u32 %v1935_v23, 16  ;;  %v6878_v60 = vadd.f32 %v9174_v40, %v9166_v18  ;;  %v9509_v42 = vpop.f32.mrf.mxu1  ;;  %v9874_v2 = vld [vmem:[#allocation2_spill] sm:$0xff]  ;;  %v9882_v23 = vld [vmem:[#allocation13_spill] sm:$0xff] }
 0x182   : > { %v6508_v37 = vcombine.low %v2578_v28, %v2655_v3  ;;  %v1942_v63 = vor.u32 %v1940_v46, %v1939_v33  ;;  %v4902_v31 = vadd.f32 %v6819_v50, %v6779_v14  ;;  %v4940_v8 = vadd.f32 %v6838_v34, %v8998_v59  ;;  %v9881_v46 = vld [vmem:[#allocation4_spill] sm:$0xff]  ;;  %v9883_v14 = vld [vmem:[#allocation15_spill] sm:$0xff] }
 0x183   : > { %7305 = vmatmul.mubr.bf16.gmra.mxu1 %v6509_v53  ;;  %v2570_v41 = vrot.slane %v2568_v10, 1  ;;  %v6841_v27 = vadd.f32 %v9168_v62, %v9162_v25  ;;  %v6881_v16 = vadd.f32 %v9209_v38, %v9188_v24  ;;  %v6844_v0 = vadd.f32 %v9203_v6, %v9190_v5  ;;  %v9528_v7 = vpop.f32.mrf.mxu1  ;;  %v9884_v33 = vld [vmem:[#allocation11_spill] sm:$0xff]  ;;  %v9885_v50 = vld [vmem:[#allocation12_spill] sm:$0xff] }
 0x184   : > { %5611 = vmatprep.mubr.bf16.mxu0 %v6508_v37  ;;  %v2643_v18 = vshrl.u32 %v1942_v63, 16  ;;  %v2645_v40 = vshll.u32 %v1942_v63, 16  ;;  %v5005_v43 = vadd.f32 %v6878_v60, %v4940_v8  ;;  %v6884_v59 = vadd.f32 %v9228_v12, %v9223_v57  ;;  %v9886_v60 = vld [vmem:[#allocation16_spill] sm:$0xff]  ;;  %v9887_v37 = vld [vmem:[#allocation18_spill] sm:$0xff] }
 0x185   : > { %v2571_v13 = vor.u32 %v2570_v41, %v2566_v58  ;;  %v4943_v25 = vadd.f32 %v6841_v27, %v9008_v45  ;;  %v4948_v62 = vadd.f32 %v6844_v0, %v9062_v26  ;;  %v6847_v24 = vadd.f32 %v9221_v20, %v9216_v15  ;;  %v9875_v45 = vld [vmem:[#allocation5_spill] sm:$0xff]  ;;  %v9877_v20 = vld [vmem:[#allocation3_spill] sm:$0xff]  ;;  %v9888_v41 = vld [vmem:[#allocation14_spill] sm:$0xff] }
 0x186   : > { %v2647_v5 = vrot.slane %v2645_v40, 1  ;;  %v6887_v6 = vadd.f32 %v9259_v11, %v9238_v9  ;;  %v6850_v38 = vadd.f32 %v9243_v52, %v9236_v48  ;;  %v6890_v57 = vadd.f32 %v9292_v17, %v9873_v51  ;;  %v9878_v9 = vld [vmem:[#allocation10_spill] sm:$0xff]  ;;  %v9880_v48 = vld [vmem:[#allocation9_spill] sm:$0xff]  ;;  %v9890_v0 = vld [vmem:[#allocation19_spill] sm:$0xff] }
 0x187   : > { %v5008_v12 = vadd.f32 %v6881_v16, %v4943_v25  ;;  %v5013_v36 = vadd.f32 %v6884_v59, %v4948_v62  ;;  %v4951_v47 = vadd.f32 %v6847_v24, %v9874_v2  ;;  %v6853_v26 = vadd.f32 %v9876_v61, %v9875_v45  ;;  %v9889_v27 = vld [vmem:[#allocation17_spill] sm:$0xff]  ;;  %v7046_v59 = vpop.f32.mrf.mxu1  ;;  %v9892_v62 = vld [vmem:[#allocation20_spill] sm:$0xff]  ;;  %v9893_v24 = vld [vmem:[#allocation22_spill] sm:$0xff]  ;;  %v7008_v2 = vpop.f32.mrf.mxu0 }
 0x188   : > { %v2648_v15 = vor.u32 %v2647_v5, %v2643_v18  ;;  %v4956_v28 = vadd.f32 %v6850_v38, %v9877_v20  ;;  %v6893_v11 = vadd.f32 %v9878_v9, %v9303_v22  ;;  %v6856_v52 = vadd.f32 %v9880_v48, %v9879_v54  ;;  %v9891_v18 = vld [vmem:[#allocation21_spill] sm:$0xff]  ;;  %v9897_v51 = vld [vmem:[#allocation26_spill] sm:$0xff]  ;;  %v9898_v45 = vld [vmem:[#allocation27_spill] sm:$0xff] }
 0x189   : > { %v5016_v17 = vadd.f32 %v6887_v6, %v4951_v47  ;;  %v4959_v29 = vadd.f32 %v6853_v26, %v9881_v46  ;;  %v6896_v3 = vadd.f32 %v9883_v14, %v9882_v23  ;;  %v6859_v34 = vadd.f32 %v9885_v50, %v9884_v33  ;;  %v9895_v6 = vld [vmem:[#allocation24_spill] sm:$0xff]  ;;  %v9896_v38 = vld [vmem:[#allocation25_spill] sm:$0xff]  ;;  %v9901_v20 = vld [vmem:[#allocation30_spill] sm:$0xff]  ;;  %v7009_v14 = vpop.f32.mrf.mxu0 }
 0x18a   : > { %v6507_v53 = vcombine.low %v2571_v13, %v2648_v15  ;;  %v5021_v58 = vadd.f32 %v6890_v57, %v4956_v28  ;;  %v4964_v10 = vadd.f32 %v6856_v52, %v4899_v30  ;;  %v6899_v63 = vadd.f32 %v9887_v37, %v9886_v60  ;;  %v9894_v13 = vld [vmem:[#allocation23_spill] sm:$0xff]  ;;  %v9899_v61 = vld [vmem:[#allocation29_spill] sm:$0xff]  ;;  %v9900_v15 = vld [vmem:[#allocation28_spill] sm:$0xff]  ;;  %v7048_v60 = vpop.f32.mrf.mxu1 }
 0x18b   : > { %v5024_v22 = vadd.f32 %v6893_v11, %v4959_v29  ;;  %v4967_v8 = vadd.f32 %v6859_v34, %v4902_v31  ;;  %v6918_v16 = vadd.f32 %v9889_v27, %v9888_v41  ;;  %v6958_v40 = vadd.f32 %v9891_v18, %v9890_v0  ;;  %v9902_v54 = vld [vmem:[#allocation31_spill] sm:$0xff]  ;;  %v9903_v48 = vld [vmem:[#allocation32_spill] sm:$0xff]  ;;  %v9904_v46 = vld [vmem:[#allocation33_spill] sm:$0xff] }
 0x18c   : > { %5612 = vmatmul.mubr.bf16.gmra.mxu0 %v6507_v53  ;;  %v5029_v25 = vadd.f32 %v6896_v3, %v4964_v10  ;;  %v6921_v5 = vadd.f32 %v9893_v24, %v9892_v62  ;;  %v6961_v30 = vadd.f32 %v9895_v6, %v9894_v13  ;;  %v6924_v57 = vadd.f32 %v9897_v51, %v9896_v38  ;;  %v9905_v29 = vld [vmem:[#allocation34_spill] sm:$0xff]  ;;  %v9906_v50 = vld [vmem:[#allocation35_spill] sm:$0xff]  ;;  %v9907_v34 = vld [vmem:[#allocation36_spill] sm:$0xff] }
 0x18d   : > { %v5032_v31 = vadd.f32 %v6899_v63, %v4967_v8  ;;  %v5070_v47 = vadd.f32 %v6918_v16, %v5005_v43  ;;  %v6964_v26 = vadd.f32 %v9899_v61, %v9898_v45  ;;  %v6927_v28 = vadd.f32 %v9901_v20, %v9900_v15  ;;  %v9908_v53 = vld [vmem:[#allocation38_spill] sm:$0xff]  ;;  %v9910_v8 = vld [vmem:[#allocation39_spill] sm:$0xff]  ;;  %v9911_v0 = vld [vmem:[#allocation40_spill] sm:$0xff] }
 0x18e   : > { %v5073_v9 = vadd.f32 %v6921_v5, %v5008_v12  ;;  %v5078_v11 = vadd.f32 %v6924_v57, %v5013_v36  ;;  %v6967_v52 = vadd.f32 %v9903_v48, %v9902_v54  ;;  %v6930_v23 = vadd.f32 %v9905_v29, %v9904_v46  ;;  %v9909_v36 = vld [vmem:[#allocation37_spill] sm:$0xff]  ;;  %v7011_v5 = vpop.f32.mrf.mxu0  ;;  %v9915_v6 = vld [vmem:[#allocation44_spill] sm:$0xff]  ;;  %v9916_v38 = vld [vmem:[#allocation46_spill] sm:$0xff] }
 0x18f   : > { %v5135_v3 = vadd.f32 %v6958_v40, %v5070_v47  ;;  %v5081_v33 = vadd.f32 %v6927_v28, %v5016_v17  ;;  %v6970_v43 = vadd.f32 %v9425_v21, %v9906_v50  ;;  %v6933_v10 = vadd.f32 %v9908_v53, %v9907_v34  ;;  %v9912_v18 = vld [vmem:[#allocation41_spill] sm:$0xff]  ;;  %v9913_v40 = vld [vmem:[#allocation42_spill] sm:$0xff]  ;;  %v9914_v17 = vld [vmem:[#allocation43_spill] sm:$0xff]  ;;  %v7049_v21 = vpop.f32.mrf.mxu1 }
 0x190   : > { %v5138_v37 = vadd.f32 %v6961_v30, %v5073_v9  ;;  %v5143_v63 = vadd.f32 %v6964_v26, %v5078_v11  ;;  %v5086_v12 = vadd.f32 %v6930_v23, %v5021_v58  ;;  %v6973_v41 = vadd.f32 %v9910_v8, %v9909_v36  ;;  %v9917_v30 = vld [vmem:[#allocation45_spill] sm:$0xff]  ;;  %v9918_v57 = vld [vmem:[#allocation47_spill] sm:$0xff]  ;;  %v9920_v26 = vld [vmem:[#allocation48_spill] sm:$0xff]  ;;  %v7012_v23 = vpop.f32.mrf.mxu0 }
 0x191   : > { %v5146_v27 = vadd.f32 %v6967_v52, %v5081_v33  ;;  %v5089_v16 = vadd.f32 %v6933_v10, %v5024_v22  ;;  %v6936_v62 = vadd.f32 %v9912_v18, %v9911_v0  ;;  %v6976_v24 = vadd.f32 %v9914_v17, %v9913_v40  ;;  %v9919_v47 = vld [vmem:[#allocation49_spill] sm:$0xff]  ;;  %v9921_v15 = vld [vmem:[#allocation50_spill] sm:$0xff]  ;;  %v7051_v9 = vpop.f32.mrf.mxu1 }
 0x192   : > { %v5151_v13 = vadd.f32 %v6970_v43, %v5086_v12  ;;  %v6939_v51 = vadd.f32 %v9916_v38, %v9915_v6  ;;  %v6979_v58 = vadd.f32 %v9461_v4, %v9917_v30  ;;  %v6998_v45 = vadd.f32 %v9919_v47, %v9918_v57  ;;  %v7803_v57 = vld [vmem:[%s9817_s6 + $0x20] sm:$0xff]  }
 0x193   : > { %v5154_v61 = vadd.f32 %v6973_v41, %v5089_v16  ;;  %v5094_v22 = vadd.f32 %v6936_v62, %v5029_v25  ;;  %v7038_v20 = vadd.f32 %v9921_v15, %v9920_v26  ;;  %v7001_v28 = vadd.f32 %v9482_v44, %v9476_v56  ;;  %v7052_v33 = vpop.f32.mrf.mxu1  ;;  %v7801_v41 = vld [vmem:[%s9817_s6 + $0x30] sm:$0xff]  }
 0x194   : > { %v5097_v11 = vadd.f32 %v6939_v51, %v5032_v31  ;;  %v5200_v54 = vadd.f32 %v6998_v45, %v5135_v3  ;;  %v7041_v48 = vadd.f32 %v9484_v32, %v9479_v39  ;;  %v7004_v4 = vadd.f32 %v9496_v49, %v9486_v35 }
 0x195   : > { %v5159_v52 = vadd.f32 %v6976_v24, %v5094_v22  ;;  %v5203_v46 = vadd.f32 %v7001_v28, %v5138_v37  ;;  %v7044_v25 = vadd.f32 %v9509_v42, %v9500_v1  ;;  %v7007_v29 = vadd.f32 %v7006_v55, %v9513_v19  ;;  %v7014_v55 = vpop.f32.mrf.mxu0 }
 0x196   : > { %v5162_v50 = vadd.f32 %v6979_v58, %v5097_v11  ;;  %v9587_v56 = vadd.f32 %v7038_v20, %v5200_v54  ;;  %v5208_v44 = vadd.f32 %v7004_v4, %v5143_v63  ;;  %v7047_v31 = vadd.f32 %v7046_v59, %v9528_v7  ;;  %v7054_v63 = vpop.f32.mrf.mxu1  ;;  %v7800_v7 = vld [vmem:[%s9817_s6 + $0x38] sm:$0xff]  }
 0x197   : > { %v9590_v3 = vadd.f32 %v7041_v48, %v5203_v46  ;;  %v5211_v39 = vadd.f32 %v7007_v29, %v5146_v27  ;;  %v7010_v32 = vadd.f32 %v7009_v14, %v7008_v2  ;;  %v7050_v35 = vadd.f32 %v7049_v21, %v7048_v60  ;;  %v7015_v37 = vpop.f32.mrf.mxu0  ;;  %7308 = vmatprep.subr.bf16.mxu0 %v7800_v7  ;;  %v7802_v21 = vld [vmem:[%s9817_s6 + $0x28] sm:$0xff]   ;;  %v7804_v11 = vld [vmem:[%s9817_s6 + $0x18] sm:$0xff]  }
 0x198   : > { %v5273_v49 = vadd.f32 %v7044_v25, %v5208_v44  ;;  %v7013_v43 = vadd.f32 %v7012_v23, %v7011_v5  ;;  %v7053_v34 = vadd.f32 %v7052_v33, %v7051_v9  ;;  %v7016_v59 = vadd.f32 %v7015_v37, %v7014_v55  ;;  %v7055_v14 = vpop.f32.mrf.mxu1  ;;  %7332 = vmatprep.subr.bf16.mxu1 %v7800_v7  ;;  %v7805_v23 = vld [vmem:[%s9817_s6 + $0x10] sm:$0xff]   ;;  %v7806_v44 = vld [vmem:[%s9817_s6 + $0x8] sm:$0xff]  }
 0x199   : > { %v9592_v53 = vadd.f32 %v7047_v31, %v5211_v39  ;;  %v5216_v1 = vadd.f32 %v7010_v32, %v5151_v13  ;;  %v7017_v2 = vpop.f32.mrf.mxu0  ;;  %v7056_v12 = vadd.f32 %v7055_v14, %v7054_v63  ;;  %7309 = vmatpush3.bf16.msra.mxu0 %v7800_v7  ;;  %7340 = vmatpush3.bf16.msra.mxu1 %v7800_v7 }
 0x19a   : > { %v5219_v42 = vadd.f32 %v7013_v43, %v5154_v61  ;;  %v5224_v60 = vadd.f32 %v7016_v59, %v5159_v52  ;;  %v7057_v8 = vpop.f32.mrf.mxu1  ;;  %7310 = vmatprep.subr.bf16.mxu0 %v7801_v41  ;;  %7333 = vmatprep.subr.bf16.mxu1 %v7801_v41 }
 0x19b   : > { %v9594_v19 = vadd.f32 %v7050_v35, %v5216_v1  ;;  %v7018_v36 = vpop.f32.mrf.mxu0  ;;  %v7807_v35 = vld [vmem:[%s9817_s6] sm:$0xff]  }
 0x19c   : > { %v9596_v10 = vadd.f32 %v7053_v34, %v5219_v42  ;;  %v9604_v27 = vadd.f32 %v7056_v12, %v5224_v60  ;;  %v7019_v16 = vadd.f32 %v7018_v36, %v7017_v2  ;;  %v7058_v0 = vpop.f32.mrf.mxu1 }
 0x19d   : > { %v9606_v18 = vpop.f32.mrf.mxu0  ;;  %v7059_v40 = vadd.f32 %v7058_v0, %v7057_v8  ;;  %7311 = vmatpush3.bf16.msra.mxu0 %v7801_v41  ;;  %7341 = vmatpush3.bf16.msra.mxu1 %v7801_v41 }
 0x19e   : > { %v5227_v62 = vadd.f32 %v7019_v16, %v5162_v50  ;;  %7312 = vmatprep.subr.bf16.mxu0 %v7802_v21  ;;  %7334 = vmatprep.subr.bf16.mxu1 %v7802_v21  ;;  %v9619_v6 = vpop.f32.mrf.mxu1 }
 0x19f   : > { %v9608_v17 = vpop.f32.mrf.mxu0 }
 0x1a0   : > { %v9610_v24 = vadd.f32 %v7059_v40, %v5227_v62  ;;  %v9621_v51 = vpop.f32.mrf.mxu1 }
 0x1a1   : > { %v9612_v5 = vpop.f32.mrf.mxu0  ;;  %7313 = vmatpush3.bf16.msra.mxu0 %v7802_v21  ;;  %7342 = vmatpush3.bf16.msra.mxu1 %v7802_v21 }
 0x1a2   : > { %v9626_v47 = vpop.f32.mrf.mxu1  ;;  %7314 = vmatprep.subr.bf16.mxu0 %v7803_v57  ;;  %7335 = vmatprep.subr.bf16.mxu1 %v7803_v57 }
 0x1a3   : > { %v9617_v13 = vpop.f32.mrf.mxu0 }
 0x1a4   : > { %v9630_v22 = vpop.f32.mrf.mxu1 }
 0x1a5   : > { %v7082_v38 = vpop.f32.mrf.mxu0  ;;  %7315 = vmatpush3.bf16.msra.mxu0 %v7803_v57  ;;  %7343 = vmatpush3.bf16.msra.mxu1 %v7803_v57 }
 0x1a6   : > { %7316 = vmatprep.subr.bf16.mxu0 %v7804_v11  ;;  %7336 = vmatprep.subr.bf16.mxu1 %v7804_v11 }
 0x1a7   : > { %v7083_v30 = vpop.f32.mrf.mxu0 }
 0x1a8   : > { %v7084_v58 = vadd.f32 %v7083_v30, %v7082_v38 }
 0x1a9   : > { %v9628_v61 = vpop.f32.mrf.mxu0  ;;  %7317 = vmatpush3.bf16.msra.mxu0 %v7804_v11  ;;  %7344 = vmatpush3.bf16.msra.mxu1 %v7804_v11 }
 0x1aa   : > { %v5338_v45 = vadd.f32 %v7084_v58, %v5273_v49  ;;  %7318 = vmatprep.subr.bf16.mxu0 %v7805_v23  ;;  %7337 = vmatprep.subr.bf16.mxu1 %v7805_v23 }
 0x1ab   : > { %v9632_v26 = vpop.f32.mrf.mxu0 }
 0x1ad   : > { %7319 = vmatpush3.bf16.msra.mxu0 %v7805_v23  ;;  %7345 = vmatpush3.bf16.msra.mxu1 %v7805_v23 }
 0x1ae   : > { %7320 = vmatprep.subr.bf16.mxu0 %v7806_v44  ;;  %7338 = vmatprep.subr.bf16.mxu1 %v7806_v44 }
 0x1b1   : > { %7321 = vmatpush3.bf16.msra.mxu0 %v7806_v44  ;;  %7346 = vmatpush3.bf16.msra.mxu1 %v7806_v44 }
 0x1b2   : > { %7322 = vmatprep.subr.bf16.mxu0 %v7807_v35  ;;  %7339 = vmatprep.subr.bf16.mxu1 %v7807_v35 }
 0x1b5   : > { %7323 = vmatpush3.bf16.msra.mxu0 %v7807_v35  ;;  %7347 = vmatpush3.bf16.msra.mxu1 %v7807_v35 }
 0x1bf   : > { %v7122_v15 = vpop.f32.mrf.mxu1 }
 0x1c1   : > { %v7088_v20 = vpop.f32.mrf.mxu0  ;;  %v7123_v28 = vpop.f32.mrf.mxu1 }
 0x1c2   : > { %v7124_v54 = vadd.f32 %v7123_v28, %v7122_v15 }
 0x1c3   : > { %v7089_v9 = vpop.f32.mrf.mxu0  ;;  %v9640_v25 = vpop.f32.mrf.mxu1 }
 0x1c4   : > { %v7090_v48 = vadd.f32 %v7089_v9, %v7088_v20  ;;  %v9637_v52 = vadd.f32 %v7124_v54, %v5338_v45 }
 0x1c5   : > { %v7091_v4 = vpop.f32.mrf.mxu0  ;;  %v9649_v31 = vpop.f32.mrf.mxu1 }
 0x1c6   : > { %v5346_v46 = vadd.f32 %v7090_v48, %v9594_v19 }
 0x1c7   : > { %v7092_v29 = vpop.f32.mrf.mxu0 }
 0x1c8   : > { %v7093_v33 = vadd.f32 %v7092_v29, %v7091_v4 }
 0x1ca   : > { %v5349_v50 = vadd.f32 %v7093_v33, %v9596_v10 }
 0x1cb   : > { %v7128_v39 = vpop.f32.mrf.mxu1  ;;  %v7094_v32 = vpop.f32.mrf.mxu0 }
 0x1cd   : > { %v7129_v49 = vpop.f32.mrf.mxu1  ;;  %v7095_v43 = vpop.f32.mrf.mxu0 }
 0x1ce   : > { %v7130_v34 = vadd.f32 %v7129_v49, %v7128_v39  ;;  %v7096_v1 = vadd.f32 %v7095_v43, %v7094_v32  ;;  %v7078_v43 = vadd.f32 %v9608_v17, %v9606_v18  ;;  %v7121_v18 = vadd.f32 %v9630_v22, %v9626_v47 }
 0x1cf   : > { %v7131_v42 = vpop.f32.mrf.mxu1  ;;  %v7097_v19 = vpop.f32.mrf.mxu0  ;;  %v7087_v47 = vadd.f32 %v9632_v26, %v9628_v61  ;;  %v9722_v26 = vld [vmem:[%s9816_s5] ss:$0 sm:$0xff] }
 0x1d0   : > { %v9654_v55 = vadd.f32 %v7130_v34, %v5346_v46  ;;  %v5354_v10 = vadd.f32 %v7096_v1, %v9604_v27 }
 0x1d1   : > { %v7132_v37 = vpop.f32.mrf.mxu1  ;;  %v7098_v63 = vpop.f32.mrf.mxu0 }
 0x1d2   : > { %v7133_v7 = vadd.f32 %v7132_v37, %v7131_v42  ;;  %v7099_v59 = vadd.f32 %v7098_v63, %v7097_v19  ;;  %v5330_v42 = vadd.f32 %v7078_v43, %v9587_v56  ;;  %v7118_v19 = vadd.f32 %v9621_v51, %v9619_v6 }
 0x1d4   : > { %v9657_v2 = vadd.f32 %v7133_v7, %v5349_v50  ;;  %v5357_v14 = vadd.f32 %v7099_v59, %v9610_v24  ;;  %v5395_v59 = vadd.f32 %v7118_v19, %v5330_v42 }
 0x1d9   : > { %v7134_v60 = vpop.f32.mrf.mxu1 }
 0x1db   : > { %v7135_v12 = vpop.f32.mrf.mxu1 }
 0x1dc   : > { %v7136_v36 = vadd.f32 %v7135_v12, %v7134_v60 }
 0x1dd   : > { %v7137_v8 = vpop.f32.mrf.mxu1 }
 0x1de   : > { %v9660_v41 = vadd.f32 %v7136_v36, %v5354_v10  ;;  %v7081_v10 = vadd.f32 %v9617_v13, %v9612_v5 }
 0x1df   : > { %v7138_v16 = vpop.f32.mrf.mxu1 }
 0x1e0   : > { %v7139_v0 = vadd.f32 %v7138_v16, %v7137_v8 }
 0x1e1   : > { %v7156_v40 = vpop.f32.mrf.mxu0 }
 0x1e2   : > { %v9662_v62 = vadd.f32 %v7139_v0, %v5357_v14  ;;  %v5333_v14 = vadd.f32 %v7081_v10, %v9590_v3 }
 0x1e3   : > { %v7157_v27 = vpop.f32.mrf.mxu0 }
 0x1e4   : > { %v7158_v37 = vadd.f32 %v7157_v27, %v7156_v40  ;;  %v5398_v6 = vadd.f32 %v7121_v18, %v5333_v14 }
 0x1e5   : > { %v7159_v21 = vpop.f32.mrf.mxu0 }
 0x1e6   : > { %v5460_v60 = vadd.f32 %v7158_v37, %v5395_v59 }
 0x1e7   : > { %v7160_v30 = vpop.f32.mrf.mxu0 }
 0x1e8   : > { %v7161_v56 = vadd.f32 %v7160_v30, %v7159_v21  ;;  %v9713_v21 = vld [vmem:[%s9815_s4] ss:$0 sm:$0xff] }
 0x1e9   : > { %v7196_v38 = vpop.f32.mrf.mxu1 }
 0x1ea   : > { %v5463_v16 = vadd.f32 %v7161_v56, %v5398_v6 }
 0x1eb   : > { %v7197_v58 = vpop.f32.mrf.mxu1 }
 0x1ec   : > { %v7198_v12 = vadd.f32 %v7197_v58, %v7196_v38 }
 0x1ed   : > { %v7199_v45 = vpop.f32.mrf.mxu1 }
 0x1ee   : > { %v5525_v13 = vadd.f32 %v7198_v12, %v5460_v60 }
 0x1ef   : > { %v7200_v24 = vpop.f32.mrf.mxu1 }
 0x1f0   : > { %v7162_v57 = vpop.f32.mrf.mxu0  ;;  %v7201_v0 = vadd.f32 %v7200_v24, %v7199_v45  ;;  %v5341_v45 = vadd.f32 %v7087_v47, %v9592_v53  ;;  %v7127_v24 = vadd.f32 %v9649_v31, %v9640_v25 }
 0x1f2   : > { %v7163_v15 = vpop.f32.mrf.mxu0  ;;  %v5528_v43 = vadd.f32 %v7201_v0, %v5463_v16  ;;  %v5406_v59 = vadd.f32 %v7127_v24, %v5341_v45 }
 0x1f3   : > { %v7164_v30 = vadd.f32 %v7163_v15, %v7162_v57 }
 0x1f4   : > { %v7165_v20 = vpop.f32.mrf.mxu0 }
 0x1f6   : > { %v7166_v9 = vpop.f32.mrf.mxu0 }
 0x1f7   : > { %v7167_v61 = vadd.f32 %v7166_v9, %v7165_v20 }
 0x1f8   : > { %v7202_v28 = vpop.f32.mrf.mxu1 }
 0x1f9   : > { %v5471_v31 = vadd.f32 %v7167_v61, %v5406_v59 }
 0x1fa   : > { %v7203_v11 = vpop.f32.mrf.mxu1 }
 0x1fb   : > { %v7204_v57 = vadd.f32 %v7203_v11, %v7202_v28 }
 0x1fc   : > { %v9666_v48 = vpop.f32.mrf.mxu1 }
 0x1fe   : > { %v7206_v46 = vpop.f32.mrf.mxu1 }
 0x1ff   : > { %v7207_v20 = vadd.f32 %v7206_v46, %v9666_v48 }
 0x201   : > { %v9664_v54 = vpop.f32.mrf.mxu0  ;;  %v5536_v6 = vadd.f32 %v7207_v20, %v5471_v31 }
 0x203   : > { %v9668_v4 = vpop.f32.mrf.mxu0 }
 0x205   : > { %v9670_v29 = vpop.f32.mrf.mxu0 }
 0x207   : > { %v9672_v23 = vpop.f32.mrf.mxu1  ;;  %v9674_v33 = vpop.f32.mrf.mxu0 }
 0x208   : > { %v7173_v16 = vadd.f32 %v9674_v33, %v9670_v29 }
 0x209   : > { %v9676_v50 = vpop.f32.mrf.mxu1 }
 0x20a   : > { %v7210_v46 = vadd.f32 %v9676_v50, %v9672_v23 }
 0x20b   : > { %v9682_v32 = vpop.f32.mrf.mxu1 }
 0x20d   : > { %v9686_v49 = vpop.f32.mrf.mxu1 }
 0x20e   : > { %v7213_v29 = vadd.f32 %v9686_v49, %v9682_v32 }
 0x212   : > { %v9678_v44 = vpop.f32.mrf.mxu0 }
 0x214   : > { %v9680_v39 = vpop.f32.mrf.mxu0 }
 0x215   : > { %v7176_v32 = vadd.f32 %v9680_v39, %v9678_v44 }
 0x216   : > { %v9684_v35 = vpop.f32.mrf.mxu0 }
 0x217   : > { %v5484_v59 = vadd.f32 %v7176_v32, %v9660_v41 }
 0x218   : > { %v9690_v34 = vpop.f32.mrf.mxu0  ;;  %v9692_v1 = vpop.f32.mrf.mxu1 }
 0x21a   : > { %v9699_v7 = vpop.f32.mrf.mxu1 }
 0x21c   : > { %v9704_v8 = vpop.f32.mrf.mxu1 }
 0x21e   : > { %v9706_v40 = vpop.f32.mrf.mxu1 }
 0x21f   : > { %v7219_v41 = vadd.f32 %v9706_v40, %v9704_v8 }
 0x220   : > { %v7236_v63 = vpop.f32.mrf.mxu0 }
 0x222   : > { %v7237_v17 = vpop.f32.mrf.mxu0 }
 0x223   : > { %v7238_v51 = vadd.f32 %v7237_v17, %v7236_v63  ;;  %v5468_v63 = vadd.f32 %v7164_v30, %v9637_v52  ;;  %v7170_v52 = vadd.f32 %v9668_v4, %v9664_v54 }
 0x224   : > { %v7239_v36 = vpop.f32.mrf.mxu0 }
 0x225   : > { %v5590_v3 = vadd.f32 %v7238_v51, %v5525_v13  ;;  %v5533_v17 = vadd.f32 %v7204_v57, %v5468_v63  ;;  %v5476_v48 = vadd.f32 %v7170_v52, %v9654_v55 }
 0x226   : > { %v7240_v5 = vpop.f32.mrf.mxu0 }
 0x227   : > { %v7241_v27 = vadd.f32 %v7240_v5, %v7239_v36 }
 0x229   : > { %v5593_v42 = vadd.f32 %v7241_v27, %v5528_v43 }
 0x22b   : > { %v7302_v22 = vpop.f32.mrf.mxu1 }
 0x22d   : > { %v5654_v38 = vpop.f32.mrf.mxu1 }
 0x22e   : > { %v5655_v58 = vadd.f32 %v5654_v38, %v5590_v3  ;;  %v5541_v38 = vadd.f32 %v7210_v46, %v5476_v48  ;;  %v5888_v48 = vld [vmem:[%s9770_s25 + $0x10] sm:$0xff] }
 0x22f   : > { %v7303_v19 = vpop.f32.mrf.mxu1 }
 0x230   : > { %v5692_v10 = vmul.f32 %v9713_v21, %v5655_v58 }
 0x231   : > { %v5657_v37 = vpop.f32.mrf.mxu1 }
 0x232   : > { %v5658_v15 = vadd.f32 %v5657_v37, %v5593_v42  ;;  %v5707_v53 = vadd.f32 %v9722_v26, %v5692_v10 }
 0x233   : > { %v7242_v14 = vpop.f32.mrf.mxu0 }
 0x234   : > { %v5693_v25 = vmul.f32 %v9713_v21, %v5658_v15  ;;  %v5715_v28 = vmax.f32 %v5707_v53, 0.0  ;;  %v7179_v53 = vadd.f32 %v9690_v34, %v9684_v35 }
 0x235   : > { %v7243_v18 = vpop.f32.mrf.mxu0 }
 0x236   : > { %v7244_v9 = vadd.f32 %v7243_v18, %v7242_v14  ;;  %v5708_v60 = vadd.f32 %v9722_v26, %v5693_v25  ;;  %v7216_v14 = vadd.f32 %v9699_v7, %v9692_v1  ;;  %v5487_v20 = vadd.f32 %v7179_v53, %v9662_v62 }
 0x237   : > { %v7245_v12 = vpop.f32.mrf.mxu0 }
 0x238   : > { %v5598_v11 = vadd.f32 %v7244_v9, %v5533_v17  ;;  %v5716_v56 = vmax.f32 %v5708_v60, 0.0  ;;  %v5549_v17 = vadd.f32 %v7216_v14, %v5484_v59  ;;  %v5552_v52 = vadd.f32 %v7219_v41, %v5487_v20  ;;  %v5891_v20 = vld [vmem:[%s9770_s25 + $0x28] sm:$0xff] }
 0x239   : > { %v7246_v36 = vpop.f32.mrf.mxu0 }
 0x23a   : > { %v5663_v51 = vadd.f32 %v7302_v22, %v5598_v11  ;;  %v7247_v5 = vadd.f32 %v7246_v36, %v7245_v12  ;;  %v5723_v13 = vpack.c.bf16 %v5716_v56, %v5715_v28  ;;  %v5479_v22 = vadd.f32 %v7173_v16, %v9657_v2  ;;  %v6736_v16 = vld [vmem:[%s9818_s7] ss:$0 sm:$0xff] }
 0x23b   : > { %v7248_v0 = vpop.f32.mrf.mxu0 }
 0x23c   : > { %v5694_v27 = vmul.f32 %v9713_v21, %v5663_v51  ;;  %v5601_v54 = vadd.f32 %v7247_v5, %v5536_v6  ;;  %7324 = vmatprep.mubr.bf16.mxu0 %v5723_v13  ;;  %v5544_v45 = vadd.f32 %v7213_v29, %v5479_v22 }
 0x23d   : > { %v7249_v4 = vpop.f32.mrf.mxu0 }
 0x23e   : > { %v5666_v3 = vadd.f32 %v7303_v19, %v5601_v54  ;;  %v7250_v47 = vadd.f32 %v7249_v4, %v7248_v0  ;;  %v5709_v33 = vadd.f32 %v9722_v26, %v5694_v27  ;;  %v5886_v4 = vld [vmem:[%s9770_s25] sm:$0xff] }
 0x23f   : > { %v7251_v43 = vpop.f32.mrf.mxu0 }
 0x240   : > { %v5695_v55 = vmul.f32 %v9713_v21, %v5666_v3  ;;  %v5606_v58 = vadd.f32 %v7250_v47, %v5541_v38  ;;  %v5717_v24 = vmax.f32 %v5709_v33, 0.0  ;;  %v5889_v38 = vld [vmem:[%s9770_s25 + $0x18] sm:$0xff] }
 0x241   : > { %v7252_v30 = vpop.f32.mrf.mxu0 }
 0x242   : > { %v5710_v23 = vadd.f32 %v9722_v26, %v5695_v55  ;;  %v7253_v50 = vadd.f32 %v7252_v30, %v7251_v43 }
 0x243   : > { %v7306_v42 = vpop.f32.mrf.mxu1 }
 0x244   : > { %v5718_v19 = vmax.f32 %v5710_v23, 0.0  ;;  %v5609_v37 = vadd.f32 %v7253_v50, %v5544_v45  ;;  %v5887_v50 = vld [vmem:[%s9770_s25 + $0x8] sm:$0xff] }
 0x245   : > { %v5670_v10 = vpop.f32.mrf.mxu1 }
 0x246   : > { %v5724_v2 = vpack.c.bf16 %v5718_v19, %v5717_v24  ;;  %v5671_v61 = vadd.f32 %v5670_v10, %v5606_v58 }
 0x247   : > { %v7307_v49 = vpop.f32.mrf.mxu1 }
 0x248   : > { %v5696_v63 = vmul.f32 %v9713_v21, %v5671_v61  ;;  %7325 = vmatmul.mubr.bf16.vlgmr.msra.gmra.mxu0 %v5724_v2 }
 0x249   : > { %v5673_v57 = vpop.f32.mrf.mxu1 }
 0x24a   : > { %v5674_v15 = vadd.f32 %v5673_v57, %v5609_v37  ;;  %v5711_v25 = vadd.f32 %v9722_v26, %v5696_v63  ;;  %v5892_v37 = vld [vmem:[%s9770_s25 + $0x30] sm:$0xff]  ;;  %v5890_v57 = vld [vmem:[%s9770_s25 + $0x20] sm:$0xff] }
 0x24c   : > { %v7254_v31 = vpop.f32.mrf.mxu0  ;;  %v5697_v18 = vmul.f32 %v9713_v21, %v5674_v15  ;;  %v5719_v60 = vmax.f32 %v5711_v25, 0.0  ;;  %v5893_v25 = vld [vmem:[%s9770_s25 + $0x38] sm:$0xff] }
 0x24e   : > { %v7255_v44 = vpop.f32.mrf.mxu0  ;;  %v5712_v39 = vadd.f32 %v9722_v26, %v5697_v18 }
 0x24f   : > { %v7256_v9 = vadd.f32 %v7255_v44, %v7254_v31 }
 0x250   : > { %v5720_v1 = vmax.f32 %v5712_v39, 0.0  ;;  %v7257_v7 = vpop.f32.mrf.mxu0 }
 0x251   : > { %v5614_v12 = vadd.f32 %v7256_v9, %v5549_v17 }
 0x252   : > { %v7258_v35 = vpop.f32.mrf.mxu0  ;;  %v5725_v34 = vpack.c.bf16 %v5720_v1, %v5719_v60 }
 0x253   : > { %v5679_v28 = vadd.f32 %v7306_v42, %v5614_v12  ;;  %v7259_v11 = vadd.f32 %v7258_v35, %v7257_v7 }
 0x254   : > { %7328 = vmatprep.mubr.bf16.mxu1 %v5725_v34 }
 0x255   : > { %v5698_v56 = vmul.f32 %v9713_v21, %v5679_v28  ;;  %v5617_v62 = vadd.f32 %v7259_v11, %v5552_v52 }
 0x257   : > { %v5682_v36 = vadd.f32 %v7307_v49, %v5617_v62  ;;  %v5713_v8 = vadd.f32 %v9722_v26, %v5698_v56 }
 0x259   : > { %v5699_v40 = vmul.f32 %v9713_v21, %v5682_v36  ;;  %v5721_v51 = vmax.f32 %v5713_v8, 0.0 }
 0x25b   : > { %v5714_v6 = vadd.f32 %v9722_v26, %v5699_v40  ;;  %v6737_v26 = vld [vmem:[%s9819_s8] ss:$0 sm:$0xff] }
 0x25d   : > { %v5722_v5 = vmax.f32 %v5714_v6, 0.0 }
 0x25f   : > { %v5726_v13 = vpack.c.bf16 %v5722_v5, %v5721_v51 }
 0x261   : > { %7329 = vmatmul.mubr.bf16.vlgmr.msra.gmra.mxu1 %v5726_v13 }
 0x308   : > { %v7326_v21 = vpop.f32.mrf.mxu0 }
 0x309   : > { %v5865_v0 = vmul.f32 %v7326_v21, %v6736_v16 }
 0x30a   : > { %v5825_v46 = vpop.f32.mrf.mxu0 }
 0x30b   : > { %v5880_v27 = vadd.f32 %v6737_v26, %v5865_v0  ;;  %v5863_v54 = vmul.f32 %v6736_v16, %v5825_v46 }
 0x30c   : > { %v7327_v3 = vpop.f32.mrf.mxu0 }
 0x30d   : > { %v5896_v47 = vadd.f32 %v5888_v48, %v5880_v27  ;;  %v5878_v22 = vadd.f32 %v6737_v26, %v5863_v54  ;;  %v5866_v43 = vmul.f32 %v7327_v3, %v6736_v16 }
 0x30e   : > { %v5828_v29 = vpop.f32.mrf.mxu0 }
 0x30f   : > { %v5904_v33 = vmax.f32 %v5896_v47, 0.0  ;;  %v5894_v55 = vadd.f32 %v5886_v4, %v5878_v22  ;;  %v5881_v30 = vadd.f32 %v6737_v26, %v5866_v43  ;;  %v5864_v23 = vmul.f32 %v6736_v16, %v5828_v29 }
 0x311   : > { %5912 = vst [vmem:[%s9780_s30 + $0x10] sm:$0xff] %v5904_v33  ;;  %v5902_v58 = vmax.f32 %v5894_v55, 0.0  ;;  %v5897_v42 = vadd.f32 %v5889_v38, %v5881_v30  ;;  %v5879_v45 = vadd.f32 %v6737_v26, %v5864_v23 }
 0x313   : > { %5910 = vst [vmem:[%s9780_s30] sm:$0xff] %v5902_v58  ;;  %v5905_v24 = vmax.f32 %v5897_v42, 0.0  ;;  %v5895_v19 = vadd.f32 %v5887_v50, %v5879_v45 }
 0x315   : > { %5913 = vst [vmem:[%s9780_s30 + $0x18] sm:$0xff] %v5905_v24  ;;  %v5903_v10 = vmax.f32 %v5895_v19, 0.0 }
 0x317   : > { %5911 = vst [vmem:[%s9780_s30 + $0x8] sm:$0xff] %v5903_v10 }
 0x321   : > { %v7330_v2 = vpop.f32.mrf.mxu1 }
 0x322   : > { %v5869_v61 = vmul.f32 %v7330_v2, %v6736_v16 }
 0x323   : > { %v5841_v32 = vpop.f32.mrf.mxu1 }
 0x324   : > { %v5884_v49 = vadd.f32 %v6737_v26, %v5869_v61  ;;  %v5867_v63 = vmul.f32 %v6736_v16, %v5841_v32 }
 0x325   : > { %v7331_v15 = vpop.f32.mrf.mxu1 }
 0x326   : > { %v5900_v59 = vadd.f32 %v5892_v37, %v5884_v49  ;;  %v5882_v14 = vadd.f32 %v6737_v26, %v5867_v63  ;;  %v5870_v53 = vmul.f32 %v7331_v15, %v6736_v16 }
 0x327   : > { %v5844_v31 = vpop.f32.mrf.mxu1 }
 0x328   : > { %v5908_v18 = vmax.f32 %v5900_v59, 0.0  ;;  %v5898_v44 = vadd.f32 %v5890_v57, %v5882_v14  ;;  %v5885_v39 = vadd.f32 %v6737_v26, %v5870_v53  ;;  %v5868_v17 = vmul.f32 %v6736_v16, %v5844_v31 }
 0x32a   : > { %5916 = vst [vmem:[%s9780_s30 + $0x30] sm:$0xff] %v5908_v18  ;;  %v5906_v41 = vmax.f32 %v5898_v44, 0.0  ;;  %v5901_v9 = vadd.f32 %v5893_v25, %v5885_v39  ;;  %v5883_v60 = vadd.f32 %v6737_v26, %v5868_v17 }
 0x32c   : > { %5914 = vst [vmem:[%s9780_s30 + $0x20] sm:$0xff] %v5906_v41  ;;  %v5909_v1 = vmax.f32 %v5901_v9, 0.0  ;;  %v5899_v7 = vadd.f32 %v5891_v20, %v5883_v60 }
 0x32e   : > { %5917 = vst [vmem:[%s9780_s30 + $0x38] sm:$0xff] %v5909_v1  ;;  %v5907_v12 = vmax.f32 %v5899_v7, 0.0 }
 0x330   : > { %5915 = vst [vmem:[%s9780_s30 + $0x28] sm:$0xff] %v5907_v12 }
 0x331 PF: > { %s20_s17 = sadd.s32 1, %s7846_s17   ;;  %s9922_s13 = smov %s7838_s15 }
 0x332   : > { %p17_p10 = scmp.ge.s32.totalorder %s20_s17, 18   ;;  %s9923_s14 = smov %s7842_s16 }
 0x333   : > { %s9924_s15 = smov %s9927_s18  ;;  %s9925_s16 = smov %s9931_s19 }
 0x334   :  { %19 = sbr.rel (!%p17_p10) target bundleno = 3 (0x3), region = 105 }

</bundles_post_ra>
